<compile_context>
chip_gen: v6e
topology: v6e:2x2x1
jax: 0.10.0
libtpu: 0.0.40
codegen_flags: <defaults>
</compile_context>

<pallas_src>
import jax
import jax.numpy as jnp
from jax import lax
from jax.experimental import pallas as pl
from jax.experimental.pallas import tpu as pltpu

ATOM_DIMS = 8          # self.D
KNN_K = 17             # self.k (self + 16 neighbors)
N_LAYERS = 3           # self.n_layers
NEG_SLOPE = 0.2        # LeakyReLU slope
GN_GROUPS = 2          # GroupNorm(2, D)
GN_EPS = 1e-5
BIG = 1e10             # cross-batch / already-selected distance sentinel
VMEM_LIMIT = 32 * 1024 * 1024
NB_DTYPE = jnp.bfloat16   # neighbor-stream dtype (set to jnp.float32 for exact numerics)


def _leaky_relu(v):
    return jnp.where(v > 0, v, NEG_SLOPE * v)


def _round_up(a, b):
    return (a + b - 1) // b * b


# --------------------------------------------------------------------------
# Kernel 1: tiled batch-masked pairwise distances fused with streaming top-K.
# Scalar-prefetched per-tile batch ranges let us skip pure cross-batch tiles.
# --------------------------------------------------------------------------
def _knn_kernel(rmin_ref, rmax_ref, cmin_ref, cmax_ref,      # SMEM (scalar prefetch)
                x_ref, yt_ref, xb_ref, yb_ref,               # VMEM inputs
                vals_ref, idx_ref,                           # outputs (written at last j)
                vstate_ref, istate_ref):                     # VMEM scratch (running top-K)
    i = pl.program_id(0)
    j = pl.program_id(1)
    nj = pl.num_programs(1)
    TM = x_ref.shape[0]
    TN = yt_ref.shape[1]

    @pl.when(j == 0)
    def _init():
        vstate_ref[...] = jnp.full(vstate_ref.shape, BIG, jnp.float32)
        istate_ref[...] = jnp.zeros(istate_ref.shape, jnp.float32)

    # skip candidate tiles whose batch-id range cannot overlap this row tile's
    overlap = jnp.logical_and(rmin_ref[i] <= cmax_ref[j], cmin_ref[j] <= rmax_ref[i])

    @pl.when(overlap)
    def _select():
        x = x_ref[...]                      # (TM, 3)
        yt = yt_ref[...]                    # (3, TN)
        same = xb_ref[...] == yb_ref[...]   # (TM, 1) == (1, TN) -> (TM, TN)

        # exact squared distance per coordinate (no xx+yy-2xy cancellation)
        d2 = jnp.zeros((TM, TN), jnp.float32)
        for c in range(3):
            diff = x[:, c:c + 1] - yt[c:c + 1, :]
            d2 = d2 + diff * diff
        work = jnp.where(same, d2, jnp.float32(BIG))

        # global column index kept as a (1, TN) row (f32, exact for < 2^24 points)
        col = (j * TN + lax.broadcasted_iota(jnp.int32, (1, TN), 1)).astype(jnp.float32)
        kio = lax.broadcasted_iota(jnp.int32, (TM, KNN_K), 1)

        # --- stage 1: K smallest within this tile (ascending, tie-break smallest col)
        t_vals = jnp.full((TM, KNN_K), BIG, jnp.float32)
        t_idxf = jnp.zeros((TM, KNN_K), jnp.float32)
        for t in range(KNN_K):
            mn = jnp.min(work, axis=-1, keepdims=True)                     # (TM, 1)
            sel = jnp.min(jnp.where(work <= mn, col, jnp.float32(BIG)),
                          axis=-1, keepdims=True)                          # (TM, 1)
            work = jnp.where(col == sel, jnp.float32(BIG), work)           # unique col ids
            t_vals = jnp.where(kio == t, mn, t_vals)
            t_idxf = jnp.where(kio == t, sel, t_idxf)

        # --- stage 2: merge with running best (2K candidates -> K smallest, sorted)
        c_vals = jnp.concatenate([vstate_ref[...], t_vals], axis=-1)       # (TM, 2K)
        c_idxf = jnp.concatenate([istate_ref[...], t_idxf], axis=-1)       # (TM, 2K)
        n_vals = jnp.full((TM, KNN_K), BIG, jnp.float32)
        n_idxf = jnp.zeros((TM, KNN_K), jnp.float32)
        for t in range(KNN_K):
            mn = jnp.min(c_vals, axis=-1, keepdims=True)
            sel = jnp.min(jnp.where(c_vals <= mn, c_idxf, jnp.float32(BIG)),
                          axis=-1, keepdims=True)
            c_vals = jnp.where(c_idxf == sel, jnp.float32(BIG), c_vals)
            n_vals = jnp.where(kio == t, mn, n_vals)
            n_idxf = jnp.where(kio == t, sel, n_idxf)

        vstate_ref[...] = n_vals
        istate_ref[...] = n_idxf

    @pl.when(j == nj - 1)
    def _flush():
        vals_ref[...] = vstate_ref[...]
        idx_ref[...] = istate_ref[...].astype(jnp.int32)


def knn_topk(x, y, x_batch, y_batch):
    """k nearest same-batch neighbors (ascending squared distance), K=17."""
    N, M = x.shape[0], y.shape[0]
    TM = min(64, _round_up(N, 8))
    TN = min(256, _round_up(M, 128))
    N_pad = _round_up(N, TM)
    M_pad = _round_up(M, TN)
    n_i, n_j = N_pad // TM, M_pad // TN

    x_p = jnp.zeros((N_pad, 3), jnp.float32).at[:N].set(x.astype(jnp.float32))
    y_p = jnp.zeros((M_pad, 3), jnp.float32).at[:M].set(y.astype(jnp.float32))
    xb_flat = jnp.full((N_pad,), -2, jnp.int32).at[:N].set(x_batch.astype(jnp.int32))
    yb_flat = jnp.full((M_pad,), -1, jnp.int32).at[:M].set(y_batch.astype(jnp.int32))
    xb_p = xb_flat[:, None]                                  # (N_pad, 1)
    yb_p = yb_flat[None, :]                                  # (1, M_pad)
    yt_p = y_p.T                                             # (3, M_pad)

    # per-tile batch-id ranges (scalar prefetch) used to skip cross-batch tiles
    rmin = xb_flat.reshape(n_i, TM).min(axis=1)
    rmax = xb_flat.reshape(n_i, TM).max(axis=1)
    cmin = yb_flat.reshape(n_j, TN).min(axis=1)
    cmax = yb_flat.reshape(n_j, TN).max(axis=1)

    grid_spec = pltpu.PrefetchScalarGridSpec(
        num_scalar_prefetch=4,
        grid=(n_i, n_j),
        in_specs=[pl.BlockSpec((TM, 3), lambda i, j, *_: (i, 0)),
                  pl.BlockSpec((3, TN), lambda i, j, *_: (0, j)),
                  pl.BlockSpec((TM, 1), lambda i, j, *_: (i, 0)),
                  pl.BlockSpec((1, TN), lambda i, j, *_: (0, j))],
        out_specs=(pl.BlockSpec((TM, KNN_K), lambda i, j, *_: (i, 0)),
                   pl.BlockSpec((TM, KNN_K), lambda i, j, *_: (i, 0))),
        scratch_shapes=[pltpu.VMEM((TM, KNN_K), jnp.float32),
                        pltpu.VMEM((TM, KNN_K), jnp.float32)],
    )
    vals, idx = pl.pallas_call(
        _knn_kernel,
        out_shape=(jax.ShapeDtypeStruct((N_pad, KNN_K), jnp.float32),
                   jax.ShapeDtypeStruct((N_pad, KNN_K), jnp.int32)),
        grid_spec=grid_spec,
        compiler_params=pltpu.CompilerParams(
            dimension_semantics=("parallel", "arbitrary"),
            vmem_limit_bytes=VMEM_LIMIT),
    )(rmin, rmax, cmin, cmax, x_p, yt_p, xb_p, yb_p)
    return vals[:N], idx[:N]


# --------------------------------------------------------------------------
# Kernel 2: one message-passing layer, lane-dense (points on the lane axis)
#   h_j = W1s@self + W1n@nb_j + w1d*dist_j + b1 ; msg = W2@sum_j leaky(h_j) + k*b2
#   out += leaky(GroupNorm(2, D)(msg))
# --------------------------------------------------------------------------
def _mp_layer_kernel(out_ref, nb_ref, dist_ref, w1s_ref, w1n_ref, w1d_ref, b1_ref,
                     w2_ref, b2_ref, gamma_ref, beta_ref, avg_ref, new_ref):
    kn = nb_ref.shape[0]
    out_t = out_ref[...]                                       # (D, TM) f32

    # self contribution, shared across all k neighbor slots
    h_self = (jnp.dot(w1s_ref[...], out_t, preferred_element_type=jnp.float32)
              + b1_ref[...])                                   # (F, TM)

    # neighbor contribution: ONE batched matmul over the k axis (bf16 in, f32 acc)
    nb = nb_ref[...]                                           # (k, D, TM)
    w1n_b = jnp.broadcast_to(w1n_ref[...], (kn,) + w1n_ref.shape).astype(nb.dtype)
    hn = jnp.einsum('kfd,kdt->kft', w1n_b, nb,
                    preferred_element_type=jnp.float32)        # (k, F, TM)

    h = (hn + h_self[None, :, :]
         + w1d_ref[...][None, :, :] * dist_ref[...][:, None, :])
    hsum = jnp.sum(_leaky_relu(h), axis=0)                     # (F, TM)

    m = (jnp.dot(w2_ref[...], hsum, preferred_element_type=jnp.float32)
         + float(kn) * b2_ref[...])                            # (D, TM)

    # GroupNorm(2, D) over channels (sublanes) per point (lane) via a tiny
    # precomputed block-diagonal averaging matmul (avg is a constant input).
    avg = avg_ref[...]
    mu = jnp.dot(avg, m, preferred_element_type=jnp.float32)
    var = jnp.dot(avg, (m - mu) ** 2, preferred_element_type=jnp.float32)
    gn = (m - mu) * lax.rsqrt(var + GN_EPS) * gamma_ref[...] + beta_ref[...]

    new_ref[...] = out_t + _leaky_relu(gn)


def mp_layer(out_t, neigh_kdn, dist_t, avg, params, tm):
    D, Np = out_t.shape
    kn = neigh_kdn.shape[0]
    F = 2 * D + 1
    w1s, w1n, w1d, b1, w2, b2, gamma, beta = params
    const = lambda i: (0, 0)
    return pl.pallas_call(
        _mp_layer_kernel,
        out_shape=jax.ShapeDtypeStruct((D, Np), jnp.float32),
        grid=(Np // tm,),
        in_specs=[pl.BlockSpec((D, tm), lambda i: (0, i)),
                  pl.BlockSpec((kn, D, tm), lambda i: (0, 0, i)),
                  pl.BlockSpec((kn, tm), lambda i: (0, i)),
                  pl.BlockSpec((F, D), const),
                  pl.BlockSpec((F, D), const),
                  pl.BlockSpec((F, 1), const),
                  pl.BlockSpec((F, 1), const),
                  pl.BlockSpec((D, F), const),
                  pl.BlockSpec((D, 1), const),
                  pl.BlockSpec((D, 1), const),
                  pl.BlockSpec((D, 1), const),
                  pl.BlockSpec((D, D), const)],
        out_specs=pl.BlockSpec((D, tm), lambda i: (0, i)),
        compiler_params=pltpu.CompilerParams(
            dimension_semantics=("parallel",),
            vmem_limit_bytes=VMEM_LIMIT),
    )(out_t, neigh_kdn, dist_t, w1s, w1n, w1d, b1, w2, b2, gamma, beta, avg)


# --------------------------------------------------------------------------
# Full forward pass (knn_atoms + 3 message-passing layers)
# --------------------------------------------------------------------------
def atom_atom_embedding_mp_forward(x, y, y_atomtypes, x_batch, y_batch, params_list):
    N = x.shape[0]
    D = y_atomtypes.shape[1]
    assert y.shape[0] == N and y_atomtypes.shape[0] == N, \
        "module semantics require x and y to be the same atom cloud"

    # NOTE: like the reference, assumes every batch has >= KNN_K same-batch points.
    dists, idx = knn_topk(x, y, x_batch, y_batch)       # (N, 17), ascending
    idx = jnp.clip(idx[:, 1:], 0, N - 1)                # drop self (rank 0)
    dists = dists[:, 1:].astype(jnp.float32)            # (N, 16)

    # lane-dense padding of the point axis; large tile (step-overhead amortized)
    TM = min(1024, _round_up(N, 128))
    Np = _round_up(N, TM)
    pad = Np - N
    out_pad = jnp.pad(y_atomtypes.astype(jnp.float32), ((0, pad), (0, 0)))   # (Np, D)
    idx_pad = jnp.pad(idx, ((0, pad), (0, 0)))
    dist_pad = jnp.pad(dists, ((0, pad), (0, 0)))
    dist_t = dist_pad.T                                  # (k, Np), reused by all layers

    # GroupNorm(2, D) block-diagonal averaging matrix, built once (hoisted)
    gsize = D // GN_GROUPS
    rg = jnp.arange(D)[:, None] // gsize
    cg = jnp.arange(D)[None, :] // gsize
    avg = jnp.where(rg == cg, 1.0 / gsize, 0.0).astype(jnp.float32)          # (D, D)

    for params in params_list:
        # XLA gather + layout transpose of the neighbor stream, at reduced precision
        neigh = jnp.take(out_pad.astype(NB_DTYPE), idx_pad, axis=0)          # (Np, k, D)
        neigh_kdn = jnp.transpose(neigh, (1, 2, 0))                          # (k, D, Np)
        new_t = mp_layer(out_pad.T, neigh_kdn, dist_t, avg, params, TM)      # (D, Np)
        out_pad = new_t.T
    return out_pad[:N]


# --------------------------------------------------------------------------
# Parameters + pure-JAX reference for validation
# --------------------------------------------------------------------------
def init_params(key, D=ATOM_DIMS, n_layers=N_LAYERS):
    F = 2 * D + 1
    params = []
    for i in range(n_layers):
        ks = jax.random.split(jax.random.fold_in(key, i), 6)
        w1 = 0.2 * jax.random.normal(ks[0], (F, F), jnp.float32)  # acts on [self|neigh|dist]
        b1 = 0.1 * jax.random.normal(ks[1], (F, 1), jnp.float32)
        w2 = 0.2 * jax.random.normal(ks[2], (D, F), jnp.float32)
        b2 = 0.1 * jax.random.normal(ks[3], (D, 1), jnp.float32)
        gamma = 1.0 + 0.1 * jax.random.normal(ks[4], (D, 1), jnp.float32)
        beta = 0.1 * jax.random.normal(ks[5], (D, 1), jnp.float32)
        w1s, w1n, w1d = w1[:, :D], w1[:, D:2 * D], w1[:, 2 * D:2 * D + 1]
        params.append((w1s, w1n, w1d, b1, w2, b2, gamma, beta))
    return params


def reference_forward(x, y, y_atomtypes, x_batch, y_batch, params_list):
    N = x.shape[0]
    d2 = jnp.sum((x[:, None, :].astype(jnp.float32)
                  - y[None, :, :].astype(jnp.float32)) ** 2, axis=-1)
    d2 = jnp.where(x_batch[:, None] == y_batch[None, :], d2, jnp.float32(BIG))
    neg_vals, idx = jax.lax.top_k(-d2, KNN_K)
    dists = -neg_vals
    idx = idx[:, 1:]
    dists = dists[:, 1:]
    out = y_atomtypes.astype(jnp.float32)
    for (w1s, w1n, w1d, b1, w2, b2, gamma, beta) in params_list:
        nb = out[idx]                                           # (N, k, D)
        h = (jnp.einsum('fd,nd->nf', w1s, out)[:, None, :]
             + jnp.einsum('fd,nkd->nkf', w1n, nb)
             + dists[:, :, None] * w1d[:, 0]
             + b1[:, 0])
        h = jnp.where(h > 0, h, NEG_SLOPE * h)
        msg = jnp.einsum('df,nkf->nkd', w2, h) + b2[:, 0]
        m = msg.sum(axis=1)                                     # (N, D)
        mg = m.reshape(N, GN_GROUPS, -1)
        mu = mg.mean(axis=-1, keepdims=True)
        var = ((mg - mu) ** 2).mean(axis=-1, keepdims=True)
        gn = ((mg - mu) * jax.lax.rsqrt(var + GN_EPS)).reshape(N, -1)
        gn = gn * gamma[:, 0] + beta[:, 0]
        out = out + jnp.where(gn > 0, gn, NEG_SLOPE * gn)
    return out


if __name__ == "__main__":
    key = jax.random.PRNGKey(0)
    kx, kt, kp = jax.random.split(key, 3)

    n_batches = 2
    pts_per_batch = 20            # >= KNN_K so every point has 17 same-batch neighbors
    N = n_batches * pts_per_batch
    D = ATOM_DIMS

    coords = 3.0 * jax.random.normal(kx, (N, 3), jnp.float32)     # atom xyz
    atomtypes = jax.random.normal(kt, (N, D), jnp.float32)        # y_atomtypes
    batch = jnp.repeat(jnp.arange(n_batches, dtype=jnp.int32), pts_per_batch)

    params = init_params(kp, D=D)

    out = atom_atom_embedding_mp_forward(coords, coords, atomtypes, batch, batch, params)
    out = jax.block_until_ready(out)

    assert out.shape == (N, D)
    assert bool(jnp.all(jnp.isfinite(out)))

    ref = reference_forward(coords, coords, atomtypes, batch, batch, params)
    # tolerance accounts for the bf16 neighbor stream (f32 accumulation everywhere)
    assert bool(jnp.allclose(out, ref, rtol=5e-2, atol=5e-2)), \
        float(jnp.max(jnp.abs(out - ref)))
    print("KERNEL_OK")
</pallas_src>

<mosaic_0001>
module attributes {stable_mosaic.version = 11 : i64} {
  func.func @_knn_kernel(%arg0: i32, %arg1: i32, %arg2: memref<1xi32, #tpu.memory_space<smem>>, %arg3: memref<1xi32, #tpu.memory_space<smem>>, %arg4: memref<1xi32, #tpu.memory_space<smem>>, %arg5: memref<1xi32, #tpu.memory_space<smem>>, %arg6: memref<40x3xf32, #tpu.memory_space<vmem>>, %arg7: memref<3x128xf32, #tpu.memory_space<vmem>>, %arg8: memref<40x1xi32, #tpu.memory_space<vmem>>, %arg9: memref<1x128xi32, #tpu.memory_space<vmem>>, %arg10: memref<40x17xf32, #tpu.memory_space<vmem>>, %arg11: memref<40x17xi32, #tpu.memory_space<vmem>>, %arg12: memref<40x17xf32, #tpu.memory_space<vmem>>, %arg13: memref<40x17xf32, #tpu.memory_space<vmem>>) attributes {dimension_semantics = [#tpu.dimension_semantics<parallel>, #tpu.dimension_semantics<arbitrary>], iteration_bounds = array<i64: 1, 1>, scalar_prefetch = 4 : i64, scratch_operands = 2 : i64, tpu.core_type = #tpu.core_type<tc>, window_params = [{transform_indices = @transform_0, window_bounds = array<i64: 40, 3>}, {transform_indices = @transform_1, window_bounds = array<i64: 3, 128>}, {transform_indices = @transform_2, window_bounds = array<i64: 40, 1>}, {transform_indices = @transform_3, window_bounds = array<i64: 1, 128>}, {transform_indices = @transform_4, window_bounds = array<i64: 40, 17>}, {transform_indices = @transform_5, window_bounds = array<i64: 40, 17>}]} {
    %c0_i32 = arith.constant 0 : i32
    %0 = arith.cmpi eq, %arg1, %c0_i32 : i32
    %1 = arith.extui %0 : i1 to i32
    %c0_i32_0 = arith.constant 0 : i32
    %2 = arith.cmpi ne, %1, %c0_i32_0 : i32
    scf.if %2 {
      %cst = arith.constant 1.000000e+10 : f32
      %19 = vector.broadcast %cst : f32 to vector<40x17xf32>
      %c0 = arith.constant 0 : index
      %c0_4 = arith.constant 0 : index
      %20 = vector.load %arg12[%c0, %c0_4] : memref<40x17xf32, #tpu.memory_space<vmem>>, vector<40x17xf32>
      tpu.vector_store %arg12[%c0, %c0_4], %19 {strides = array<i32>} : memref<40x17xf32, #tpu.memory_space<vmem>>, vector<40x17xf32>,
      %cst_5 = arith.constant 0.000000e+00 : f32
      %21 = vector.broadcast %cst_5 : f32 to vector<40x17xf32>
      %c0_6 = arith.constant 0 : index
      %c0_7 = arith.constant 0 : index
      %22 = vector.load %arg13[%c0_6, %c0_7] : memref<40x17xf32, #tpu.memory_space<vmem>>, vector<40x17xf32>
      tpu.vector_store %arg13[%c0_6, %c0_7], %21 {strides = array<i32>} : memref<40x17xf32, #tpu.memory_space<vmem>>, vector<40x17xf32>,
    } else {
    }
    %3 = arith.index_cast %arg0 : i32 to index
    %4 = memref.load %arg2[%3] : memref<1xi32, #tpu.memory_space<smem>>
    %5 = arith.index_cast %arg1 : i32 to index
    %6 = memref.load %arg5[%5] : memref<1xi32, #tpu.memory_space<smem>>
    %7 = arith.cmpi sle, %4, %6 : i32
    %8 = arith.index_cast %arg1 : i32 to index
    %9 = memref.load %arg4[%8] : memref<1xi32, #tpu.memory_space<smem>>
    %10 = arith.index_cast %arg0 : i32 to index
    %11 = memref.load %arg3[%10] : memref<1xi32, #tpu.memory_space<smem>>
    %12 = arith.cmpi sle, %9, %11 : i32
    %13 = arith.andi %7, %12 : i1
    %14 = arith.extui %13 : i1 to i32
    %c0_i32_1 = arith.constant 0 : i32
    %15 = arith.cmpi ne, %14, %c0_i32_1 : i32
    scf.if %15 {
      %c0 = arith.constant 0 : index
      %c0_4 = arith.constant 0 : index
      %19 = vector.load %arg6[%c0, %c0_4] : memref<40x3xf32, #tpu.memory_space<vmem>>, vector<40x3xf32>
      %c0_5 = arith.constant 0 : index
      %c0_6 = arith.constant 0 : index
      %20 = vector.load %arg7[%c0_5, %c0_6] : memref<3x128xf32, #tpu.memory_space<vmem>>, vector<3x128xf32>
      %c0_7 = arith.constant 0 : index
      %c0_8 = arith.constant 0 : index
      %21 = vector.load %arg8[%c0_7, %c0_8] : memref<40x1xi32, #tpu.memory_space<vmem>>, vector<40x1xi32>
      %c0_9 = arith.constant 0 : index
      %c0_10 = arith.constant 0 : index
      %22 = vector.load %arg9[%c0_9, %c0_10] : memref<1x128xi32, #tpu.memory_space<vmem>>, vector<1x128xi32>
      %23 = vector.broadcast %21 : vector<40x1xi32> to vector<40x128xi32>
      %24 = vector.broadcast %22 : vector<1x128xi32> to vector<40x128xi32>
      %25 = arith.cmpi eq, %23, %24 : vector<40x128xi32>
      %cst = arith.constant 0.000000e+00 : f32
      %26 = vector.broadcast %cst : f32 to vector<40x128xf32>
      %27 = vector.extract_strided_slice %19 {offsets = [0, 0], sizes = [40, 1], strides = [1, 1]} : vector<40x3xf32> to vector<40x1xf32>
      %28 = vector.extract_strided_slice %20 {offsets = [0, 0], sizes = [1, 128], strides = [1, 1]} : vector<3x128xf32> to vector<1x128xf32>
      %29 = vector.broadcast %27 : vector<40x1xf32> to vector<40x128xf32>
      %30 = vector.broadcast %28 : vector<1x128xf32> to vector<40x128xf32>
      %31 = arith.subf %29, %30 : vector<40x128xf32>
      %32 = arith.mulf %31, %31 : vector<40x128xf32>
      %33 = arith.addf %26, %32 : vector<40x128xf32>
      %34 = vector.extract_strided_slice %19 {offsets = [0, 1], sizes = [40, 1], strides = [1, 1]} : vector<40x3xf32> to vector<40x1xf32>
      %35 = vector.extract_strided_slice %20 {offsets = [1, 0], sizes = [1, 128], strides = [1, 1]} : vector<3x128xf32> to vector<1x128xf32>
      %36 = vector.broadcast %34 : vector<40x1xf32> to vector<40x128xf32>
      %37 = vector.broadcast %35 : vector<1x128xf32> to vector<40x128xf32>
      %38 = arith.subf %36, %37 : vector<40x128xf32>
      %39 = arith.mulf %38, %38 : vector<40x128xf32>
      %40 = arith.addf %33, %39 : vector<40x128xf32>
      %41 = vector.extract_strided_slice %19 {offsets = [0, 2], sizes = [40, 1], strides = [1, 1]} : vector<40x3xf32> to vector<40x1xf32>
      %42 = vector.extract_strided_slice %20 {offsets = [2, 0], sizes = [1, 128], strides = [1, 1]} : vector<3x128xf32> to vector<1x128xf32>
      %43 = vector.broadcast %41 : vector<40x1xf32> to vector<40x128xf32>
      %44 = vector.broadcast %42 : vector<1x128xf32> to vector<40x128xf32>
      %45 = arith.subf %43, %44 : vector<40x128xf32>
      %46 = arith.mulf %45, %45 : vector<40x128xf32>
      %47 = arith.addf %40, %46 : vector<40x128xf32>
      %cst_11 = arith.constant 1.000000e+10 : f32
      %48 = vector.broadcast %cst_11 : f32 to vector<40x128xf32>
      %49 = arith.select %25, %47, %48 : vector<40x128xi1>, vector<40x128xf32>
      %c128_i32 = arith.constant 128 : i32
      %50 = arith.muli %arg1, %c128_i32 : i32
      %51 = tpu.iota {dimensions = array<i32: 1>} : vector<1x128xi32>
      %52 = vector.broadcast %50 : i32 to vector<1x128xi32>
      %53 = arith.addi %52, %51 : vector<1x128xi32>
      %54 = arith.sitofp %53 : vector<1x128xi32> to vector<1x128xf32>
      %55 = tpu.iota {dimensions = array<i32: 1>} : vector<40x17xi32>
      %cst_12 = arith.constant 1.000000e+10 : f32
      %56 = vector.broadcast %cst_12 : f32 to vector<40x17xf32>
      %cst_13 = arith.constant 0.000000e+00 : f32
      %57 = vector.broadcast %cst_13 : f32 to vector<40x17xf32>
      %cst_14 = arith.constant dense<0x7F800000> : vector<40xf32>
      %58 = vector.multi_reduction <minimumf>, %49, %cst_14 [1] : vector<40x128xf32> to vector<40xf32>
      %59 = vector.shape_cast %58 : vector<40xf32> to vector<40x1xf32>
      %60 = vector.broadcast %59 : vector<40x1xf32> to vector<40x128xf32>
      %61 = arith.cmpf ole, %49, %60 : vector<40x128xf32>
      %cst_15 = arith.constant 1.000000e+10 : f32
      %62 = vector.shape_cast %54 : vector<1x128xf32> to vector<1x128xf32>
      %63 = vector.broadcast %62 : vector<1x128xf32> to vector<40x128xf32>
      %64 = vector.broadcast %cst_15 : f32 to vector<40x128xf32>
      %65 = arith.select %61, %63, %64 : vector<40x128xi1>, vector<40x128xf32>
      %cst_16 = arith.constant dense<0x7F800000> : vector<40xf32>
      %66 = vector.multi_reduction <minimumf>, %65, %cst_16 [1] : vector<40x128xf32> to vector<40xf32>
      %67 = vector.shape_cast %66 : vector<40xf32> to vector<40x1xf32>
      %68 = vector.broadcast %54 : vector<1x128xf32> to vector<40x128xf32>
      %69 = vector.broadcast %67 : vector<40x1xf32> to vector<40x128xf32>
      %70 = arith.cmpf oeq, %68, %69 : vector<40x128xf32>
      %cst_17 = arith.constant 1.000000e+10 : f32
      %71 = vector.broadcast %cst_17 : f32 to vector<40x128xf32>
      %72 = arith.select %70, %71, %49 : vector<40x128xi1>, vector<40x128xf32>
      %c0_i32_18 = arith.constant 0 : i32
      %73 = vector.broadcast %c0_i32_18 : i32 to vector<40x17xi32>
      %74 = arith.cmpi eq, %55, %73 : vector<40x17xi32>
      %75 = vector.shape_cast %59 : vector<40x1xf32> to vector<40x1xf32>
      %76 = vector.broadcast %75 : vector<40x1xf32> to vector<40x17xf32>
      %77 = arith.select %74, %76, %56 : vector<40x17xi1>, vector<40x17xf32>
      %c0_i32_19 = arith.constant 0 : i32
      %78 = vector.broadcast %c0_i32_19 : i32 to vector<40x17xi32>
      %79 = arith.cmpi eq, %55, %78 : vector<40x17xi32>
      %80 = vector.shape_cast %67 : vector<40x1xf32> to vector<40x1xf32>
      %81 = vector.broadcast %80 : vector<40x1xf32> to vector<40x17xf32>
      %82 = arith.select %79, %81, %57 : vector<40x17xi1>, vector<40x17xf32>
      %cst_20 = arith.constant dense<0x7F800000> : vector<40xf32>
      %83 = vector.multi_reduction <minimumf>, %72, %cst_20 [1] : vector<40x128xf32> to vector<40xf32>
      %84 = vector.shape_cast %83 : vector<40xf32> to vector<40x1xf32>
      %85 = vector.broadcast %84 : vector<40x1xf32> to vector<40x128xf32>
      %86 = arith.cmpf ole, %72, %85 : vector<40x128xf32>
      %cst_21 = arith.constant 1.000000e+10 : f32
      %87 = vector.shape_cast %54 : vector<1x128xf32> to vector<1x128xf32>
      %88 = vector.broadcast %87 : vector<1x128xf32> to vector<40x128xf32>
      %89 = vector.broadcast %cst_21 : f32 to vector<40x128xf32>
      %90 = arith.select %86, %88, %89 : vector<40x128xi1>, vector<40x128xf32>
      %cst_22 = arith.constant dense<0x7F800000> : vector<40xf32>
      %91 = vector.multi_reduction <minimumf>, %90, %cst_22 [1] : vector<40x128xf32> to vector<40xf32>
      %92 = vector.shape_cast %91 : vector<40xf32> to vector<40x1xf32>
      %93 = vector.broadcast %54 : vector<1x128xf32> to vector<40x128xf32>
      %94 = vector.broadcast %92 : vector<40x1xf32> to vector<40x128xf32>
      %95 = arith.cmpf oeq, %93, %94 : vector<40x128xf32>
      %cst_23 = arith.constant 1.000000e+10 : f32
      %96 = vector.broadcast %cst_23 : f32 to vector<40x128xf32>
      %97 = arith.select %95, %96, %72 : vector<40x128xi1>, vector<40x128xf32>
      %c1_i32 = arith.constant 1 : i32
      %98 = vector.broadcast %c1_i32 : i32 to vector<40x17xi32>
      %99 = arith.cmpi eq, %55, %98 : vector<40x17xi32>
      %100 = vector.shape_cast %84 : vector<40x1xf32> to vector<40x1xf32>
      %101 = vector.broadcast %100 : vector<40x1xf32> to vector<40x17xf32>
      %102 = arith.select %99, %101, %77 : vector<40x17xi1>, vector<40x17xf32>
      %c1_i32_24 = arith.constant 1 : i32
      %103 = vector.broadcast %c1_i32_24 : i32 to vector<40x17xi32>
      %104 = arith.cmpi eq, %55, %103 : vector<40x17xi32>
      %105 = vector.shape_cast %92 : vector<40x1xf32> to vector<40x1xf32>
      %106 = vector.broadcast %105 : vector<40x1xf32> to vector<40x17xf32>
      %107 = arith.select %104, %106, %82 : vector<40x17xi1>, vector<40x17xf32>
      %cst_25 = arith.constant dense<0x7F800000> : vector<40xf32>
      %108 = vector.multi_reduction <minimumf>, %97, %cst_25 [1] : vector<40x128xf32> to vector<40xf32>
      %109 = vector.shape_cast %108 : vector<40xf32> to vector<40x1xf32>
      %110 = vector.broadcast %109 : vector<40x1xf32> to vector<40x128xf32>
      %111 = arith.cmpf ole, %97, %110 : vector<40x128xf32>
      %cst_26 = arith.constant 1.000000e+10 : f32
      %112 = vector.shape_cast %54 : vector<1x128xf32> to vector<1x128xf32>
      %113 = vector.broadcast %112 : vector<1x128xf32> to vector<40x128xf32>
      %114 = vector.broadcast %cst_26 : f32 to vector<40x128xf32>
      %115 = arith.select %111, %113, %114 : vector<40x128xi1>, vector<40x128xf32>
      %cst_27 = arith.constant dense<0x7F800000> : vector<40xf32>
      %116 = vector.multi_reduction <minimumf>, %115, %cst_27 [1] : vector<40x128xf32> to vector<40xf32>
      %117 = vector.shape_cast %116 : vector<40xf32> to vector<40x1xf32>
      %118 = vector.broadcast %54 : vector<1x128xf32> to vector<40x128xf32>
      %119 = vector.broadcast %117 : vector<40x1xf32> to vector<40x128xf32>
      %120 = arith.cmpf oeq, %118, %119 : vector<40x128xf32>
      %cst_28 = arith.constant 1.000000e+10 : f32
      %121 = vector.broadcast %cst_28 : f32 to vector<40x128xf32>
      %122 = arith.select %120, %121, %97 : vector<40x128xi1>, vector<40x128xf32>
      %c2_i32 = arith.constant 2 : i32
      %123 = vector.broadcast %c2_i32 : i32 to vector<40x17xi32>
      %124 = arith.cmpi eq, %55, %123 : vector<40x17xi32>
      %125 = vector.shape_cast %109 : vector<40x1xf32> to vector<40x1xf32>
      %126 = vector.broadcast %125 : vector<40x1xf32> to vector<40x17xf32>
      %127 = arith.select %124, %126, %102 : vector<40x17xi1>, vector<40x17xf32>
      %c2_i32_29 = arith.constant 2 : i32
      %128 = vector.broadcast %c2_i32_29 : i32 to vector<40x17xi32>
      %129 = arith.cmpi eq, %55, %128 : vector<40x17xi32>
      %130 = vector.shape_cast %117 : vector<40x1xf32> to vector<40x1xf32>
      %131 = vector.broadcast %130 : vector<40x1xf32> to vector<40x17xf32>
      %132 = arith.select %129, %131, %107 : vector<40x17xi1>, vector<40x17xf32>
      %cst_30 = arith.constant dense<0x7F800000> : vector<40xf32>
      %133 = vector.multi_reduction <minimumf>, %122, %cst_30 [1] : vector<40x128xf32> to vector<40xf32>
      %134 = vector.shape_cast %133 : vector<40xf32> to vector<40x1xf32>
      %135 = vector.broadcast %134 : vector<40x1xf32> to vector<40x128xf32>
      %136 = arith.cmpf ole, %122, %135 : vector<40x128xf32>
      %cst_31 = arith.constant 1.000000e+10 : f32
      %137 = vector.shape_cast %54 : vector<1x128xf32> to vector<1x128xf32>
      %138 = vector.broadcast %137 : vector<1x128xf32> to vector<40x128xf32>
      %139 = vector.broadcast %cst_31 : f32 to vector<40x128xf32>
      %140 = arith.select %136, %138, %139 : vector<40x128xi1>, vector<40x128xf32>
      %cst_32 = arith.constant dense<0x7F800000> : vector<40xf32>
      %141 = vector.multi_reduction <minimumf>, %140, %cst_32 [1] : vector<40x128xf32> to vector<40xf32>
      %142 = vector.shape_cast %141 : vector<40xf32> to vector<40x1xf32>
      %143 = vector.broadcast %54 : vector<1x128xf32> to vector<40x128xf32>
      %144 = vector.broadcast %142 : vector<40x1xf32> to vector<40x128xf32>
      %145 = arith.cmpf oeq, %143, %144 : vector<40x128xf32>
      %cst_33 = arith.constant 1.000000e+10 : f32
      %146 = vector.broadcast %cst_33 : f32 to vector<40x128xf32>
      %147 = arith.select %145, %146, %122 : vector<40x128xi1>, vector<40x128xf32>
      %c3_i32 = arith.constant 3 : i32
      %148 = vector.broadcast %c3_i32 : i32 to vector<40x17xi32>
      %149 = arith.cmpi eq, %55, %148 : vector<40x17xi32>
      %150 = vector.shape_cast %134 : vector<40x1xf32> to vector<40x1xf32>
      %151 = vector.broadcast %150 : vector<40x1xf32> to vector<40x17xf32>
      %152 = arith.select %149, %151, %127 : vector<40x17xi1>, vector<40x17xf32>
      %c3_i32_34 = arith.constant 3 : i32
      %153 = vector.broadcast %c3_i32_34 : i32 to vector<40x17xi32>
      %154 = arith.cmpi eq, %55, %153 : vector<40x17xi32>
      %155 = vector.shape_cast %142 : vector<40x1xf32> to vector<40x1xf32>
      %156 = vector.broadcast %155 : vector<40x1xf32> to vector<40x17xf32>
      %157 = arith.select %154, %156, %132 : vector<40x17xi1>, vector<40x17xf32>
      %cst_35 = arith.constant dense<0x7F800000> : vector<40xf32>
      %158 = vector.multi_reduction <minimumf>, %147, %cst_35 [1] : vector<40x128xf32> to vector<40xf32>
      %159 = vector.shape_cast %158 : vector<40xf32> to vector<40x1xf32>
      %160 = vector.broadcast %159 : vector<40x1xf32> to vector<40x128xf32>
      %161 = arith.cmpf ole, %147, %160 : vector<40x128xf32>
      %cst_36 = arith.constant 1.000000e+10 : f32
      %162 = vector.shape_cast %54 : vector<1x128xf32> to vector<1x128xf32>
      %163 = vector.broadcast %162 : vector<1x128xf32> to vector<40x128xf32>
      %164 = vector.broadcast %cst_36 : f32 to vector<40x128xf32>
      %165 = arith.select %161, %163, %164 : vector<40x128xi1>, vector<40x128xf32>
      %cst_37 = arith.constant dense<0x7F800000> : vector<40xf32>
      %166 = vector.multi_reduction <minimumf>, %165, %cst_37 [1] : vector<40x128xf32> to vector<40xf32>
      %167 = vector.shape_cast %166 : vector<40xf32> to vector<40x1xf32>
      %168 = vector.broadcast %54 : vector<1x128xf32> to vector<40x128xf32>
      %169 = vector.broadcast %167 : vector<40x1xf32> to vector<40x128xf32>
      %170 = arith.cmpf oeq, %168, %169 : vector<40x128xf32>
      %cst_38 = arith.constant 1.000000e+10 : f32
      %171 = vector.broadcast %cst_38 : f32 to vector<40x128xf32>
      %172 = arith.select %170, %171, %147 : vector<40x128xi1>, vector<40x128xf32>
      %c4_i32 = arith.constant 4 : i32
      %173 = vector.broadcast %c4_i32 : i32 to vector<40x17xi32>
      %174 = arith.cmpi eq, %55, %173 : vector<40x17xi32>
      %175 = vector.shape_cast %159 : vector<40x1xf32> to vector<40x1xf32>
      %176 = vector.broadcast %175 : vector<40x1xf32> to vector<40x17xf32>
      %177 = arith.select %174, %176, %152 : vector<40x17xi1>, vector<40x17xf32>
      %c4_i32_39 = arith.constant 4 : i32
      %178 = vector.broadcast %c4_i32_39 : i32 to vector<40x17xi32>
      %179 = arith.cmpi eq, %55, %178 : vector<40x17xi32>
      %180 = vector.shape_cast %167 : vector<40x1xf32> to vector<40x1xf32>
      %181 = vector.broadcast %180 : vector<40x1xf32> to vector<40x17xf32>
      %182 = arith.select %179, %181, %157 : vector<40x17xi1>, vector<40x17xf32>
      %cst_40 = arith.constant dense<0x7F800000> : vector<40xf32>
      %183 = vector.multi_reduction <minimumf>, %172, %cst_40 [1] : vector<40x128xf32> to vector<40xf32>
      %184 = vector.shape_cast %183 : vector<40xf32> to vector<40x1xf32>
      %185 = vector.broadcast %184 : vector<40x1xf32> to vector<40x128xf32>
      %186 = arith.cmpf ole, %172, %185 : vector<40x128xf32>
      %cst_41 = arith.constant 1.000000e+10 : f32
      %187 = vector.shape_cast %54 : vector<1x128xf32> to vector<1x128xf32>
      %188 = vector.broadcast %187 : vector<1x128xf32> to vector<40x128xf32>
      %189 = vector.broadcast %cst_41 : f32 to vector<40x128xf32>
      %190 = arith.select %186, %188, %189 : vector<40x128xi1>, vector<40x128xf32>
      %cst_42 = arith.constant dense<0x7F800000> : vector<40xf32>
      %191 = vector.multi_reduction <minimumf>, %190, %cst_42 [1] : vector<40x128xf32> to vector<40xf32>
      %192 = vector.shape_cast %191 : vector<40xf32> to vector<40x1xf32>
      %193 = vector.broadcast %54 : vector<1x128xf32> to vector<40x128xf32>
      %194 = vector.broadcast %192 : vector<40x1xf32> to vector<40x128xf32>
      %195 = arith.cmpf oeq, %193, %194 : vector<40x128xf32>
      %cst_43 = arith.constant 1.000000e+10 : f32
      %196 = vector.broadcast %cst_43 : f32 to vector<40x128xf32>
      %197 = arith.select %195, %196, %172 : vector<40x128xi1>, vector<40x128xf32>
      %c5_i32 = arith.constant 5 : i32
      %198 = vector.broadcast %c5_i32 : i32 to vector<40x17xi32>
      %199 = arith.cmpi eq, %55, %198 : vector<40x17xi32>
      %200 = vector.shape_cast %184 : vector<40x1xf32> to vector<40x1xf32>
      %201 = vector.broadcast %200 : vector<40x1xf32> to vector<40x17xf32>
      %202 = arith.select %199, %201, %177 : vector<40x17xi1>, vector<40x17xf32>
      %c5_i32_44 = arith.constant 5 : i32
      %203 = vector.broadcast %c5_i32_44 : i32 to vector<40x17xi32>
      %204 = arith.cmpi eq, %55, %203 : vector<40x17xi32>
      %205 = vector.shape_cast %192 : vector<40x1xf32> to vector<40x1xf32>
      %206 = vector.broadcast %205 : vector<40x1xf32> to vector<40x17xf32>
      %207 = arith.select %204, %206, %182 : vector<40x17xi1>, vector<40x17xf32>
      %cst_45 = arith.constant dense<0x7F800000> : vector<40xf32>
      %208 = vector.multi_reduction <minimumf>, %197, %cst_45 [1] : vector<40x128xf32> to vector<40xf32>
      %209 = vector.shape_cast %208 : vector<40xf32> to vector<40x1xf32>
      %210 = vector.broadcast %209 : vector<40x1xf32> to vector<40x128xf32>
      %211 = arith.cmpf ole, %197, %210 : vector<40x128xf32>
      %cst_46 = arith.constant 1.000000e+10 : f32
      %212 = vector.shape_cast %54 : vector<1x128xf32> to vector<1x128xf32>
      %213 = vector.broadcast %212 : vector<1x128xf32> to vector<40x128xf32>
      %214 = vector.broadcast %cst_46 : f32 to vector<40x128xf32>
      %215 = arith.select %211, %213, %214 : vector<40x128xi1>, vector<40x128xf32>
      %cst_47 = arith.constant dense<0x7F800000> : vector<40xf32>
      %216 = vector.multi_reduction <minimumf>, %215, %cst_47 [1] : vector<40x128xf32> to vector<40xf32>
      %217 = vector.shape_cast %216 : vector<40xf32> to vector<40x1xf32>
      %218 = vector.broadcast %54 : vector<1x128xf32> to vector<40x128xf32>
      %219 = vector.broadcast %217 : vector<40x1xf32> to vector<40x128xf32>
      %220 = arith.cmpf oeq, %218, %219 : vector<40x128xf32>
      %cst_48 = arith.constant 1.000000e+10 : f32
      %221 = vector.broadcast %cst_48 : f32 to vector<40x128xf32>
      %222 = arith.select %220, %221, %197 : vector<40x128xi1>, vector<40x128xf32>
      %c6_i32 = arith.constant 6 : i32
      %223 = vector.broadcast %c6_i32 : i32 to vector<40x17xi32>
      %224 = arith.cmpi eq, %55, %223 : vector<40x17xi32>
      %225 = vector.shape_cast %209 : vector<40x1xf32> to vector<40x1xf32>
      %226 = vector.broadcast %225 : vector<40x1xf32> to vector<40x17xf32>
      %227 = arith.select %224, %226, %202 : vector<40x17xi1>, vector<40x17xf32>
      %c6_i32_49 = arith.constant 6 : i32
      %228 = vector.broadcast %c6_i32_49 : i32 to vector<40x17xi32>
      %229 = arith.cmpi eq, %55, %228 : vector<40x17xi32>
      %230 = vector.shape_cast %217 : vector<40x1xf32> to vector<40x1xf32>
      %231 = vector.broadcast %230 : vector<40x1xf32> to vector<40x17xf32>
      %232 = arith.select %229, %231, %207 : vector<40x17xi1>, vector<40x17xf32>
      %cst_50 = arith.constant dense<0x7F800000> : vector<40xf32>
      %233 = vector.multi_reduction <minimumf>, %222, %cst_50 [1] : vector<40x128xf32> to vector<40xf32>
      %234 = vector.shape_cast %233 : vector<40xf32> to vector<40x1xf32>
      %235 = vector.broadcast %234 : vector<40x1xf32> to vector<40x128xf32>
      %236 = arith.cmpf ole, %222, %235 : vector<40x128xf32>
      %cst_51 = arith.constant 1.000000e+10 : f32
      %237 = vector.shape_cast %54 : vector<1x128xf32> to vector<1x128xf32>
      %238 = vector.broadcast %237 : vector<1x128xf32> to vector<40x128xf32>
      %239 = vector.broadcast %cst_51 : f32 to vector<40x128xf32>
      %240 = arith.select %236, %238, %239 : vector<40x128xi1>, vector<40x128xf32>
      %cst_52 = arith.constant dense<0x7F800000> : vector<40xf32>
      %241 = vector.multi_reduction <minimumf>, %240, %cst_52 [1] : vector<40x128xf32> to vector<40xf32>
      %242 = vector.shape_cast %241 : vector<40xf32> to vector<40x1xf32>
      %243 = vector.broadcast %54 : vector<1x128xf32> to vector<40x128xf32>
      %244 = vector.broadcast %242 : vector<40x1xf32> to vector<40x128xf32>
      %245 = arith.cmpf oeq, %243, %244 : vector<40x128xf32>
      %cst_53 = arith.constant 1.000000e+10 : f32
      %246 = vector.broadcast %cst_53 : f32 to vector<40x128xf32>
      %247 = arith.select %245, %246, %222 : vector<40x128xi1>, vector<40x128xf32>
      %c7_i32 = arith.constant 7 : i32
      %248 = vector.broadcast %c7_i32 : i32 to vector<40x17xi32>
      %249 = arith.cmpi eq, %55, %248 : vector<40x17xi32>
      %250 = vector.shape_cast %234 : vector<40x1xf32> to vector<40x1xf32>
      %251 = vector.broadcast %250 : vector<40x1xf32> to vector<40x17xf32>
      %252 = arith.select %249, %251, %227 : vector<40x17xi1>, vector<40x17xf32>
      %c7_i32_54 = arith.constant 7 : i32
      %253 = vector.broadcast %c7_i32_54 : i32 to vector<40x17xi32>
      %254 = arith.cmpi eq, %55, %253 : vector<40x17xi32>
      %255 = vector.shape_cast %242 : vector<40x1xf32> to vector<40x1xf32>
      %256 = vector.broadcast %255 : vector<40x1xf32> to vector<40x17xf32>
      %257 = arith.select %254, %256, %232 : vector<40x17xi1>, vector<40x17xf32>
      %cst_55 = arith.constant dense<0x7F800000> : vector<40xf32>
      %258 = vector.multi_reduction <minimumf>, %247, %cst_55 [1] : vector<40x128xf32> to vector<40xf32>
      %259 = vector.shape_cast %258 : vector<40xf32> to vector<40x1xf32>
      %260 = vector.broadcast %259 : vector<40x1xf32> to vector<40x128xf32>
      %261 = arith.cmpf ole, %247, %260 : vector<40x128xf32>
      %cst_56 = arith.constant 1.000000e+10 : f32
      %262 = vector.shape_cast %54 : vector<1x128xf32> to vector<1x128xf32>
      %263 = vector.broadcast %262 : vector<1x128xf32> to vector<40x128xf32>
      %264 = vector.broadcast %cst_56 : f32 to vector<40x128xf32>
      %265 = arith.select %261, %263, %264 : vector<40x128xi1>, vector<40x128xf32>
      %cst_57 = arith.constant dense<0x7F800000> : vector<40xf32>
      %266 = vector.multi_reduction <minimumf>, %265, %cst_57 [1] : vector<40x128xf32> to vector<40xf32>
      %267 = vector.shape_cast %266 : vector<40xf32> to vector<40x1xf32>
      %268 = vector.broadcast %54 : vector<1x128xf32> to vector<40x128xf32>
      %269 = vector.broadcast %267 : vector<40x1xf32> to vector<40x128xf32>
      %270 = arith.cmpf oeq, %268, %269 : vector<40x128xf32>
      %cst_58 = arith.constant 1.000000e+10 : f32
      %271 = vector.broadcast %cst_58 : f32 to vector<40x128xf32>
      %272 = arith.select %270, %271, %247 : vector<40x128xi1>, vector<40x128xf32>
      %c8_i32 = arith.constant 8 : i32
      %273 = vector.broadcast %c8_i32 : i32 to vector<40x17xi32>
      %274 = arith.cmpi eq, %55, %273 : vector<40x17xi32>
      %275 = vector.shape_cast %259 : vector<40x1xf32> to vector<40x1xf32>
      %276 = vector.broadcast %275 : vector<40x1xf32> to vector<40x17xf32>
      %277 = arith.select %274, %276, %252 : vector<40x17xi1>, vector<40x17xf32>
      %c8_i32_59 = arith.constant 8 : i32
      %278 = vector.broadcast %c8_i32_59 : i32 to vector<40x17xi32>
      %279 = arith.cmpi eq, %55, %278 : vector<40x17xi32>
      %280 = vector.shape_cast %267 : vector<40x1xf32> to vector<40x1xf32>
      %281 = vector.broadcast %280 : vector<40x1xf32> to vector<40x17xf32>
      %282 = arith.select %279, %281, %257 : vector<40x17xi1>, vector<40x17xf32>
      %cst_60 = arith.constant dense<0x7F800000> : vector<40xf32>
      %283 = vector.multi_reduction <minimumf>, %272, %cst_60 [1] : vector<40x128xf32> to vector<40xf32>
      %284 = vector.shape_cast %283 : vector<40xf32> to vector<40x1xf32>
      %285 = vector.broadcast %284 : vector<40x1xf32> to vector<40x128xf32>
      %286 = arith.cmpf ole, %272, %285 : vector<40x128xf32>
      %cst_61 = arith.constant 1.000000e+10 : f32
      %287 = vector.shape_cast %54 : vector<1x128xf32> to vector<1x128xf32>
      %288 = vector.broadcast %287 : vector<1x128xf32> to vector<40x128xf32>
      %289 = vector.broadcast %cst_61 : f32 to vector<40x128xf32>
      %290 = arith.select %286, %288, %289 : vector<40x128xi1>, vector<40x128xf32>
      %cst_62 = arith.constant dense<0x7F800000> : vector<40xf32>
      %291 = vector.multi_reduction <minimumf>, %290, %cst_62 [1] : vector<40x128xf32> to vector<40xf32>
      %292 = vector.shape_cast %291 : vector<40xf32> to vector<40x1xf32>
      %293 = vector.broadcast %54 : vector<1x128xf32> to vector<40x128xf32>
      %294 = vector.broadcast %292 : vector<40x1xf32> to vector<40x128xf32>
      %295 = arith.cmpf oeq, %293, %294 : vector<40x128xf32>
      %cst_63 = arith.constant 1.000000e+10 : f32
      %296 = vector.broadcast %cst_63 : f32 to vector<40x128xf32>
      %297 = arith.select %295, %296, %272 : vector<40x128xi1>, vector<40x128xf32>
      %c9_i32 = arith.constant 9 : i32
      %298 = vector.broadcast %c9_i32 : i32 to vector<40x17xi32>
      %299 = arith.cmpi eq, %55, %298 : vector<40x17xi32>
      %300 = vector.shape_cast %284 : vector<40x1xf32> to vector<40x1xf32>
      %301 = vector.broadcast %300 : vector<40x1xf32> to vector<40x17xf32>
      %302 = arith.select %299, %301, %277 : vector<40x17xi1>, vector<40x17xf32>
      %c9_i32_64 = arith.constant 9 : i32
      %303 = vector.broadcast %c9_i32_64 : i32 to vector<40x17xi32>
      %304 = arith.cmpi eq, %55, %303 : vector<40x17xi32>
      %305 = vector.shape_cast %292 : vector<40x1xf32> to vector<40x1xf32>
      %306 = vector.broadcast %305 : vector<40x1xf32> to vector<40x17xf32>
      %307 = arith.select %304, %306, %282 : vector<40x17xi1>, vector<40x17xf32>
      %cst_65 = arith.constant dense<0x7F800000> : vector<40xf32>
      %308 = vector.multi_reduction <minimumf>, %297, %cst_65 [1] : vector<40x128xf32> to vector<40xf32>
      %309 = vector.shape_cast %308 : vector<40xf32> to vector<40x1xf32>
      %310 = vector.broadcast %309 : vector<40x1xf32> to vector<40x128xf32>
      %311 = arith.cmpf ole, %297, %310 : vector<40x128xf32>
      %cst_66 = arith.constant 1.000000e+10 : f32
      %312 = vector.shape_cast %54 : vector<1x128xf32> to vector<1x128xf32>
      %313 = vector.broadcast %312 : vector<1x128xf32> to vector<40x128xf32>
      %314 = vector.broadcast %cst_66 : f32 to vector<40x128xf32>
      %315 = arith.select %311, %313, %314 : vector<40x128xi1>, vector<40x128xf32>
      %cst_67 = arith.constant dense<0x7F800000> : vector<40xf32>
      %316 = vector.multi_reduction <minimumf>, %315, %cst_67 [1] : vector<40x128xf32> to vector<40xf32>
      %317 = vector.shape_cast %316 : vector<40xf32> to vector<40x1xf32>
      %318 = vector.broadcast %54 : vector<1x128xf32> to vector<40x128xf32>
      %319 = vector.broadcast %317 : vector<40x1xf32> to vector<40x128xf32>
      %320 = arith.cmpf oeq, %318, %319 : vector<40x128xf32>
      %cst_68 = arith.constant 1.000000e+10 : f32
      %321 = vector.broadcast %cst_68 : f32 to vector<40x128xf32>
      %322 = arith.select %320, %321, %297 : vector<40x128xi1>, vector<40x128xf32>
      %c10_i32 = arith.constant 10 : i32
      %323 = vector.broadcast %c10_i32 : i32 to vector<40x17xi32>
      %324 = arith.cmpi eq, %55, %323 : vector<40x17xi32>
      %325 = vector.shape_cast %309 : vector<40x1xf32> to vector<40x1xf32>
      %326 = vector.broadcast %325 : vector<40x1xf32> to vector<40x17xf32>
      %327 = arith.select %324, %326, %302 : vector<40x17xi1>, vector<40x17xf32>
      %c10_i32_69 = arith.constant 10 : i32
      %328 = vector.broadcast %c10_i32_69 : i32 to vector<40x17xi32>
      %329 = arith.cmpi eq, %55, %328 : vector<40x17xi32>
      %330 = vector.shape_cast %317 : vector<40x1xf32> to vector<40x1xf32>
      %331 = vector.broadcast %330 : vector<40x1xf32> to vector<40x17xf32>
      %332 = arith.select %329, %331, %307 : vector<40x17xi1>, vector<40x17xf32>
      %cst_70 = arith.constant dense<0x7F800000> : vector<40xf32>
      %333 = vector.multi_reduction <minimumf>, %322, %cst_70 [1] : vector<40x128xf32> to vector<40xf32>
      %334 = vector.shape_cast %333 : vector<40xf32> to vector<40x1xf32>
      %335 = vector.broadcast %334 : vector<40x1xf32> to vector<40x128xf32>
      %336 = arith.cmpf ole, %322, %335 : vector<40x128xf32>
      %cst_71 = arith.constant 1.000000e+10 : f32
      %337 = vector.shape_cast %54 : vector<1x128xf32> to vector<1x128xf32>
      %338 = vector.broadcast %337 : vector<1x128xf32> to vector<40x128xf32>
      %339 = vector.broadcast %cst_71 : f32 to vector<40x128xf32>
      %340 = arith.select %336, %338, %339 : vector<40x128xi1>, vector<40x128xf32>
      %cst_72 = arith.constant dense<0x7F800000> : vector<40xf32>
      %341 = vector.multi_reduction <minimumf>, %340, %cst_72 [1] : vector<40x128xf32> to vector<40xf32>
      %342 = vector.shape_cast %341 : vector<40xf32> to vector<40x1xf32>
      %343 = vector.broadcast %54 : vector<1x128xf32> to vector<40x128xf32>
      %344 = vector.broadcast %342 : vector<40x1xf32> to vector<40x128xf32>
      %345 = arith.cmpf oeq, %343, %344 : vector<40x128xf32>
      %cst_73 = arith.constant 1.000000e+10 : f32
      %346 = vector.broadcast %cst_73 : f32 to vector<40x128xf32>
      %347 = arith.select %345, %346, %322 : vector<40x128xi1>, vector<40x128xf32>
      %c11_i32 = arith.constant 11 : i32
      %348 = vector.broadcast %c11_i32 : i32 to vector<40x17xi32>
      %349 = arith.cmpi eq, %55, %348 : vector<40x17xi32>
      %350 = vector.shape_cast %334 : vector<40x1xf32> to vector<40x1xf32>
      %351 = vector.broadcast %350 : vector<40x1xf32> to vector<40x17xf32>
      %352 = arith.select %349, %351, %327 : vector<40x17xi1>, vector<40x17xf32>
      %c11_i32_74 = arith.constant 11 : i32
      %353 = vector.broadcast %c11_i32_74 : i32 to vector<40x17xi32>
      %354 = arith.cmpi eq, %55, %353 : vector<40x17xi32>
      %355 = vector.shape_cast %342 : vector<40x1xf32> to vector<40x1xf32>
      %356 = vector.broadcast %355 : vector<40x1xf32> to vector<40x17xf32>
      %357 = arith.select %354, %356, %332 : vector<40x17xi1>, vector<40x17xf32>
      %cst_75 = arith.constant dense<0x7F800000> : vector<40xf32>
      %358 = vector.multi_reduction <minimumf>, %347, %cst_75 [1] : vector<40x128xf32> to vector<40xf32>
      %359 = vector.shape_cast %358 : vector<40xf32> to vector<40x1xf32>
      %360 = vector.broadcast %359 : vector<40x1xf32> to vector<40x128xf32>
      %361 = arith.cmpf ole, %347, %360 : vector<40x128xf32>
      %cst_76 = arith.constant 1.000000e+10 : f32
      %362 = vector.shape_cast %54 : vector<1x128xf32> to vector<1x128xf32>
      %363 = vector.broadcast %362 : vector<1x128xf32> to vector<40x128xf32>
      %364 = vector.broadcast %cst_76 : f32 to vector<40x128xf32>
      %365 = arith.select %361, %363, %364 : vector<40x128xi1>, vector<40x128xf32>
      %cst_77 = arith.constant dense<0x7F800000> : vector<40xf32>
      %366 = vector.multi_reduction <minimumf>, %365, %cst_77 [1] : vector<40x128xf32> to vector<40xf32>
      %367 = vector.shape_cast %366 : vector<40xf32> to vector<40x1xf32>
      %368 = vector.broadcast %54 : vector<1x128xf32> to vector<40x128xf32>
      %369 = vector.broadcast %367 : vector<40x1xf32> to vector<40x128xf32>
      %370 = arith.cmpf oeq, %368, %369 : vector<40x128xf32>
      %cst_78 = arith.constant 1.000000e+10 : f32
      %371 = vector.broadcast %cst_78 : f32 to vector<40x128xf32>
      %372 = arith.select %370, %371, %347 : vector<40x128xi1>, vector<40x128xf32>
      %c12_i32 = arith.constant 12 : i32
      %373 = vector.broadcast %c12_i32 : i32 to vector<40x17xi32>
      %374 = arith.cmpi eq, %55, %373 : vector<40x17xi32>
      %375 = vector.shape_cast %359 : vector<40x1xf32> to vector<40x1xf32>
      %376 = vector.broadcast %375 : vector<40x1xf32> to vector<40x17xf32>
      %377 = arith.select %374, %376, %352 : vector<40x17xi1>, vector<40x17xf32>
      %c12_i32_79 = arith.constant 12 : i32
      %378 = vector.broadcast %c12_i32_79 : i32 to vector<40x17xi32>
      %379 = arith.cmpi eq, %55, %378 : vector<40x17xi32>
      %380 = vector.shape_cast %367 : vector<40x1xf32> to vector<40x1xf32>
      %381 = vector.broadcast %380 : vector<40x1xf32> to vector<40x17xf32>
      %382 = arith.select %379, %381, %357 : vector<40x17xi1>, vector<40x17xf32>
      %cst_80 = arith.constant dense<0x7F800000> : vector<40xf32>
      %383 = vector.multi_reduction <minimumf>, %372, %cst_80 [1] : vector<40x128xf32> to vector<40xf32>
      %384 = vector.shape_cast %383 : vector<40xf32> to vector<40x1xf32>
      %385 = vector.broadcast %384 : vector<40x1xf32> to vector<40x128xf32>
      %386 = arith.cmpf ole, %372, %385 : vector<40x128xf32>
      %cst_81 = arith.constant 1.000000e+10 : f32
      %387 = vector.shape_cast %54 : vector<1x128xf32> to vector<1x128xf32>
      %388 = vector.broadcast %387 : vector<1x128xf32> to vector<40x128xf32>
      %389 = vector.broadcast %cst_81 : f32 to vector<40x128xf32>
      %390 = arith.select %386, %388, %389 : vector<40x128xi1>, vector<40x128xf32>
      %cst_82 = arith.constant dense<0x7F800000> : vector<40xf32>
      %391 = vector.multi_reduction <minimumf>, %390, %cst_82 [1] : vector<40x128xf32> to vector<40xf32>
      %392 = vector.shape_cast %391 : vector<40xf32> to vector<40x1xf32>
      %393 = vector.broadcast %54 : vector<1x128xf32> to vector<40x128xf32>
      %394 = vector.broadcast %392 : vector<40x1xf32> to vector<40x128xf32>
      %395 = arith.cmpf oeq, %393, %394 : vector<40x128xf32>
      %cst_83 = arith.constant 1.000000e+10 : f32
      %396 = vector.broadcast %cst_83 : f32 to vector<40x128xf32>
      %397 = arith.select %395, %396, %372 : vector<40x128xi1>, vector<40x128xf32>
      %c13_i32 = arith.constant 13 : i32
      %398 = vector.broadcast %c13_i32 : i32 to vector<40x17xi32>
      %399 = arith.cmpi eq, %55, %398 : vector<40x17xi32>
      %400 = vector.shape_cast %384 : vector<40x1xf32> to vector<40x1xf32>
      %401 = vector.broadcast %400 : vector<40x1xf32> to vector<40x17xf32>
      %402 = arith.select %399, %401, %377 : vector<40x17xi1>, vector<40x17xf32>
      %c13_i32_84 = arith.constant 13 : i32
      %403 = vector.broadcast %c13_i32_84 : i32 to vector<40x17xi32>
      %404 = arith.cmpi eq, %55, %403 : vector<40x17xi32>
      %405 = vector.shape_cast %392 : vector<40x1xf32> to vector<40x1xf32>
      %406 = vector.broadcast %405 : vector<40x1xf32> to vector<40x17xf32>
      %407 = arith.select %404, %406, %382 : vector<40x17xi1>, vector<40x17xf32>
      %cst_85 = arith.constant dense<0x7F800000> : vector<40xf32>
      %408 = vector.multi_reduction <minimumf>, %397, %cst_85 [1] : vector<40x128xf32> to vector<40xf32>
      %409 = vector.shape_cast %408 : vector<40xf32> to vector<40x1xf32>
      %410 = vector.broadcast %409 : vector<40x1xf32> to vector<40x128xf32>
      %411 = arith.cmpf ole, %397, %410 : vector<40x128xf32>
      %cst_86 = arith.constant 1.000000e+10 : f32
      %412 = vector.shape_cast %54 : vector<1x128xf32> to vector<1x128xf32>
      %413 = vector.broadcast %412 : vector<1x128xf32> to vector<40x128xf32>
      %414 = vector.broadcast %cst_86 : f32 to vector<40x128xf32>
      %415 = arith.select %411, %413, %414 : vector<40x128xi1>, vector<40x128xf32>
      %cst_87 = arith.constant dense<0x7F800000> : vector<40xf32>
      %416 = vector.multi_reduction <minimumf>, %415, %cst_87 [1] : vector<40x128xf32> to vector<40xf32>
      %417 = vector.shape_cast %416 : vector<40xf32> to vector<40x1xf32>
      %418 = vector.broadcast %54 : vector<1x128xf32> to vector<40x128xf32>
      %419 = vector.broadcast %417 : vector<40x1xf32> to vector<40x128xf32>
      %420 = arith.cmpf oeq, %418, %419 : vector<40x128xf32>
      %cst_88 = arith.constant 1.000000e+10 : f32
      %421 = vector.broadcast %cst_88 : f32 to vector<40x128xf32>
      %422 = arith.select %420, %421, %397 : vector<40x128xi1>, vector<40x128xf32>
      %c14_i32 = arith.constant 14 : i32
      %423 = vector.broadcast %c14_i32 : i32 to vector<40x17xi32>
      %424 = arith.cmpi eq, %55, %423 : vector<40x17xi32>
      %425 = vector.shape_cast %409 : vector<40x1xf32> to vector<40x1xf32>
      %426 = vector.broadcast %425 : vector<40x1xf32> to vector<40x17xf32>
      %427 = arith.select %424, %426, %402 : vector<40x17xi1>, vector<40x17xf32>
      %c14_i32_89 = arith.constant 14 : i32
      %428 = vector.broadcast %c14_i32_89 : i32 to vector<40x17xi32>
      %429 = arith.cmpi eq, %55, %428 : vector<40x17xi32>
      %430 = vector.shape_cast %417 : vector<40x1xf32> to vector<40x1xf32>
      %431 = vector.broadcast %430 : vector<40x1xf32> to vector<40x17xf32>
      %432 = arith.select %429, %431, %407 : vector<40x17xi1>, vector<40x17xf32>
      %cst_90 = arith.constant dense<0x7F800000> : vector<40xf32>
      %433 = vector.multi_reduction <minimumf>, %422, %cst_90 [1] : vector<40x128xf32> to vector<40xf32>
      %434 = vector.shape_cast %433 : vector<40xf32> to vector<40x1xf32>
      %435 = vector.broadcast %434 : vector<40x1xf32> to vector<40x128xf32>
      %436 = arith.cmpf ole, %422, %435 : vector<40x128xf32>
      %cst_91 = arith.constant 1.000000e+10 : f32
      %437 = vector.shape_cast %54 : vector<1x128xf32> to vector<1x128xf32>
      %438 = vector.broadcast %437 : vector<1x128xf32> to vector<40x128xf32>
      %439 = vector.broadcast %cst_91 : f32 to vector<40x128xf32>
      %440 = arith.select %436, %438, %439 : vector<40x128xi1>, vector<40x128xf32>
      %cst_92 = arith.constant dense<0x7F800000> : vector<40xf32>
      %441 = vector.multi_reduction <minimumf>, %440, %cst_92 [1] : vector<40x128xf32> to vector<40xf32>
      %442 = vector.shape_cast %441 : vector<40xf32> to vector<40x1xf32>
      %443 = vector.broadcast %54 : vector<1x128xf32> to vector<40x128xf32>
      %444 = vector.broadcast %442 : vector<40x1xf32> to vector<40x128xf32>
      %445 = arith.cmpf oeq, %443, %444 : vector<40x128xf32>
      %cst_93 = arith.constant 1.000000e+10 : f32
      %446 = vector.broadcast %cst_93 : f32 to vector<40x128xf32>
      %447 = arith.select %445, %446, %422 : vector<40x128xi1>, vector<40x128xf32>
      %c15_i32 = arith.constant 15 : i32
      %448 = vector.broadcast %c15_i32 : i32 to vector<40x17xi32>
      %449 = arith.cmpi eq, %55, %448 : vector<40x17xi32>
      %450 = vector.shape_cast %434 : vector<40x1xf32> to vector<40x1xf32>
      %451 = vector.broadcast %450 : vector<40x1xf32> to vector<40x17xf32>
      %452 = arith.select %449, %451, %427 : vector<40x17xi1>, vector<40x17xf32>
      %c15_i32_94 = arith.constant 15 : i32
      %453 = vector.broadcast %c15_i32_94 : i32 to vector<40x17xi32>
      %454 = arith.cmpi eq, %55, %453 : vector<40x17xi32>
      %455 = vector.shape_cast %442 : vector<40x1xf32> to vector<40x1xf32>
      %456 = vector.broadcast %455 : vector<40x1xf32> to vector<40x17xf32>
      %457 = arith.select %454, %456, %432 : vector<40x17xi1>, vector<40x17xf32>
      %cst_95 = arith.constant dense<0x7F800000> : vector<40xf32>
      %458 = vector.multi_reduction <minimumf>, %447, %cst_95 [1] : vector<40x128xf32> to vector<40xf32>
      %459 = vector.shape_cast %458 : vector<40xf32> to vector<40x1xf32>
      %460 = vector.broadcast %459 : vector<40x1xf32> to vector<40x128xf32>
      %461 = arith.cmpf ole, %447, %460 : vector<40x128xf32>
      %cst_96 = arith.constant 1.000000e+10 : f32
      %462 = vector.shape_cast %54 : vector<1x128xf32> to vector<1x128xf32>
      %463 = vector.broadcast %462 : vector<1x128xf32> to vector<40x128xf32>
      %464 = vector.broadcast %cst_96 : f32 to vector<40x128xf32>
      %465 = arith.select %461, %463, %464 : vector<40x128xi1>, vector<40x128xf32>
      %cst_97 = arith.constant dense<0x7F800000> : vector<40xf32>
      %466 = vector.multi_reduction <minimumf>, %465, %cst_97 [1] : vector<40x128xf32> to vector<40xf32>
      %467 = vector.shape_cast %466 : vector<40xf32> to vector<40x1xf32>
      %c16_i32 = arith.constant 16 : i32
      %468 = vector.broadcast %c16_i32 : i32 to vector<40x17xi32>
      %469 = arith.cmpi eq, %55, %468 : vector<40x17xi32>
      %470 = vector.shape_cast %459 : vector<40x1xf32> to vector<40x1xf32>
      %471 = vector.broadcast %470 : vector<40x1xf32> to vector<40x17xf32>
      %472 = arith.select %469, %471, %452 : vector<40x17xi1>, vector<40x17xf32>
      %c16_i32_98 = arith.constant 16 : i32
      %473 = vector.broadcast %c16_i32_98 : i32 to vector<40x17xi32>
      %474 = arith.cmpi eq, %55, %473 : vector<40x17xi32>
      %475 = vector.shape_cast %467 : vector<40x1xf32> to vector<40x1xf32>
      %476 = vector.broadcast %475 : vector<40x1xf32> to vector<40x17xf32>
      %477 = arith.select %474, %476, %457 : vector<40x17xi1>, vector<40x17xf32>
      %c0_99 = arith.constant 0 : index
      %c0_100 = arith.constant 0 : index
      %478 = vector.load %arg12[%c0_99, %c0_100] : memref<40x17xf32, #tpu.memory_space<vmem>>, vector<40x17xf32>
      %479 = tpu.concatenate %478, %472 in 1 : vector<40x17xf32>, vector<40x17xf32> -> vector<40x34xf32>
      %c0_101 = arith.constant 0 : index
      %c0_102 = arith.constant 0 : index
      %480 = vector.load %arg13[%c0_101, %c0_102] : memref<40x17xf32, #tpu.memory_space<vmem>>, vector<40x17xf32>
      %481 = tpu.concatenate %480, %477 in 1 : vector<40x17xf32>, vector<40x17xf32> -> vector<40x34xf32>
      %cst_103 = arith.constant 1.000000e+10 : f32
      %482 = vector.broadcast %cst_103 : f32 to vector<40x17xf32>
      %cst_104 = arith.constant 0.000000e+00 : f32
      %483 = vector.broadcast %cst_104 : f32 to vector<40x17xf32>
      %cst_105 = arith.constant dense<0x7F800000> : vector<40xf32>
      %484 = vector.multi_reduction <minimumf>, %479, %cst_105 [1] : vector<40x34xf32> to vector<40xf32>
      %485 = vector.shape_cast %484 : vector<40xf32> to vector<40x1xf32>
      %486 = vector.broadcast %485 : vector<40x1xf32> to vector<40x34xf32>
      %487 = arith.cmpf ole, %479, %486 : vector<40x34xf32>
      %cst_106 = arith.constant 1.000000e+10 : f32
      %488 = vector.broadcast %cst_106 : f32 to vector<40x34xf32>
      %489 = arith.select %487, %481, %488 : vector<40x34xi1>, vector<40x34xf32>
      %cst_107 = arith.constant dense<0x7F800000> : vector<40xf32>
      %490 = vector.multi_reduction <minimumf>, %489, %cst_107 [1] : vector<40x34xf32> to vector<40xf32>
      %491 = vector.shape_cast %490 : vector<40xf32> to vector<40x1xf32>
      %492 = vector.broadcast %491 : vector<40x1xf32> to vector<40x34xf32>
      %493 = arith.cmpf oeq, %481, %492 : vector<40x34xf32>
      %cst_108 = arith.constant 1.000000e+10 : f32
      %494 = vector.broadcast %cst_108 : f32 to vector<40x34xf32>
      %495 = arith.select %493, %494, %479 : vector<40x34xi1>, vector<40x34xf32>
      %c0_i32_109 = arith.constant 0 : i32
      %496 = vector.broadcast %c0_i32_109 : i32 to vector<40x17xi32>
      %497 = arith.cmpi eq, %55, %496 : vector<40x17xi32>
      %498 = vector.shape_cast %485 : vector<40x1xf32> to vector<40x1xf32>
      %499 = vector.broadcast %498 : vector<40x1xf32> to vector<40x17xf32>
      %500 = arith.select %497, %499, %482 : vector<40x17xi1>, vector<40x17xf32>
      %c0_i32_110 = arith.constant 0 : i32
      %501 = vector.broadcast %c0_i32_110 : i32 to vector<40x17xi32>
      %502 = arith.cmpi eq, %55, %501 : vector<40x17xi32>
      %503 = vector.shape_cast %491 : vector<40x1xf32> to vector<40x1xf32>
      %504 = vector.broadcast %503 : vector<40x1xf32> to vector<40x17xf32>
      %505 = arith.select %502, %504, %483 : vector<40x17xi1>, vector<40x17xf32>
      %cst_111 = arith.constant dense<0x7F800000> : vector<40xf32>
      %506 = vector.multi_reduction <minimumf>, %495, %cst_111 [1] : vector<40x34xf32> to vector<40xf32>
      %507 = vector.shape_cast %506 : vector<40xf32> to vector<40x1xf32>
      %508 = vector.broadcast %507 : vector<40x1xf32> to vector<40x34xf32>
      %509 = arith.cmpf ole, %495, %508 : vector<40x34xf32>
      %cst_112 = arith.constant 1.000000e+10 : f32
      %510 = vector.broadcast %cst_112 : f32 to vector<40x34xf32>
      %511 = arith.select %509, %481, %510 : vector<40x34xi1>, vector<40x34xf32>
      %cst_113 = arith.constant dense<0x7F800000> : vector<40xf32>
      %512 = vector.multi_reduction <minimumf>, %511, %cst_113 [1] : vector<40x34xf32> to vector<40xf32>
      %513 = vector.shape_cast %512 : vector<40xf32> to vector<40x1xf32>
      %514 = vector.broadcast %513 : vector<40x1xf32> to vector<40x34xf32>
      %515 = arith.cmpf oeq, %481, %514 : vector<40x34xf32>
      %cst_114 = arith.constant 1.000000e+10 : f32
      %516 = vector.broadcast %cst_114 : f32 to vector<40x34xf32>
      %517 = arith.select %515, %516, %495 : vector<40x34xi1>, vector<40x34xf32>
      %c1_i32_115 = arith.constant 1 : i32
      %518 = vector.broadcast %c1_i32_115 : i32 to vector<40x17xi32>
      %519 = arith.cmpi eq, %55, %518 : vector<40x17xi32>
      %520 = vector.shape_cast %507 : vector<40x1xf32> to vector<40x1xf32>
      %521 = vector.broadcast %520 : vector<40x1xf32> to vector<40x17xf32>
      %522 = arith.select %519, %521, %500 : vector<40x17xi1>, vector<40x17xf32>
      %c1_i32_116 = arith.constant 1 : i32
      %523 = vector.broadcast %c1_i32_116 : i32 to vector<40x17xi32>
      %524 = arith.cmpi eq, %55, %523 : vector<40x17xi32>
      %525 = vector.shape_cast %513 : vector<40x1xf32> to vector<40x1xf32>
      %526 = vector.broadcast %525 : vector<40x1xf32> to vector<40x17xf32>
      %527 = arith.select %524, %526, %505 : vector<40x17xi1>, vector<40x17xf32>
      %cst_117 = arith.constant dense<0x7F800000> : vector<40xf32>
      %528 = vector.multi_reduction <minimumf>, %517, %cst_117 [1] : vector<40x34xf32> to vector<40xf32>
      %529 = vector.shape_cast %528 : vector<40xf32> to vector<40x1xf32>
      %530 = vector.broadcast %529 : vector<40x1xf32> to vector<40x34xf32>
      %531 = arith.cmpf ole, %517, %530 : vector<40x34xf32>
      %cst_118 = arith.constant 1.000000e+10 : f32
      %532 = vector.broadcast %cst_118 : f32 to vector<40x34xf32>
      %533 = arith.select %531, %481, %532 : vector<40x34xi1>, vector<40x34xf32>
      %cst_119 = arith.constant dense<0x7F800000> : vector<40xf32>
      %534 = vector.multi_reduction <minimumf>, %533, %cst_119 [1] : vector<40x34xf32> to vector<40xf32>
      %535 = vector.shape_cast %534 : vector<40xf32> to vector<40x1xf32>
      %536 = vector.broadcast %535 : vector<40x1xf32> to vector<40x34xf32>
      %537 = arith.cmpf oeq, %481, %536 : vector<40x34xf32>
      %cst_120 = arith.constant 1.000000e+10 : f32
      %538 = vector.broadcast %cst_120 : f32 to vector<40x34xf32>
      %539 = arith.select %537, %538, %517 : vector<40x34xi1>, vector<40x34xf32>
      %c2_i32_121 = arith.constant 2 : i32
      %540 = vector.broadcast %c2_i32_121 : i32 to vector<40x17xi32>
      %541 = arith.cmpi eq, %55, %540 : vector<40x17xi32>
      %542 = vector.shape_cast %529 : vector<40x1xf32> to vector<40x1xf32>
      %543 = vector.broadcast %542 : vector<40x1xf32> to vector<40x17xf32>
      %544 = arith.select %541, %543, %522 : vector<40x17xi1>, vector<40x17xf32>
      %c2_i32_122 = arith.constant 2 : i32
      %545 = vector.broadcast %c2_i32_122 : i32 to vector<40x17xi32>
      %546 = arith.cmpi eq, %55, %545 : vector<40x17xi32>
      %547 = vector.shape_cast %535 : vector<40x1xf32> to vector<40x1xf32>
      %548 = vector.broadcast %547 : vector<40x1xf32> to vector<40x17xf32>
      %549 = arith.select %546, %548, %527 : vector<40x17xi1>, vector<40x17xf32>
      %cst_123 = arith.constant dense<0x7F800000> : vector<40xf32>
      %550 = vector.multi_reduction <minimumf>, %539, %cst_123 [1] : vector<40x34xf32> to vector<40xf32>
      %551 = vector.shape_cast %550 : vector<40xf32> to vector<40x1xf32>
      %552 = vector.broadcast %551 : vector<40x1xf32> to vector<40x34xf32>
      %553 = arith.cmpf ole, %539, %552 : vector<40x34xf32>
      %cst_124 = arith.constant 1.000000e+10 : f32
      %554 = vector.broadcast %cst_124 : f32 to vector<40x34xf32>
      %555 = arith.select %553, %481, %554 : vector<40x34xi1>, vector<40x34xf32>
      %cst_125 = arith.constant dense<0x7F800000> : vector<40xf32>
      %556 = vector.multi_reduction <minimumf>, %555, %cst_125 [1] : vector<40x34xf32> to vector<40xf32>
      %557 = vector.shape_cast %556 : vector<40xf32> to vector<40x1xf32>
      %558 = vector.broadcast %557 : vector<40x1xf32> to vector<40x34xf32>
      %559 = arith.cmpf oeq, %481, %558 : vector<40x34xf32>
      %cst_126 = arith.constant 1.000000e+10 : f32
      %560 = vector.broadcast %cst_126 : f32 to vector<40x34xf32>
      %561 = arith.select %559, %560, %539 : vector<40x34xi1>, vector<40x34xf32>
      %c3_i32_127 = arith.constant 3 : i32
      %562 = vector.broadcast %c3_i32_127 : i32 to vector<40x17xi32>
      %563 = arith.cmpi eq, %55, %562 : vector<40x17xi32>
      %564 = vector.shape_cast %551 : vector<40x1xf32> to vector<40x1xf32>
      %565 = vector.broadcast %564 : vector<40x1xf32> to vector<40x17xf32>
      %566 = arith.select %563, %565, %544 : vector<40x17xi1>, vector<40x17xf32>
      %c3_i32_128 = arith.constant 3 : i32
      %567 = vector.broadcast %c3_i32_128 : i32 to vector<40x17xi32>
      %568 = arith.cmpi eq, %55, %567 : vector<40x17xi32>
      %569 = vector.shape_cast %557 : vector<40x1xf32> to vector<40x1xf32>
      %570 = vector.broadcast %569 : vector<40x1xf32> to vector<40x17xf32>
      %571 = arith.select %568, %570, %549 : vector<40x17xi1>, vector<40x17xf32>
      %cst_129 = arith.constant dense<0x7F800000> : vector<40xf32>
      %572 = vector.multi_reduction <minimumf>, %561, %cst_129 [1] : vector<40x34xf32> to vector<40xf32>
      %573 = vector.shape_cast %572 : vector<40xf32> to vector<40x1xf32>
      %574 = vector.broadcast %573 : vector<40x1xf32> to vector<40x34xf32>
      %575 = arith.cmpf ole, %561, %574 : vector<40x34xf32>
      %cst_130 = arith.constant 1.000000e+10 : f32
      %576 = vector.broadcast %cst_130 : f32 to vector<40x34xf32>
      %577 = arith.select %575, %481, %576 : vector<40x34xi1>, vector<40x34xf32>
      %cst_131 = arith.constant dense<0x7F800000> : vector<40xf32>
      %578 = vector.multi_reduction <minimumf>, %577, %cst_131 [1] : vector<40x34xf32> to vector<40xf32>
      %579 = vector.shape_cast %578 : vector<40xf32> to vector<40x1xf32>
      %580 = vector.broadcast %579 : vector<40x1xf32> to vector<40x34xf32>
      %581 = arith.cmpf oeq, %481, %580 : vector<40x34xf32>
      %cst_132 = arith.constant 1.000000e+10 : f32
      %582 = vector.broadcast %cst_132 : f32 to vector<40x34xf32>
      %583 = arith.select %581, %582, %561 : vector<40x34xi1>, vector<40x34xf32>
      %c4_i32_133 = arith.constant 4 : i32
      %584 = vector.broadcast %c4_i32_133 : i32 to vector<40x17xi32>
      %585 = arith.cmpi eq, %55, %584 : vector<40x17xi32>
      %586 = vector.shape_cast %573 : vector<40x1xf32> to vector<40x1xf32>
      %587 = vector.broadcast %586 : vector<40x1xf32> to vector<40x17xf32>
      %588 = arith.select %585, %587, %566 : vector<40x17xi1>, vector<40x17xf32>
      %c4_i32_134 = arith.constant 4 : i32
      %589 = vector.broadcast %c4_i32_134 : i32 to vector<40x17xi32>
      %590 = arith.cmpi eq, %55, %589 : vector<40x17xi32>
      %591 = vector.shape_cast %579 : vector<40x1xf32> to vector<40x1xf32>
      %592 = vector.broadcast %591 : vector<40x1xf32> to vector<40x17xf32>
      %593 = arith.select %590, %592, %571 : vector<40x17xi1>, vector<40x17xf32>
      %cst_135 = arith.constant dense<0x7F800000> : vector<40xf32>
      %594 = vector.multi_reduction <minimumf>, %583, %cst_135 [1] : vector<40x34xf32> to vector<40xf32>
      %595 = vector.shape_cast %594 : vector<40xf32> to vector<40x1xf32>
      %596 = vector.broadcast %595 : vector<40x1xf32> to vector<40x34xf32>
      %597 = arith.cmpf ole, %583, %596 : vector<40x34xf32>
      %cst_136 = arith.constant 1.000000e+10 : f32
      %598 = vector.broadcast %cst_136 : f32 to vector<40x34xf32>
      %599 = arith.select %597, %481, %598 : vector<40x34xi1>, vector<40x34xf32>
      %cst_137 = arith.constant dense<0x7F800000> : vector<40xf32>
      %600 = vector.multi_reduction <minimumf>, %599, %cst_137 [1] : vector<40x34xf32> to vector<40xf32>
      %601 = vector.shape_cast %600 : vector<40xf32> to vector<40x1xf32>
      %602 = vector.broadcast %601 : vector<40x1xf32> to vector<40x34xf32>
      %603 = arith.cmpf oeq, %481, %602 : vector<40x34xf32>
      %cst_138 = arith.constant 1.000000e+10 : f32
      %604 = vector.broadcast %cst_138 : f32 to vector<40x34xf32>
      %605 = arith.select %603, %604, %583 : vector<40x34xi1>, vector<40x34xf32>
      %c5_i32_139 = arith.constant 5 : i32
      %606 = vector.broadcast %c5_i32_139 : i32 to vector<40x17xi32>
      %607 = arith.cmpi eq, %55, %606 : vector<40x17xi32>
      %608 = vector.shape_cast %595 : vector<40x1xf32> to vector<40x1xf32>
      %609 = vector.broadcast %608 : vector<40x1xf32> to vector<40x17xf32>
      %610 = arith.select %607, %609, %588 : vector<40x17xi1>, vector<40x17xf32>
      %c5_i32_140 = arith.constant 5 : i32
      %611 = vector.broadcast %c5_i32_140 : i32 to vector<40x17xi32>
      %612 = arith.cmpi eq, %55, %611 : vector<40x17xi32>
      %613 = vector.shape_cast %601 : vector<40x1xf32> to vector<40x1xf32>
      %614 = vector.broadcast %613 : vector<40x1xf32> to vector<40x17xf32>
      %615 = arith.select %612, %614, %593 : vector<40x17xi1>, vector<40x17xf32>
      %cst_141 = arith.constant dense<0x7F800000> : vector<40xf32>
      %616 = vector.multi_reduction <minimumf>, %605, %cst_141 [1] : vector<40x34xf32> to vector<40xf32>
      %617 = vector.shape_cast %616 : vector<40xf32> to vector<40x1xf32>
      %618 = vector.broadcast %617 : vector<40x1xf32> to vector<40x34xf32>
      %619 = arith.cmpf ole, %605, %618 : vector<40x34xf32>
      %cst_142 = arith.constant 1.000000e+10 : f32
      %620 = vector.broadcast %cst_142 : f32 to vector<40x34xf32>
      %621 = arith.select %619, %481, %620 : vector<40x34xi1>, vector<40x34xf32>
      %cst_143 = arith.constant dense<0x7F800000> : vector<40xf32>
      %622 = vector.multi_reduction <minimumf>, %621, %cst_143 [1] : vector<40x34xf32> to vector<40xf32>
      %623 = vector.shape_cast %622 : vector<40xf32> to vector<40x1xf32>
      %624 = vector.broadcast %623 : vector<40x1xf32> to vector<40x34xf32>
      %625 = arith.cmpf oeq, %481, %624 : vector<40x34xf32>
      %cst_144 = arith.constant 1.000000e+10 : f32
      %626 = vector.broadcast %cst_144 : f32 to vector<40x34xf32>
      %627 = arith.select %625, %626, %605 : vector<40x34xi1>, vector<40x34xf32>
      %c6_i32_145 = arith.constant 6 : i32
      %628 = vector.broadcast %c6_i32_145 : i32 to vector<40x17xi32>
      %629 = arith.cmpi eq, %55, %628 : vector<40x17xi32>
      %630 = vector.shape_cast %617 : vector<40x1xf32> to vector<40x1xf32>
      %631 = vector.broadcast %630 : vector<40x1xf32> to vector<40x17xf32>
      %632 = arith.select %629, %631, %610 : vector<40x17xi1>, vector<40x17xf32>
      %c6_i32_146 = arith.constant 6 : i32
      %633 = vector.broadcast %c6_i32_146 : i32 to vector<40x17xi32>
      %634 = arith.cmpi eq, %55, %633 : vector<40x17xi32>
      %635 = vector.shape_cast %623 : vector<40x1xf32> to vector<40x1xf32>
      %636 = vector.broadcast %635 : vector<40x1xf32> to vector<40x17xf32>
      %637 = arith.select %634, %636, %615 : vector<40x17xi1>, vector<40x17xf32>
      %cst_147 = arith.constant dense<0x7F800000> : vector<40xf32>
      %638 = vector.multi_reduction <minimumf>, %627, %cst_147 [1] : vector<40x34xf32> to vector<40xf32>
      %639 = vector.shape_cast %638 : vector<40xf32> to vector<40x1xf32>
      %640 = vector.broadcast %639 : vector<40x1xf32> to vector<40x34xf32>
      %641 = arith.cmpf ole, %627, %640 : vector<40x34xf32>
      %cst_148 = arith.constant 1.000000e+10 : f32
      %642 = vector.broadcast %cst_148 : f32 to vector<40x34xf32>
      %643 = arith.select %641, %481, %642 : vector<40x34xi1>, vector<40x34xf32>
      %cst_149 = arith.constant dense<0x7F800000> : vector<40xf32>
      %644 = vector.multi_reduction <minimumf>, %643, %cst_149 [1] : vector<40x34xf32> to vector<40xf32>
      %645 = vector.shape_cast %644 : vector<40xf32> to vector<40x1xf32>
      %646 = vector.broadcast %645 : vector<40x1xf32> to vector<40x34xf32>
      %647 = arith.cmpf oeq, %481, %646 : vector<40x34xf32>
      %cst_150 = arith.constant 1.000000e+10 : f32
      %648 = vector.broadcast %cst_150 : f32 to vector<40x34xf32>
      %649 = arith.select %647, %648, %627 : vector<40x34xi1>, vector<40x34xf32>
      %c7_i32_151 = arith.constant 7 : i32
      %650 = vector.broadcast %c7_i32_151 : i32 to vector<40x17xi32>
      %651 = arith.cmpi eq, %55, %650 : vector<40x17xi32>
      %652 = vector.shape_cast %639 : vector<40x1xf32> to vector<40x1xf32>
      %653 = vector.broadcast %652 : vector<40x1xf32> to vector<40x17xf32>
      %654 = arith.select %651, %653, %632 : vector<40x17xi1>, vector<40x17xf32>
      %c7_i32_152 = arith.constant 7 : i32
      %655 = vector.broadcast %c7_i32_152 : i32 to vector<40x17xi32>
      %656 = arith.cmpi eq, %55, %655 : vector<40x17xi32>
      %657 = vector.shape_cast %645 : vector<40x1xf32> to vector<40x1xf32>
      %658 = vector.broadcast %657 : vector<40x1xf32> to vector<40x17xf32>
      %659 = arith.select %656, %658, %637 : vector<40x17xi1>, vector<40x17xf32>
      %cst_153 = arith.constant dense<0x7F800000> : vector<40xf32>
      %660 = vector.multi_reduction <minimumf>, %649, %cst_153 [1] : vector<40x34xf32> to vector<40xf32>
      %661 = vector.shape_cast %660 : vector<40xf32> to vector<40x1xf32>
      %662 = vector.broadcast %661 : vector<40x1xf32> to vector<40x34xf32>
      %663 = arith.cmpf ole, %649, %662 : vector<40x34xf32>
      %cst_154 = arith.constant 1.000000e+10 : f32
      %664 = vector.broadcast %cst_154 : f32 to vector<40x34xf32>
      %665 = arith.select %663, %481, %664 : vector<40x34xi1>, vector<40x34xf32>
      %cst_155 = arith.constant dense<0x7F800000> : vector<40xf32>
      %666 = vector.multi_reduction <minimumf>, %665, %cst_155 [1] : vector<40x34xf32> to vector<40xf32>
      %667 = vector.shape_cast %666 : vector<40xf32> to vector<40x1xf32>
      %668 = vector.broadcast %667 : vector<40x1xf32> to vector<40x34xf32>
      %669 = arith.cmpf oeq, %481, %668 : vector<40x34xf32>
      %cst_156 = arith.constant 1.000000e+10 : f32
      %670 = vector.broadcast %cst_156 : f32 to vector<40x34xf32>
      %671 = arith.select %669, %670, %649 : vector<40x34xi1>, vector<40x34xf32>
      %c8_i32_157 = arith.constant 8 : i32
      %672 = vector.broadcast %c8_i32_157 : i32 to vector<40x17xi32>
      %673 = arith.cmpi eq, %55, %672 : vector<40x17xi32>
      %674 = vector.shape_cast %661 : vector<40x1xf32> to vector<40x1xf32>
      %675 = vector.broadcast %674 : vector<40x1xf32> to vector<40x17xf32>
      %676 = arith.select %673, %675, %654 : vector<40x17xi1>, vector<40x17xf32>
      %c8_i32_158 = arith.constant 8 : i32
      %677 = vector.broadcast %c8_i32_158 : i32 to vector<40x17xi32>
      %678 = arith.cmpi eq, %55, %677 : vector<40x17xi32>
      %679 = vector.shape_cast %667 : vector<40x1xf32> to vector<40x1xf32>
      %680 = vector.broadcast %679 : vector<40x1xf32> to vector<40x17xf32>
      %681 = arith.select %678, %680, %659 : vector<40x17xi1>, vector<40x17xf32>
      %cst_159 = arith.constant dense<0x7F800000> : vector<40xf32>
      %682 = vector.multi_reduction <minimumf>, %671, %cst_159 [1] : vector<40x34xf32> to vector<40xf32>
      %683 = vector.shape_cast %682 : vector<40xf32> to vector<40x1xf32>
      %684 = vector.broadcast %683 : vector<40x1xf32> to vector<40x34xf32>
      %685 = arith.cmpf ole, %671, %684 : vector<40x34xf32>
      %cst_160 = arith.constant 1.000000e+10 : f32
      %686 = vector.broadcast %cst_160 : f32 to vector<40x34xf32>
      %687 = arith.select %685, %481, %686 : vector<40x34xi1>, vector<40x34xf32>
      %cst_161 = arith.constant dense<0x7F800000> : vector<40xf32>
      %688 = vector.multi_reduction <minimumf>, %687, %cst_161 [1] : vector<40x34xf32> to vector<40xf32>
      %689 = vector.shape_cast %688 : vector<40xf32> to vector<40x1xf32>
      %690 = vector.broadcast %689 : vector<40x1xf32> to vector<40x34xf32>
      %691 = arith.cmpf oeq, %481, %690 : vector<40x34xf32>
      %cst_162 = arith.constant 1.000000e+10 : f32
      %692 = vector.broadcast %cst_162 : f32 to vector<40x34xf32>
      %693 = arith.select %691, %692, %671 : vector<40x34xi1>, vector<40x34xf32>
      %c9_i32_163 = arith.constant 9 : i32
      %694 = vector.broadcast %c9_i32_163 : i32 to vector<40x17xi32>
      %695 = arith.cmpi eq, %55, %694 : vector<40x17xi32>
      %696 = vector.shape_cast %683 : vector<40x1xf32> to vector<40x1xf32>
      %697 = vector.broadcast %696 : vector<40x1xf32> to vector<40x17xf32>
      %698 = arith.select %695, %697, %676 : vector<40x17xi1>, vector<40x17xf32>
      %c9_i32_164 = arith.constant 9 : i32
      %699 = vector.broadcast %c9_i32_164 : i32 to vector<40x17xi32>
      %700 = arith.cmpi eq, %55, %699 : vector<40x17xi32>
      %701 = vector.shape_cast %689 : vector<40x1xf32> to vector<40x1xf32>
      %702 = vector.broadcast %701 : vector<40x1xf32> to vector<40x17xf32>
      %703 = arith.select %700, %702, %681 : vector<40x17xi1>, vector<40x17xf32>
      %cst_165 = arith.constant dense<0x7F800000> : vector<40xf32>
      %704 = vector.multi_reduction <minimumf>, %693, %cst_165 [1] : vector<40x34xf32> to vector<40xf32>
      %705 = vector.shape_cast %704 : vector<40xf32> to vector<40x1xf32>
      %706 = vector.broadcast %705 : vector<40x1xf32> to vector<40x34xf32>
      %707 = arith.cmpf ole, %693, %706 : vector<40x34xf32>
      %cst_166 = arith.constant 1.000000e+10 : f32
      %708 = vector.broadcast %cst_166 : f32 to vector<40x34xf32>
      %709 = arith.select %707, %481, %708 : vector<40x34xi1>, vector<40x34xf32>
      %cst_167 = arith.constant dense<0x7F800000> : vector<40xf32>
      %710 = vector.multi_reduction <minimumf>, %709, %cst_167 [1] : vector<40x34xf32> to vector<40xf32>
      %711 = vector.shape_cast %710 : vector<40xf32> to vector<40x1xf32>
      %712 = vector.broadcast %711 : vector<40x1xf32> to vector<40x34xf32>
      %713 = arith.cmpf oeq, %481, %712 : vector<40x34xf32>
      %cst_168 = arith.constant 1.000000e+10 : f32
      %714 = vector.broadcast %cst_168 : f32 to vector<40x34xf32>
      %715 = arith.select %713, %714, %693 : vector<40x34xi1>, vector<40x34xf32>
      %c10_i32_169 = arith.constant 10 : i32
      %716 = vector.broadcast %c10_i32_169 : i32 to vector<40x17xi32>
      %717 = arith.cmpi eq, %55, %716 : vector<40x17xi32>
      %718 = vector.shape_cast %705 : vector<40x1xf32> to vector<40x1xf32>
      %719 = vector.broadcast %718 : vector<40x1xf32> to vector<40x17xf32>
      %720 = arith.select %717, %719, %698 : vector<40x17xi1>, vector<40x17xf32>
      %c10_i32_170 = arith.constant 10 : i32
      %721 = vector.broadcast %c10_i32_170 : i32 to vector<40x17xi32>
      %722 = arith.cmpi eq, %55, %721 : vector<40x17xi32>
      %723 = vector.shape_cast %711 : vector<40x1xf32> to vector<40x1xf32>
      %724 = vector.broadcast %723 : vector<40x1xf32> to vector<40x17xf32>
      %725 = arith.select %722, %724, %703 : vector<40x17xi1>, vector<40x17xf32>
      %cst_171 = arith.constant dense<0x7F800000> : vector<40xf32>
      %726 = vector.multi_reduction <minimumf>, %715, %cst_171 [1] : vector<40x34xf32> to vector<40xf32>
      %727 = vector.shape_cast %726 : vector<40xf32> to vector<40x1xf32>
      %728 = vector.broadcast %727 : vector<40x1xf32> to vector<40x34xf32>
      %729 = arith.cmpf ole, %715, %728 : vector<40x34xf32>
      %cst_172 = arith.constant 1.000000e+10 : f32
      %730 = vector.broadcast %cst_172 : f32 to vector<40x34xf32>
      %731 = arith.select %729, %481, %730 : vector<40x34xi1>, vector<40x34xf32>
      %cst_173 = arith.constant dense<0x7F800000> : vector<40xf32>
      %732 = vector.multi_reduction <minimumf>, %731, %cst_173 [1] : vector<40x34xf32> to vector<40xf32>
      %733 = vector.shape_cast %732 : vector<40xf32> to vector<40x1xf32>
      %734 = vector.broadcast %733 : vector<40x1xf32> to vector<40x34xf32>
      %735 = arith.cmpf oeq, %481, %734 : vector<40x34xf32>
      %cst_174 = arith.constant 1.000000e+10 : f32
      %736 = vector.broadcast %cst_174 : f32 to vector<40x34xf32>
      %737 = arith.select %735, %736, %715 : vector<40x34xi1>, vector<40x34xf32>
      %c11_i32_175 = arith.constant 11 : i32
      %738 = vector.broadcast %c11_i32_175 : i32 to vector<40x17xi32>
      %739 = arith.cmpi eq, %55, %738 : vector<40x17xi32>
      %740 = vector.shape_cast %727 : vector<40x1xf32> to vector<40x1xf32>
      %741 = vector.broadcast %740 : vector<40x1xf32> to vector<40x17xf32>
      %742 = arith.select %739, %741, %720 : vector<40x17xi1>, vector<40x17xf32>
      %c11_i32_176 = arith.constant 11 : i32
      %743 = vector.broadcast %c11_i32_176 : i32 to vector<40x17xi32>
      %744 = arith.cmpi eq, %55, %743 : vector<40x17xi32>
      %745 = vector.shape_cast %733 : vector<40x1xf32> to vector<40x1xf32>
      %746 = vector.broadcast %745 : vector<40x1xf32> to vector<40x17xf32>
      %747 = arith.select %744, %746, %725 : vector<40x17xi1>, vector<40x17xf32>
      %cst_177 = arith.constant dense<0x7F800000> : vector<40xf32>
      %748 = vector.multi_reduction <minimumf>, %737, %cst_177 [1] : vector<40x34xf32> to vector<40xf32>
      %749 = vector.shape_cast %748 : vector<40xf32> to vector<40x1xf32>
      %750 = vector.broadcast %749 : vector<40x1xf32> to vector<40x34xf32>
      %751 = arith.cmpf ole, %737, %750 : vector<40x34xf32>
      %cst_178 = arith.constant 1.000000e+10 : f32
      %752 = vector.broadcast %cst_178 : f32 to vector<40x34xf32>
      %753 = arith.select %751, %481, %752 : vector<40x34xi1>, vector<40x34xf32>
      %cst_179 = arith.constant dense<0x7F800000> : vector<40xf32>
      %754 = vector.multi_reduction <minimumf>, %753, %cst_179 [1] : vector<40x34xf32> to vector<40xf32>
      %755 = vector.shape_cast %754 : vector<40xf32> to vector<40x1xf32>
      %756 = vector.broadcast %755 : vector<40x1xf32> to vector<40x34xf32>
      %757 = arith.cmpf oeq, %481, %756 : vector<40x34xf32>
      %cst_180 = arith.constant 1.000000e+10 : f32
      %758 = vector.broadcast %cst_180 : f32 to vector<40x34xf32>
      %759 = arith.select %757, %758, %737 : vector<40x34xi1>, vector<40x34xf32>
      %c12_i32_181 = arith.constant 12 : i32
      %760 = vector.broadcast %c12_i32_181 : i32 to vector<40x17xi32>
      %761 = arith.cmpi eq, %55, %760 : vector<40x17xi32>
      %762 = vector.shape_cast %749 : vector<40x1xf32> to vector<40x1xf32>
      %763 = vector.broadcast %762 : vector<40x1xf32> to vector<40x17xf32>
      %764 = arith.select %761, %763, %742 : vector<40x17xi1>, vector<40x17xf32>
      %c12_i32_182 = arith.constant 12 : i32
      %765 = vector.broadcast %c12_i32_182 : i32 to vector<40x17xi32>
      %766 = arith.cmpi eq, %55, %765 : vector<40x17xi32>
      %767 = vector.shape_cast %755 : vector<40x1xf32> to vector<40x1xf32>
      %768 = vector.broadcast %767 : vector<40x1xf32> to vector<40x17xf32>
      %769 = arith.select %766, %768, %747 : vector<40x17xi1>, vector<40x17xf32>
      %cst_183 = arith.constant dense<0x7F800000> : vector<40xf32>
      %770 = vector.multi_reduction <minimumf>, %759, %cst_183 [1] : vector<40x34xf32> to vector<40xf32>
      %771 = vector.shape_cast %770 : vector<40xf32> to vector<40x1xf32>
      %772 = vector.broadcast %771 : vector<40x1xf32> to vector<40x34xf32>
      %773 = arith.cmpf ole, %759, %772 : vector<40x34xf32>
      %cst_184 = arith.constant 1.000000e+10 : f32
      %774 = vector.broadcast %cst_184 : f32 to vector<40x34xf32>
      %775 = arith.select %773, %481, %774 : vector<40x34xi1>, vector<40x34xf32>
      %cst_185 = arith.constant dense<0x7F800000> : vector<40xf32>
      %776 = vector.multi_reduction <minimumf>, %775, %cst_185 [1] : vector<40x34xf32> to vector<40xf32>
      %777 = vector.shape_cast %776 : vector<40xf32> to vector<40x1xf32>
      %778 = vector.broadcast %777 : vector<40x1xf32> to vector<40x34xf32>
      %779 = arith.cmpf oeq, %481, %778 : vector<40x34xf32>
      %cst_186 = arith.constant 1.000000e+10 : f32
      %780 = vector.broadcast %cst_186 : f32 to vector<40x34xf32>
      %781 = arith.select %779, %780, %759 : vector<40x34xi1>, vector<40x34xf32>
      %c13_i32_187 = arith.constant 13 : i32
      %782 = vector.broadcast %c13_i32_187 : i32 to vector<40x17xi32>
      %783 = arith.cmpi eq, %55, %782 : vector<40x17xi32>
      %784 = vector.shape_cast %771 : vector<40x1xf32> to vector<40x1xf32>
      %785 = vector.broadcast %784 : vector<40x1xf32> to vector<40x17xf32>
      %786 = arith.select %783, %785, %764 : vector<40x17xi1>, vector<40x17xf32>
      %c13_i32_188 = arith.constant 13 : i32
      %787 = vector.broadcast %c13_i32_188 : i32 to vector<40x17xi32>
      %788 = arith.cmpi eq, %55, %787 : vector<40x17xi32>
      %789 = vector.shape_cast %777 : vector<40x1xf32> to vector<40x1xf32>
      %790 = vector.broadcast %789 : vector<40x1xf32> to vector<40x17xf32>
      %791 = arith.select %788, %790, %769 : vector<40x17xi1>, vector<40x17xf32>
      %cst_189 = arith.constant dense<0x7F800000> : vector<40xf32>
      %792 = vector.multi_reduction <minimumf>, %781, %cst_189 [1] : vector<40x34xf32> to vector<40xf32>
      %793 = vector.shape_cast %792 : vector<40xf32> to vector<40x1xf32>
      %794 = vector.broadcast %793 : vector<40x1xf32> to vector<40x34xf32>
      %795 = arith.cmpf ole, %781, %794 : vector<40x34xf32>
      %cst_190 = arith.constant 1.000000e+10 : f32
      %796 = vector.broadcast %cst_190 : f32 to vector<40x34xf32>
      %797 = arith.select %795, %481, %796 : vector<40x34xi1>, vector<40x34xf32>
      %cst_191 = arith.constant dense<0x7F800000> : vector<40xf32>
      %798 = vector.multi_reduction <minimumf>, %797, %cst_191 [1] : vector<40x34xf32> to vector<40xf32>
      %799 = vector.shape_cast %798 : vector<40xf32> to vector<40x1xf32>
      %800 = vector.broadcast %799 : vector<40x1xf32> to vector<40x34xf32>
      %801 = arith.cmpf oeq, %481, %800 : vector<40x34xf32>
      %cst_192 = arith.constant 1.000000e+10 : f32
      %802 = vector.broadcast %cst_192 : f32 to vector<40x34xf32>
      %803 = arith.select %801, %802, %781 : vector<40x34xi1>, vector<40x34xf32>
      %c14_i32_193 = arith.constant 14 : i32
      %804 = vector.broadcast %c14_i32_193 : i32 to vector<40x17xi32>
      %805 = arith.cmpi eq, %55, %804 : vector<40x17xi32>
      %806 = vector.shape_cast %793 : vector<40x1xf32> to vector<40x1xf32>
      %807 = vector.broadcast %806 : vector<40x1xf32> to vector<40x17xf32>
      %808 = arith.select %805, %807, %786 : vector<40x17xi1>, vector<40x17xf32>
      %c14_i32_194 = arith.constant 14 : i32
      %809 = vector.broadcast %c14_i32_194 : i32 to vector<40x17xi32>
      %810 = arith.cmpi eq, %55, %809 : vector<40x17xi32>
      %811 = vector.shape_cast %799 : vector<40x1xf32> to vector<40x1xf32>
      %812 = vector.broadcast %811 : vector<40x1xf32> to vector<40x17xf32>
      %813 = arith.select %810, %812, %791 : vector<40x17xi1>, vector<40x17xf32>
      %cst_195 = arith.constant dense<0x7F800000> : vector<40xf32>
      %814 = vector.multi_reduction <minimumf>, %803, %cst_195 [1] : vector<40x34xf32> to vector<40xf32>
      %815 = vector.shape_cast %814 : vector<40xf32> to vector<40x1xf32>
      %816 = vector.broadcast %815 : vector<40x1xf32> to vector<40x34xf32>
      %817 = arith.cmpf ole, %803, %816 : vector<40x34xf32>
      %cst_196 = arith.constant 1.000000e+10 : f32
      %818 = vector.broadcast %cst_196 : f32 to vector<40x34xf32>
      %819 = arith.select %817, %481, %818 : vector<40x34xi1>, vector<40x34xf32>
      %cst_197 = arith.constant dense<0x7F800000> : vector<40xf32>
      %820 = vector.multi_reduction <minimumf>, %819, %cst_197 [1] : vector<40x34xf32> to vector<40xf32>
      %821 = vector.shape_cast %820 : vector<40xf32> to vector<40x1xf32>
      %822 = vector.broadcast %821 : vector<40x1xf32> to vector<40x34xf32>
      %823 = arith.cmpf oeq, %481, %822 : vector<40x34xf32>
      %cst_198 = arith.constant 1.000000e+10 : f32
      %824 = vector.broadcast %cst_198 : f32 to vector<40x34xf32>
      %825 = arith.select %823, %824, %803 : vector<40x34xi1>, vector<40x34xf32>
      %c15_i32_199 = arith.constant 15 : i32
      %826 = vector.broadcast %c15_i32_199 : i32 to vector<40x17xi32>
      %827 = arith.cmpi eq, %55, %826 : vector<40x17xi32>
      %828 = vector.shape_cast %815 : vector<40x1xf32> to vector<40x1xf32>
      %829 = vector.broadcast %828 : vector<40x1xf32> to vector<40x17xf32>
      %830 = arith.select %827, %829, %808 : vector<40x17xi1>, vector<40x17xf32>
      %c15_i32_200 = arith.constant 15 : i32
      %831 = vector.broadcast %c15_i32_200 : i32 to vector<40x17xi32>
      %832 = arith.cmpi eq, %55, %831 : vector<40x17xi32>
      %833 = vector.shape_cast %821 : vector<40x1xf32> to vector<40x1xf32>
      %834 = vector.broadcast %833 : vector<40x1xf32> to vector<40x17xf32>
      %835 = arith.select %832, %834, %813 : vector<40x17xi1>, vector<40x17xf32>
      %cst_201 = arith.constant dense<0x7F800000> : vector<40xf32>
      %836 = vector.multi_reduction <minimumf>, %825, %cst_201 [1] : vector<40x34xf32> to vector<40xf32>
      %837 = vector.shape_cast %836 : vector<40xf32> to vector<40x1xf32>
      %838 = vector.broadcast %837 : vector<40x1xf32> to vector<40x34xf32>
      %839 = arith.cmpf ole, %825, %838 : vector<40x34xf32>
      %cst_202 = arith.constant 1.000000e+10 : f32
      %840 = vector.broadcast %cst_202 : f32 to vector<40x34xf32>
      %841 = arith.select %839, %481, %840 : vector<40x34xi1>, vector<40x34xf32>
      %cst_203 = arith.constant dense<0x7F800000> : vector<40xf32>
      %842 = vector.multi_reduction <minimumf>, %841, %cst_203 [1] : vector<40x34xf32> to vector<40xf32>
      %843 = vector.shape_cast %842 : vector<40xf32> to vector<40x1xf32>
      %c16_i32_204 = arith.constant 16 : i32
      %844 = vector.broadcast %c16_i32_204 : i32 to vector<40x17xi32>
      %845 = arith.cmpi eq, %55, %844 : vector<40x17xi32>
      %846 = vector.shape_cast %837 : vector<40x1xf32> to vector<40x1xf32>
      %847 = vector.broadcast %846 : vector<40x1xf32> to vector<40x17xf32>
      %848 = arith.select %845, %847, %830 : vector<40x17xi1>, vector<40x17xf32>
      %c16_i32_205 = arith.constant 16 : i32
      %849 = vector.broadcast %c16_i32_205 : i32 to vector<40x17xi32>
      %850 = arith.cmpi eq, %55, %849 : vector<40x17xi32>
      %851 = vector.shape_cast %843 : vector<40x1xf32> to vector<40x1xf32>
      %852 = vector.broadcast %851 : vector<40x1xf32> to vector<40x17xf32>
      %853 = arith.select %850, %852, %835 : vector<40x17xi1>, vector<40x17xf32>
      %c0_206 = arith.constant 0 : index
      %c0_207 = arith.constant 0 : index
      %854 = vector.load %arg12[%c0_206, %c0_207] : memref<40x17xf32, #tpu.memory_space<vmem>>, vector<40x17xf32>
      tpu.vector_store %arg12[%c0_206, %c0_207], %848 {strides = array<i32>} : memref<40x17xf32, #tpu.memory_space<vmem>>, vector<40x17xf32>,
      %c0_208 = arith.constant 0 : index
      %c0_209 = arith.constant 0 : index
      %855 = vector.load %arg13[%c0_208, %c0_209] : memref<40x17xf32, #tpu.memory_space<vmem>>, vector<40x17xf32>
      tpu.vector_store %arg13[%c0_208, %c0_209], %853 {strides = array<i32>} : memref<40x17xf32, #tpu.memory_space<vmem>>, vector<40x17xf32>,
    } else {
    }
    %c0_i32_2 = arith.constant 0 : i32
    %16 = arith.cmpi eq, %arg1, %c0_i32_2 : i32
    %17 = arith.extui %16 : i1 to i32
    %c0_i32_3 = arith.constant 0 : i32
    %18 = arith.cmpi ne, %17, %c0_i32_3 : i32
    scf.if %18 {
      %c0 = arith.constant 0 : index
      %c0_4 = arith.constant 0 : index
      %19 = vector.load %arg12[%c0, %c0_4] : memref<40x17xf32, #tpu.memory_space<vmem>>, vector<40x17xf32>
      %c0_5 = arith.constant 0 : index
      %c0_6 = arith.constant 0 : index
      %20 = vector.load %arg10[%c0_5, %c0_6] : memref<40x17xf32, #tpu.memory_space<vmem>>, vector<40x17xf32>
      tpu.vector_store %arg10[%c0_5, %c0_6], %19 {strides = array<i32>} : memref<40x17xf32, #tpu.memory_space<vmem>>, vector<40x17xf32>,
      %c0_7 = arith.constant 0 : index
      %c0_8 = arith.constant 0 : index
      %21 = vector.load %arg13[%c0_7, %c0_8] : memref<40x17xf32, #tpu.memory_space<vmem>>, vector<40x17xf32>
      %22 = arith.fptosi %21 : vector<40x17xf32> to vector<40x17xi32>
      %c0_9 = arith.constant 0 : index
      %c0_10 = arith.constant 0 : index
      %23 = vector.load %arg11[%c0_9, %c0_10] : memref<40x17xi32, #tpu.memory_space<vmem>>, vector<40x17xi32>
      tpu.vector_store %arg11[%c0_9, %c0_10], %22 {strides = array<i32>} : memref<40x17xi32, #tpu.memory_space<vmem>>, vector<40x17xi32>,
    } else {
    }
    return
  }
  func.func @transform_0(%arg0: i32, %arg1: i32, %arg2: memref<1xi32, #tpu.memory_space<smem>>, %arg3: memref<1xi32, #tpu.memory_space<smem>>, %arg4: memref<1xi32, #tpu.memory_space<smem>>, %arg5: memref<1xi32, #tpu.memory_space<smem>>) -> (i32, i32) {
    %c0_i32 = arith.constant 0 : i32
    %c0_i32_0 = arith.constant 0 : i32
    return %arg0, %c0_i32 : i32, i32
  }
  func.func @transform_1(%arg0: i32, %arg1: i32, %arg2: memref<1xi32, #tpu.memory_space<smem>>, %arg3: memref<1xi32, #tpu.memory_space<smem>>, %arg4: memref<1xi32, #tpu.memory_space<smem>>, %arg5: memref<1xi32, #tpu.memory_space<smem>>) -> (i32, i32) {
    %c0_i32 = arith.constant 0 : i32
    %c0_i32_0 = arith.constant 0 : i32
    return %c0_i32, %arg1 : i32, i32
  }
  func.func @transform_2(%arg0: i32, %arg1: i32, %arg2: memref<1xi32, #tpu.memory_space<smem>>, %arg3: memref<1xi32, #tpu.memory_space<smem>>, %arg4: memref<1xi32, #tpu.memory_space<smem>>, %arg5: memref<1xi32, #tpu.memory_space<smem>>) -> (i32, i32) {
    %c0_i32 = arith.constant 0 : i32
    %c0_i32_0 = arith.constant 0 : i32
    return %arg0, %c0_i32 : i32, i32
  }
  func.func @transform_3(%arg0: i32, %arg1: i32, %arg2: memref<1xi32, #tpu.memory_space<smem>>, %arg3: memref<1xi32, #tpu.memory_space<smem>>, %arg4: memref<1xi32, #tpu.memory_space<smem>>, %arg5: memref<1xi32, #tpu.memory_space<smem>>) -> (i32, i32) {
    %c0_i32 = arith.constant 0 : i32
    %c0_i32_0 = arith.constant 0 : i32
    return %c0_i32, %arg1 : i32, i32
  }
  func.func @transform_4(%arg0: i32, %arg1: i32, %arg2: memref<1xi32, #tpu.memory_space<smem>>, %arg3: memref<1xi32, #tpu.memory_space<smem>>, %arg4: memref<1xi32, #tpu.memory_space<smem>>, %arg5: memref<1xi32, #tpu.memory_space<smem>>) -> (i32, i32) {
    %c0_i32 = arith.constant 0 : i32
    %c0_i32_0 = arith.constant 0 : i32
    return %arg0, %c0_i32 : i32, i32
  }
  func.func @transform_5(%arg0: i32, %arg1: i32, %arg2: memref<1xi32, #tpu.memory_space<smem>>, %arg3: memref<1xi32, #tpu.memory_space<smem>>, %arg4: memref<1xi32, #tpu.memory_space<smem>>, %arg5: memref<1xi32, #tpu.memory_space<smem>>) -> (i32, i32) {
    %c0_i32 = arith.constant 0 : i32
    %c0_i32_0 = arith.constant 0 : i32
    return %arg0, %c0_i32 : i32, i32
  }
}

</mosaic_0001>

<bundles_post_ra>
// kernel: tpu_custom_call.1
= control target key start
LH: loop header
LB: loop body
LE: loop exit
PB: predicated region body
PF: predicated region fallthrough
CT: control target
= control target key end

     0   :  { %vm31_vm0 = vcmask 138240   ;;  %v2222_v0 = vmov 1e+10   ;;  %v2223_v1 = vmov 0.0   ;;  %s4850_s0 = inlined_call_operand.<no memory space> [shape: s32[1], index: 0, kind: input, shape index: {}]   ;;  %s4851_s1 = inlined_call_operand.<no memory space> [shape: s32[1], index: 1, kind: input, shape index: {}]   ;;  %s4852_s2 = inlined_call_operand.<no memory space> [shape: s32[1], index: 2, kind: input, shape index: {}]   ;;  %s4853_s3 = inlined_call_operand.<no memory space> [shape: s32[1], index: 3, kind: input, shape index: {}]   ;;  %s4854_s4 = inlined_call_operand.vmem [shape: f32[40,3], index: 4, kind: input, shape index: {}]   ;;  %s4855_s5 = inlined_call_operand.vmem [shape: f32[3,128], index: 5, kind: input, shape index: {}]   ;;  %s4856_s6 = inlined_call_operand.vmem [shape: s32[40,1], index: 6, kind: input, shape index: {}]   ;;  %s4857_s7 = inlined_call_operand.vmem [shape: s32[1,128], index: 7, kind: input, shape index: {}]   ;;  %s4858_s8 = inlined_call_operand.vmem [shape: f32[40,17], index: 8, kind: output, shape index: {0}]   ;;  %s4859_s9 = inlined_call_operand.vmem [shape: s32[40,17], index: 9, kind: output, shape index: {1}]  }
   0x1   :  { %32 = vst.msk [vmem:[#allocation2] sm:$0xff] %vm31_vm0, %v2222_v0  ;;  %33 = vst.msk [vmem:[#allocation2 + $0x8] sm:$0xff] %vm31_vm0, %v2222_v0  ;;  %p44_p0 = scmp.le.s32.totalorder %s4850_s0, %s4853_s3  ;;  %p47_p1 = scmp.le.s32.totalorder %s4852_s2, %s4851_s1 }
   0x2   :  { %34 = vst.msk [vmem:[#allocation2 + $0x10] sm:$0xff] %vm31_vm0, %v2222_v0  ;;  %35 = vst.msk [vmem:[#allocation2 + $0x18] sm:$0xff] %vm31_vm0, %v2222_v0 }
   0x3   :  { %36 = vst.msk [vmem:[#allocation2 + $0x20] sm:$0xff] %vm31_vm0, %v2222_v0  ;;  %37 = vst.msk [vmem:[#allocation3] sm:$0xff] %vm31_vm0, %v2223_v1  ;;  %p48_p2 = pnand %p47_p1, %p44_p0 }
   0x4   :  { %38 = vst.msk [vmem:[#allocation3 + $0x8] sm:$0xff] %vm31_vm0, %v2223_v1  ;;  %39 = vst.msk [vmem:[#allocation3 + $0x10] sm:$0xff] %vm31_vm0, %v2223_v1 }
   0x5   :  { %40 = vst.msk [vmem:[#allocation3 + $0x18] sm:$0xff] %vm31_vm0, %v2223_v1  ;;  %41 = vst.msk [vmem:[#allocation3 + $0x20] sm:$0xff] %vm31_vm0, %v2223_v1  ;;  %51 = sbr.rel (%p48_p2) target bundleno = 9753 (0x2619), region = 25 }
   0xa   :  { %v54_v2 = vld [vmem:[%s4854_s4 + $0x10] sm:$0xff]  ;;  %v53_v3 = vld [vmem:[%s4854_s4 + $0x8] sm:$0xff]  ;;  %v2224_v4 = vmov 1   ;;  %v2225_v5 = vmov 0   ;;  %v55_v6 = vld [vmem:[%s4854_s4 + $0x18] sm:$0xff]  ;;  %v2226_v9 = vmov 2   ;;  %v113_v19 = vlaneseq }
   0xb   :  { %2216 = vset.pattern.permute.xlu0 %v2224_v4  ;;  %2214 = vset.pattern.permute.xlu1 %v2225_v5  ;;  %v56_v7 = vld [vmem:[%s4854_s4 + $0x20] sm:$0xff]  ;;  %v59_v10 = vld [vmem:[%s4856_s6 + $0x8] sm:$0xff]  ;;  %v60_v13 = vld [vmem:[%s4856_s6 + $0x10] sm:$0xff] }
   0xc   :  { %100 = vperm.xlu1 %2214, %v54_v2   ;;  %137 = vperm.xlu0 %2216, %v53_v3   ;;  %v52_v8 = vld [vmem:[%s4854_s4] sm:$0xff]  ;;  %v61_v14 = vld [vmem:[%s4856_s6 + $0x18] sm:$0xff]  ;;  %v114_v22 = vshrl.u32 %v113_v19, 7 }
   0xd   :  { %v62_v11 = vld [vmem:[%s4856_s6 + $0x20] sm:$0xff] }
   0xe   :  { %v58_v12 = vld [vmem:[%s4856_s6] sm:$0xff]  ;;  %v154_v23 = vsub.s32 1, %v114_v22  ;;  %v193_v26 = vsub.s32 2, %v114_v22  ;;  %v115_v28 = vsub.s32 0, %v114_v22 }
   0xf   :  { %v57_v27 = vld [vmem:[%s4855_s5] sm:$0x7] }
  0x10   :  { %105 = vperm.xlu1 %2214, %v55_v6   ;;  %149 = vperm.xlu0 %2216, %v56_v7   ;;  %v155_v29 = vrot.slane %v57_v27, %v154_v23  ;;  %v194_v32 = vrot.slane %v57_v27, %v193_v26  ;;  %v116_v33 = vrot.slane %v57_v27, %v115_v28  ;;  %v2197_v48 = vld [vmem:[%s4857_s7] ss:$0 sm:$0xff]  ;;  %v2341_v27 = vand.u32 127, %v113_v19  ;;  %s2227_s7 = smov 17  }
  0x12   :  { %v2344_v28 = vcvt.s32.f32 %v2341_v27 }
  0x14   :  { %2215 = vset.pattern.permute.xlu1 %v2224_v4  ;;  %2218 = vset.pattern.permute.xlu0 %v2226_v9 }
  0x15   :  { %176 = vperm.xlu0 %2218, %v53_v3   ;;  %133 = vperm.xlu1 %2215, %v52_v8  }
  0x19   :  { %188 = vperm.xlu0 %2218, %v56_v7   ;;  %141 = vperm.xlu1 %2215, %v54_v2  }
  0x1d   :  { %2219 = vset.pattern.permute.xlu0 %v2225_v5  ;;  %145 = vperm.xlu1 %2215, %v55_v6  }
  0x1e   :  { %90 = vperm.xlu0 %2219, %v52_v8  }
  0x21   :  { %2217 = vset.pattern.permute.xlu1 %v2226_v9 }
  0x22   :  { %95 = vperm.xlu0 %2219, %v53_v3   ;;  %172 = vperm.xlu1 %2217, %v52_v8  }
  0x26   :  { %110 = vperm.xlu0 %2219, %v56_v7   ;;  %180 = vperm.xlu1 %2217, %v54_v2  }
  0x2a   :  { %68 = vperm.xlu0 %2219, %v59_v10   ;;  %184 = vperm.xlu1 %2217, %v55_v6  }
  0x2e   :  { %77 = vperm.xlu0 %2219, %v62_v11   ;;  %2220 = vset.pattern.permute.xlu1 %v2225_v5 }
  0x2f   :  { %65 = vperm.xlu1 %2220, %v58_v12  }
  0x32   :  { %2221 = vset.pattern.permute.xlu0 %v2226_v9 }
  0x33   :  { %71 = vperm.xlu1 %2220, %v60_v13  }
  0x37   :  { %74 = vperm.xlu1 %2220, %v61_v14  }
  0x87   :  { %v101_v15 = vpop.permute.xlu1 %100  ;;  %v138_v16 = vpop.permute.xlu0 %137 }
  0x88   :  { %v157_v34 = vsub.f32 %v138_v16, %v155_v29  ;;  %v119_v53 = vsub.f32 %v101_v15, %v116_v33 }
  0x8a   :  { %v162_v39 = vmul.f32 %v157_v34, %v157_v34  ;;  %v124_v1 = vmul.f32 %v119_v53, %v119_v53 }
  0x8b   :  { %v106_v17 = vpop.permute.xlu1 %105  ;;  %v150_v18 = vpop.permute.xlu0 %149 }
  0x8c   :  { %v160_v54 = vsub.f32 %v150_v18, %v155_v29  ;;  %v120_v2 = vsub.f32 %v106_v17, %v116_v33 }
  0x8e   :  { %v165_v3 = vmul.f32 %v160_v54, %v160_v54  ;;  %v125_v13 = vmul.f32 %v120_v2, %v120_v2 }
  0x90   :  { %v134_v20 = vpop.permute.xlu1 %133  ;;  %v177_v21 = vpop.permute.xlu0 %176 }
  0x91   :  { %v196_v37 = vsub.f32 %v177_v21, %v194_v32  ;;  %v156_v44 = vsub.f32 %v134_v20, %v155_v29 }
  0x93   :  { %v201_v45 = vmul.f32 %v196_v37, %v196_v37  ;;  %v161_v57 = vmul.f32 %v156_v44, %v156_v44 }
  0x94   :  { %v142_v24 = vpop.permute.xlu1 %141  ;;  %v189_v25 = vpop.permute.xlu0 %188 }
  0x95   :  { %v158_v49 = vsub.f32 %v142_v24, %v155_v29  ;;  %v199_v4 = vsub.f32 %v189_v25, %v194_v32 }
  0x97   :  { %v163_v61 = vmul.f32 %v158_v49, %v158_v49  ;;  %v204_v14 = vmul.f32 %v199_v4, %v199_v4 }
  0x98   :  { %v146_v30 = vpop.permute.xlu1 %145 }
  0x99   :  { %v91_v31 = vpop.permute.xlu0 %90  ;;  %v159_v62 = vsub.f32 %v146_v30, %v155_v29  ;;  %v168_v9 = vadd.f32 %v163_v61, %v124_v1 }
  0x9a   :  { %v117_v40 = vsub.f32 %v91_v31, %v116_v33 }
  0x9b   :  { %v164_v10 = vmul.f32 %v159_v62, %v159_v62 }
  0x9c   :  { %v122_v50 = vmul.f32 %v117_v40, %v117_v40 }
  0x9d   :  { %v96_v35 = vpop.permute.xlu0 %95  ;;  %v173_v36 = vpop.permute.xlu1 %172  ;;  %v169_v17 = vadd.f32 %v164_v10, %v125_v13 }
  0x9e   :  { %v118_v38 = vsub.f32 %v96_v35, %v116_v33  ;;  %v195_v47 = vsub.f32 %v173_v36, %v194_v32  ;;  %v166_v63 = vadd.f32 %v161_v57, %v122_v50 }
  0xa0   :  { %v123_v41 = vmul.f32 %v118_v38, %v118_v38  ;;  %v200_v58 = vmul.f32 %v195_v47, %v195_v47 }
  0xa1   :  { %v111_v42 = vpop.permute.xlu0 %110  ;;  %v181_v43 = vpop.permute.xlu1 %180 }
  0xa2   :  { %v167_v46 = vadd.f32 %v162_v39, %v123_v41  ;;  %v121_v51 = vsub.f32 %v111_v42, %v116_v33  ;;  %v197_v59 = vsub.f32 %v181_v43, %v194_v32  ;;  %v205_v8 = vadd.f32 %v200_v58, %v166_v63 }
  0xa4   :  { %v206_v52 = vadd.f32 %v201_v45, %v167_v46  ;;  %v126_v0 = vmul.f32 %v121_v51, %v121_v51  ;;  %v202_v5 = vmul.f32 %v197_v59, %v197_v59 }
  0xa5   :  { %v69_v55 = vpop.permute.xlu0 %68  ;;  %v185_v56 = vpop.permute.xlu1 %184 }
  0xa6   :  { %vm84_vm1 = vcmp.eq.s32.totalorder %v69_v55, %v2197_v48  ;;  %v198_v6 = vsub.f32 %v185_v56, %v194_v32  ;;  %v170_v11 = vadd.f32 %v165_v3, %v126_v0  ;;  %v207_v20 = vadd.f32 %v202_v5, %v168_v9 }
  0xa7   :  { %v2337_v60 = vsel %vm84_vm1, %v206_v52, 1e+10 }
  0xa8   :  { %223 = vmin.xlane.f32.xlu0 %v2337_v60  ;;  %v203_v15 = vmul.f32 %v198_v6, %v198_v6  ;;  %v209_v22 = vadd.f32 %v204_v14, %v170_v11 }
  0xa9   :  { %v78_v16 = vpop.permute.xlu0 %77 }
  0xaa   :  { %v66_v7 = vpop.permute.xlu1 %65  ;;  %vm87_vm4 = vcmp.eq.s32.totalorder %v78_v16, %v2197_v48  ;;  %v208_v24 = vadd.f32 %v203_v15, %v169_v17 }
  0xab   :  { %vm83_vm2 = vcmp.eq.s32.totalorder %v66_v7, %v2197_v48  ;;  %v214_v25 = vsel %vm87_vm4, %v209_v22, 1e+10 }
  0xac   :  { %v210_v12 = vsel %vm83_vm2, %v205_v8, 1e+10 }
  0xad   :  { %221 = vmin.xlane.f32.xlu1 %v210_v12 }
  0xae   :  { %v72_v18 = vpop.permute.xlu1 %71 }
  0xaf   :  { %vm85_vm3 = vcmp.eq.s32.totalorder %v72_v18, %v2197_v48 }
  0xb0   :  { %v212_v21 = vsel %vm85_vm3, %v207_v20, 1e+10 }
  0xb1   :  { %225 = vmin.xlane.f32.xlu0 %v212_v21 }
  0xb2   :  { %v75_v23 = vpop.permute.xlu1 %74 }
  0xb3   :  { %vm86_vm5 = vcmp.eq.s32.totalorder %v75_v23, %v2197_v48 }
  0xb4   :  { %v213_v26 = vsel %vm86_vm5, %v208_v24, 1e+10 }
  0xb5   :  { %229 = vmin.xlane.f32.xlu0 %v214_v25  ;;  %227 = vmin.xlane.f32.xlu1 %v213_v26 }
 0x131   :  { %v2346_v29 = vpop.xlane.xlu0 %223 }
 0x132   :  { %vm232_vm6 = vcmp.le.f32.partialorder %v2337_v60, %v2346_v29 }
 0x133   :  { %v237_v30 = vsel %vm232_vm6, %v2344_v28, 1e+10 }
 0x134   :  { %243 = vmin.xlane.f32.xlu0 %v237_v30 }
 0x136   :  { %v2351_v31 = vpop.xlane.xlu1 %221 }
 0x137   :  { %vm231_vm7 = vcmp.le.f32.partialorder %v210_v12, %v2351_v31 }
 0x138   :  { %v236_v32 = vsel %vm231_vm7, %v2344_v28, 1e+10 }
 0x139   :  { %241 = vmin.xlane.f32.xlu1 %v236_v32 }
 0x13a   :  { %v2355_v19 = vpop.xlane.xlu0 %225 }
 0x13b   :  { %vm233_vm8 = vcmp.le.f32.partialorder %v212_v21, %v2355_v19 }
 0x13c   :  { %v238_v33 = vsel %vm233_vm8, %v2344_v28, 1e+10 }
 0x13d   :  { %245 = vmin.xlane.f32.xlu1 %v238_v33 }
 0x13e   :  { %v2359_v34 = vpop.xlane.xlu0 %229  ;;  %v2361_v35 = vpop.xlane.xlu1 %227 }
 0x13f   :  { %vm235_vm9 = vcmp.le.f32.partialorder %v214_v25, %v2359_v34  ;;  %vm234_vm10 = vcmp.le.f32.partialorder %v213_v26, %v2361_v35 }
 0x140   :  { %v240_v36 = vsel %vm235_vm9, %v2344_v28, 1e+10  ;;  %v239_v37 = vsel %vm234_vm10, %v2344_v28, 1e+10 }
 0x141   :  { %249 = vmin.xlane.f32.xlu1 %v240_v36  ;;  %247 = vmin.xlane.f32.xlu0 %v239_v37 }
 0x1bd   :  { %v2367_v38 = vpop.xlane.xlu0 %243 }
 0x1be   :  { %5013 = vst [vmem:[#allocation9_spill] sm:$0xff] %v2367_v38  ;;  %vm252_vm11 = vcmp.eq.f32.partialorder %v2344_v28, %v2367_v38 }
 0x1bf   :  { %v257_v39 = vsel %vm252_vm11, 1e+10, %v2337_v60 }
 0x1c0   :  { %274 = vmin.xlane.f32.xlu1 %v257_v39 }
 0x1c2   :  { %v2372_v40 = vpop.xlane.xlu1 %241 }
 0x1c3   :  { %5014 = vst [vmem:[#allocation10_spill] sm:$0xff] %v2372_v40  ;;  %vm251_vm12 = vcmp.eq.f32.partialorder %v2344_v28, %v2372_v40 }
 0x1c4   :  { %v256_v41 = vsel %vm251_vm12, 1e+10, %v210_v12 }
 0x1c5   :  { %272 = vmin.xlane.f32.xlu0 %v256_v41 }
 0x1c6   :  { %v2376_v42 = vpop.xlane.xlu1 %245 }
 0x1c7   :  { %5015 = vst [vmem:[#allocation11_spill] sm:$0xff] %v2376_v42  ;;  %vm253_vm13 = vcmp.eq.f32.partialorder %v2344_v28, %v2376_v42 }
 0x1c8   :  { %v258_v43 = vsel %vm253_vm13, 1e+10, %v212_v21 }
 0x1c9   :  { %276 = vmin.xlane.f32.xlu0 %v258_v43 }
 0x1ca   :  { %v2380_v44 = vpop.xlane.xlu0 %247  ;;  %v2382_v45 = vpop.xlane.xlu1 %249 }
 0x1cb   :  { %5016 = vst [vmem:[#allocation12_spill] sm:$0xff] %v2380_v44  ;;  %5017 = vst [vmem:[#allocation13_spill] sm:$0xff] %v2382_v45  ;;  %vm254_vm14 = vcmp.eq.f32.partialorder %v2344_v28, %v2380_v44  ;;  %vm255_vm15 = vcmp.eq.f32.partialorder %v2344_v28, %v2382_v45 }
 0x1cc   :  { %v259_v46 = vsel %vm254_vm14, 1e+10, %v213_v26  ;;  %v260_v47 = vsel %vm255_vm15, 1e+10, %v214_v25 }
 0x1cd   :  { %278 = vmin.xlane.f32.xlu1 %v259_v46  ;;  %280 = vmin.xlane.f32.xlu0 %v260_v47 }
 0x249   :  { %v2388_v48 = vpop.xlane.xlu1 %274 }
 0x24a   :  { %vm283_vm1 = vcmp.le.f32.partialorder %v257_v39, %v2388_v48 }
 0x24b   :  { %v288_v49 = vsel %vm283_vm1, %v2344_v28, 1e+10 }
 0x24c   :  { %294 = vmin.xlane.f32.xlu0 %v288_v49 }
 0x24e   :  { %v2392_v50 = vpop.xlane.xlu0 %272 }
 0x24f   :  { %vm282_vm2 = vcmp.le.f32.partialorder %v256_v41, %v2392_v50 }
 0x250   :  { %v287_v51 = vsel %vm282_vm2, %v2344_v28, 1e+10 }
 0x251   :  { %292 = vmin.xlane.f32.xlu1 %v287_v51 }
 0x252   :  { %v2396_v52 = vpop.xlane.xlu0 %276 }
 0x253   :  { %vm284_vm3 = vcmp.le.f32.partialorder %v258_v43, %v2396_v52 }
 0x254   :  { %v289_v53 = vsel %vm284_vm3, %v2344_v28, 1e+10 }
 0x255   :  { %296 = vmin.xlane.f32.xlu1 %v289_v53 }
 0x256   :  { %v2400_v54 = vpop.xlane.xlu0 %280  ;;  %v2402_v55 = vpop.xlane.xlu1 %278 }
 0x257   :  { %vm286_vm4 = vcmp.le.f32.partialorder %v260_v47, %v2400_v54  ;;  %vm285_vm5 = vcmp.le.f32.partialorder %v259_v46, %v2402_v55 }
 0x258   :  { %v291_v56 = vsel %vm286_vm4, %v2344_v28, 1e+10  ;;  %v290_v57 = vsel %vm285_vm5, %v2344_v28, 1e+10 }
 0x259   :  { %300 = vmin.xlane.f32.xlu1 %v291_v56  ;;  %298 = vmin.xlane.f32.xlu0 %v290_v57 }
 0x2d5   :  { %v2408_v58 = vpop.xlane.xlu0 %294 }
 0x2d6   :  { %5018 = vst [vmem:[#allocation14_spill] sm:$0xff] %v2408_v58  ;;  %vm303_vm6 = vcmp.eq.f32.partialorder %v2344_v28, %v2408_v58 }
 0x2d7   :  { %v308_v59 = vsel %vm303_vm6, 1e+10, %v257_v39 }
 0x2d8   :  { %325 = vmin.xlane.f32.xlu1 %v308_v59 }
 0x2da   :  { %v2412_v60 = vpop.xlane.xlu1 %292 }
 0x2db   :  { %5019 = vst [vmem:[#allocation15_spill] sm:$0xff] %v2412_v60  ;;  %vm302_vm7 = vcmp.eq.f32.partialorder %v2344_v28, %v2412_v60 }
 0x2dc   :  { %v307_v61 = vsel %vm302_vm7, 1e+10, %v256_v41 }
 0x2dd   :  { %323 = vmin.xlane.f32.xlu0 %v307_v61 }
 0x2de   :  { %v2416_v62 = vpop.xlane.xlu1 %296 }
 0x2df   :  { %5020 = vst [vmem:[#allocation16_spill] sm:$0xff] %v2416_v62  ;;  %vm304_vm8 = vcmp.eq.f32.partialorder %v2344_v28, %v2416_v62 }
 0x2e0   :  { %v309_v63 = vsel %vm304_vm8, 1e+10, %v258_v43 }
 0x2e1   :  { %327 = vmin.xlane.f32.xlu0 %v309_v63 }
 0x2e2   :  { %v2420_v0 = vpop.xlane.xlu0 %298  ;;  %v2422_v1 = vpop.xlane.xlu1 %300 }
 0x2e3   :  { %5021 = vst [vmem:[#allocation17_spill] sm:$0xff] %v2420_v0  ;;  %5022 = vst [vmem:[#allocation18_spill] sm:$0xff] %v2422_v1  ;;  %vm305_vm9 = vcmp.eq.f32.partialorder %v2344_v28, %v2420_v0  ;;  %vm306_vm10 = vcmp.eq.f32.partialorder %v2344_v28, %v2422_v1 }
 0x2e4   :  { %v310_v2 = vsel %vm305_vm9, 1e+10, %v259_v46  ;;  %v311_v3 = vsel %vm306_vm10, 1e+10, %v260_v47 }
 0x2e5   :  { %329 = vmin.xlane.f32.xlu1 %v310_v2  ;;  %331 = vmin.xlane.f32.xlu0 %v311_v3 }
 0x361   :  { %v2428_v4 = vpop.xlane.xlu1 %325 }
 0x362   :  { %vm334_vm11 = vcmp.le.f32.partialorder %v308_v59, %v2428_v4 }
 0x363   :  { %v339_v5 = vsel %vm334_vm11, %v2344_v28, 1e+10 }
 0x364   :  { %345 = vmin.xlane.f32.xlu0 %v339_v5 }
 0x366   :  { %v2432_v6 = vpop.xlane.xlu0 %323 }
 0x367   :  { %vm333_vm12 = vcmp.le.f32.partialorder %v307_v61, %v2432_v6 }
 0x368   :  { %v338_v7 = vsel %vm333_vm12, %v2344_v28, 1e+10 }
 0x369   :  { %343 = vmin.xlane.f32.xlu1 %v338_v7 }
 0x36a   :  { %v2436_v8 = vpop.xlane.xlu0 %327 }
 0x36b   :  { %vm335_vm13 = vcmp.le.f32.partialorder %v309_v63, %v2436_v8 }
 0x36c   :  { %v340_v9 = vsel %vm335_vm13, %v2344_v28, 1e+10 }
 0x36d   :  { %347 = vmin.xlane.f32.xlu1 %v340_v9 }
 0x36e   :  { %v2440_v10 = vpop.xlane.xlu0 %331  ;;  %v2442_v11 = vpop.xlane.xlu1 %329 }
 0x36f   :  { %vm337_vm14 = vcmp.le.f32.partialorder %v311_v3, %v2440_v10  ;;  %vm336_vm15 = vcmp.le.f32.partialorder %v310_v2, %v2442_v11 }
 0x370   :  { %v342_v12 = vsel %vm337_vm14, %v2344_v28, 1e+10  ;;  %v341_v13 = vsel %vm336_vm15, %v2344_v28, 1e+10 }
 0x371   :  { %351 = vmin.xlane.f32.xlu1 %v342_v12  ;;  %349 = vmin.xlane.f32.xlu0 %v341_v13 }
 0x3ed   :  { %v2448_v14 = vpop.xlane.xlu0 %345 }
 0x3ee   :  { %5023 = vst [vmem:[#allocation19_spill] sm:$0xff] %v2448_v14  ;;  %vm354_vm1 = vcmp.eq.f32.partialorder %v2344_v28, %v2448_v14 }
 0x3ef   :  { %v359_v15 = vsel %vm354_vm1, 1e+10, %v308_v59 }
 0x3f0   :  { %376 = vmin.xlane.f32.xlu1 %v359_v15 }
 0x3f2   :  { %v2452_v16 = vpop.xlane.xlu1 %343 }
 0x3f3   :  { %5024 = vst [vmem:[#allocation20_spill] sm:$0xff] %v2452_v16  ;;  %vm353_vm2 = vcmp.eq.f32.partialorder %v2344_v28, %v2452_v16 }
 0x3f4   :  { %v358_v18 = vsel %vm353_vm2, 1e+10, %v307_v61 }
 0x3f5   :  { %374 = vmin.xlane.f32.xlu0 %v358_v18 }
 0x3f6   :  { %v2456_v20 = vpop.xlane.xlu1 %347 }
 0x3f7   :  { %5025 = vst [vmem:[#allocation21_spill] sm:$0xff] %v2456_v20  ;;  %vm355_vm3 = vcmp.eq.f32.partialorder %v2344_v28, %v2456_v20 }
 0x3f8   :  { %v360_v17 = vsel %vm355_vm3, 1e+10, %v309_v63 }
 0x3f9   :  { %378 = vmin.xlane.f32.xlu0 %v360_v17 }
 0x3fa   :  { %v2460_v21 = vpop.xlane.xlu0 %349  ;;  %v2462_v22 = vpop.xlane.xlu1 %351 }
 0x3fb   :  { %5026 = vst [vmem:[#allocation22_spill] sm:$0xff] %v2460_v21  ;;  %5027 = vst [vmem:[#allocation23_spill] sm:$0xff] %v2462_v22  ;;  %vm356_vm4 = vcmp.eq.f32.partialorder %v2344_v28, %v2460_v21  ;;  %vm357_vm5 = vcmp.eq.f32.partialorder %v2344_v28, %v2462_v22 }
 0x3fc   :  { %v361_v23 = vsel %vm356_vm4, 1e+10, %v310_v2  ;;  %v362_v24 = vsel %vm357_vm5, 1e+10, %v311_v3 }
 0x3fd   :  { %380 = vmin.xlane.f32.xlu1 %v361_v23  ;;  %382 = vmin.xlane.f32.xlu0 %v362_v24 }
 0x479   :  { %v2468_v25 = vpop.xlane.xlu1 %376 }
 0x47a   :  { %vm385_vm6 = vcmp.le.f32.partialorder %v359_v15, %v2468_v25 }
 0x47b   :  { %v390_v26 = vsel %vm385_vm6, %v2344_v28, 1e+10 }
 0x47c   :  { %396 = vmin.xlane.f32.xlu0 %v390_v26 }
 0x47e   :  { %v2472_v30 = vpop.xlane.xlu0 %374 }
 0x47f   :  { %vm384_vm7 = vcmp.le.f32.partialorder %v358_v18, %v2472_v30 }
 0x480   :  { %v389_v32 = vsel %vm384_vm7, %v2344_v28, 1e+10 }
 0x481   :  { %394 = vmin.xlane.f32.xlu1 %v389_v32 }
 0x482   :  { %v2476_v33 = vpop.xlane.xlu0 %378 }
 0x483   :  { %vm386_vm8 = vcmp.le.f32.partialorder %v360_v17, %v2476_v33 }
 0x484   :  { %v391_v36 = vsel %vm386_vm8, %v2344_v28, 1e+10 }
 0x485   :  { %398 = vmin.xlane.f32.xlu1 %v391_v36 }
 0x486   :  { %v2480_v37 = vpop.xlane.xlu0 %382  ;;  %v2482_v39 = vpop.xlane.xlu1 %380 }
 0x487   :  { %vm388_vm9 = vcmp.le.f32.partialorder %v362_v24, %v2480_v37  ;;  %vm387_vm10 = vcmp.le.f32.partialorder %v361_v23, %v2482_v39 }
 0x488   :  { %v393_v41 = vsel %vm388_vm9, %v2344_v28, 1e+10  ;;  %v392_v43 = vsel %vm387_vm10, %v2344_v28, 1e+10 }
 0x489   :  { %402 = vmin.xlane.f32.xlu1 %v393_v41  ;;  %400 = vmin.xlane.f32.xlu0 %v392_v43 }
 0x505   :  { %v2488_v46 = vpop.xlane.xlu0 %396 }
 0x506   :  { %5028 = vst [vmem:[#allocation24_spill] sm:$0xff] %v2488_v46  ;;  %vm405_vm11 = vcmp.eq.f32.partialorder %v2344_v28, %v2488_v46 }
 0x507   :  { %v410_v47 = vsel %vm405_vm11, 1e+10, %v359_v15 }
 0x508   :  { %427 = vmin.xlane.f32.xlu1 %v410_v47 }
 0x50a   :  { %v2492_v49 = vpop.xlane.xlu1 %394 }
 0x50b   :  { %5029 = vst [vmem:[#allocation25_spill] sm:$0xff] %v2492_v49  ;;  %vm404_vm12 = vcmp.eq.f32.partialorder %v2344_v28, %v2492_v49 }
 0x50c   :  { %v409_v51 = vsel %vm404_vm12, 1e+10, %v358_v18 }
 0x50d   :  { %425 = vmin.xlane.f32.xlu0 %v409_v51 }
 0x50e   :  { %v2496_v53 = vpop.xlane.xlu1 %398 }
 0x50f   :  { %5030 = vst [vmem:[#allocation26_spill] sm:$0xff] %v2496_v53  ;;  %vm406_vm13 = vcmp.eq.f32.partialorder %v2344_v28, %v2496_v53 }
 0x510   :  { %v411_v56 = vsel %vm406_vm13, 1e+10, %v360_v17 }
 0x511   :  { %429 = vmin.xlane.f32.xlu0 %v411_v56 }
 0x512   :  { %v2500_v57 = vpop.xlane.xlu0 %400  ;;  %v2502_v59 = vpop.xlane.xlu1 %402 }
 0x513   :  { %5031 = vst [vmem:[#allocation27_spill] sm:$0xff] %v2500_v57  ;;  %5032 = vst [vmem:[#allocation28_spill] sm:$0xff] %v2502_v59  ;;  %vm407_vm14 = vcmp.eq.f32.partialorder %v2344_v28, %v2500_v57  ;;  %vm408_vm15 = vcmp.eq.f32.partialorder %v2344_v28, %v2502_v59 }
 0x514   :  { %v412_v61 = vsel %vm407_vm14, 1e+10, %v361_v23  ;;  %v413_v63 = vsel %vm408_vm15, 1e+10, %v362_v24 }
 0x515   :  { %431 = vmin.xlane.f32.xlu1 %v412_v61  ;;  %433 = vmin.xlane.f32.xlu0 %v413_v63 }
 0x591   :  { %v2508_v2 = vpop.xlane.xlu1 %427 }
 0x592   :  { %vm436_vm1 = vcmp.le.f32.partialorder %v410_v47, %v2508_v2 }
 0x593   :  { %v441_v3 = vsel %vm436_vm1, %v2344_v28, 1e+10 }
 0x594   :  { %447 = vmin.xlane.f32.xlu0 %v441_v3 }
 0x596   :  { %v2512_v5 = vpop.xlane.xlu0 %425 }
 0x597   :  { %vm435_vm2 = vcmp.le.f32.partialorder %v409_v51, %v2512_v5 }
 0x598   :  { %v440_v7 = vsel %vm435_vm2, %v2344_v28, 1e+10 }
 0x599   :  { %445 = vmin.xlane.f32.xlu1 %v440_v7 }
 0x59a   :  { %v2516_v9 = vpop.xlane.xlu0 %429 }
 0x59b   :  { %vm437_vm3 = vcmp.le.f32.partialorder %v411_v56, %v2516_v9 }
 0x59c   :  { %v442_v12 = vsel %vm437_vm3, %v2344_v28, 1e+10 }
 0x59d   :  { %449 = vmin.xlane.f32.xlu1 %v442_v12 }
 0x59e   :  { %v2520_v13 = vpop.xlane.xlu0 %433  ;;  %v2522_v15 = vpop.xlane.xlu1 %431 }
 0x59f   :  { %vm439_vm4 = vcmp.le.f32.partialorder %v413_v63, %v2520_v13  ;;  %vm438_vm5 = vcmp.le.f32.partialorder %v412_v61, %v2522_v15 }
 0x5a0   :  { %v444_v18 = vsel %vm439_vm4, %v2344_v28, 1e+10  ;;  %v443_v17 = vsel %vm438_vm5, %v2344_v28, 1e+10 }
 0x5a1   :  { %453 = vmin.xlane.f32.xlu1 %v444_v18  ;;  %451 = vmin.xlane.f32.xlu0 %v443_v17 }
 0x61d   :  { %v2528_v23 = vpop.xlane.xlu0 %447 }
 0x61e   :  { %5033 = vst [vmem:[#allocation29_spill] sm:$0xff] %v2528_v23  ;;  %vm456_vm6 = vcmp.eq.f32.partialorder %v2344_v28, %v2528_v23 }
 0x61f   :  { %v461_v24 = vsel %vm456_vm6, 1e+10, %v410_v47 }
 0x620   :  { %478 = vmin.xlane.f32.xlu1 %v461_v24 }
 0x622   :  { %v2532_v26 = vpop.xlane.xlu1 %445 }
 0x623   :  { %5034 = vst [vmem:[#allocation30_spill] sm:$0xff] %v2532_v26  ;;  %vm455_vm7 = vcmp.eq.f32.partialorder %v2344_v28, %v2532_v26 }
 0x624   :  { %v460_v32 = vsel %vm455_vm7, 1e+10, %v409_v51 }
 0x625   :  { %476 = vmin.xlane.f32.xlu0 %v460_v32 }
 0x626   :  { %v2536_v36 = vpop.xlane.xlu1 %449 }
 0x627   :  { %5035 = vst [vmem:[#allocation31_spill] sm:$0xff] %v2536_v36  ;;  %vm457_vm8 = vcmp.eq.f32.partialorder %v2344_v28, %v2536_v36 }
 0x628   :  { %v462_v41 = vsel %vm457_vm8, 1e+10, %v411_v56 }
 0x629   :  { %480 = vmin.xlane.f32.xlu0 %v462_v41 }
 0x62a   :  { %v2540_v43 = vpop.xlane.xlu0 %451  ;;  %v2542_v3 = vpop.xlane.xlu1 %453 }
 0x62b   :  { %5036 = vst [vmem:[#allocation32_spill] sm:$0xff] %v2540_v43  ;;  %5037 = vst [vmem:[#allocation33_spill] sm:$0xff] %v2542_v3  ;;  %vm458_vm9 = vcmp.eq.f32.partialorder %v2344_v28, %v2540_v43  ;;  %vm459_vm10 = vcmp.eq.f32.partialorder %v2344_v28, %v2542_v3 }
 0x62c   :  { %v463_v47 = vsel %vm458_vm9, 1e+10, %v412_v61  ;;  %v464_v51 = vsel %vm459_vm10, 1e+10, %v413_v63 }
 0x62d   :  { %482 = vmin.xlane.f32.xlu1 %v463_v47  ;;  %484 = vmin.xlane.f32.xlu0 %v464_v51 }
 0x6a9   :  { %v2548_v7 = vpop.xlane.xlu1 %478 }
 0x6aa   :  { %vm487_vm11 = vcmp.le.f32.partialorder %v461_v24, %v2548_v7 }
 0x6ab   :  { %v492_v56 = vsel %vm487_vm11, %v2344_v28, 1e+10 }
 0x6ac   :  { %498 = vmin.xlane.f32.xlu0 %v492_v56 }
 0x6ae   :  { %v2552_v12 = vpop.xlane.xlu0 %476 }
 0x6af   :  { %vm486_vm12 = vcmp.le.f32.partialorder %v460_v32, %v2552_v12 }
 0x6b0   :  { %v491_v18 = vsel %vm486_vm12, %v2344_v28, 1e+10 }
 0x6b1   :  { %496 = vmin.xlane.f32.xlu1 %v491_v18 }
 0x6b2   :  { %v2556_v17 = vpop.xlane.xlu0 %480 }
 0x6b3   :  { %vm488_vm13 = vcmp.le.f32.partialorder %v462_v41, %v2556_v17 }
 0x6b4   :  { %v493_v61 = vsel %vm488_vm13, %v2344_v28, 1e+10 }
 0x6b5   :  { %500 = vmin.xlane.f32.xlu1 %v493_v61 }
 0x6b6   :  { %v2560_v63 = vpop.xlane.xlu0 %484  ;;  %v2562_v3 = vpop.xlane.xlu1 %482 }
 0x6b7   :  { %vm490_vm14 = vcmp.le.f32.partialorder %v464_v51, %v2560_v63  ;;  %vm489_vm15 = vcmp.le.f32.partialorder %v463_v47, %v2562_v3 }
 0x6b8   :  { %v495_v56 = vsel %vm490_vm14, %v2344_v28, 1e+10  ;;  %v494_v43 = vsel %vm489_vm15, %v2344_v28, 1e+10 }
 0x6b9   :  { %504 = vmin.xlane.f32.xlu1 %v495_v56  ;;  %502 = vmin.xlane.f32.xlu0 %v494_v43 }
 0x735   :  { %v2568_v18 = vpop.xlane.xlu0 %498 }
 0x736   :  { %5038 = vst [vmem:[#allocation34_spill] sm:$0xff] %v2568_v18  ;;  %vm507_vm1 = vcmp.eq.f32.partialorder %v2344_v28, %v2568_v18 }
 0x737   :  { %v512_v61 = vsel %vm507_vm1, 1e+10, %v461_v24 }
 0x738   :  { %529 = vmin.xlane.f32.xlu1 %v512_v61 }
 0x73a   :  { %v2572_v36 = vpop.xlane.xlu1 %496 }
 0x73b   :  { %5039 = vst [vmem:[#allocation35_spill] sm:$0xff] %v2572_v36  ;;  %vm506_vm2 = vcmp.eq.f32.partialorder %v2344_v28, %v2572_v36 }
 0x73c   :  { %v511_v26 = vsel %vm506_vm2, 1e+10, %v460_v32 }
 0x73d   :  { %527 = vmin.xlane.f32.xlu0 %v511_v26 }
 0x73e   :  { %v2576_v59 = vpop.xlane.xlu1 %500 }
 0x73f   :  { %5040 = vst [vmem:[#allocation36_spill] sm:$0xff] %v2576_v59  ;;  %vm508_vm3 = vcmp.eq.f32.partialorder %v2344_v28, %v2576_v59 }
 0x740   :  { %v513_v43 = vsel %vm508_vm3, 1e+10, %v462_v41 }
 0x741   :  { %531 = vmin.xlane.f32.xlu0 %v513_v43 }
 0x742   :  { %v2580_v56 = vpop.xlane.xlu0 %502  ;;  %v2582_v57 = vpop.xlane.xlu1 %504 }
 0x743   :  { %5041 = vst [vmem:[#allocation37_spill] sm:$0xff] %v2580_v56  ;;  %5042 = vst [vmem:[#allocation38_spill] sm:$0xff] %v2582_v57  ;;  %vm509_vm4 = vcmp.eq.f32.partialorder %v2344_v28, %v2580_v56  ;;  %vm510_vm5 = vcmp.eq.f32.partialorder %v2344_v28, %v2582_v57 }
 0x744   :  { %v514_v24 = vsel %vm509_vm4, 1e+10, %v463_v47  ;;  %v515_v32 = vsel %vm510_vm5, 1e+10, %v464_v51 }
 0x745   :  { %533 = vmin.xlane.f32.xlu1 %v514_v24  ;;  %535 = vmin.xlane.f32.xlu0 %v515_v32 }
 0x7c1   :  { %v2588_v36 = vpop.xlane.xlu1 %529 }
 0x7c2   :  { %vm538_vm6 = vcmp.le.f32.partialorder %v512_v61, %v2588_v36 }
 0x7c3   :  { %v543_v41 = vsel %vm538_vm6, %v2344_v28, 1e+10 }
 0x7c4   :  { %549 = vmin.xlane.f32.xlu0 %v543_v41 }
 0x7c6   :  { %v2592_v59 = vpop.xlane.xlu0 %527 }
 0x7c7   :  { %vm537_vm7 = vcmp.le.f32.partialorder %v511_v26, %v2592_v59 }
 0x7c8   :  { %v542_v56 = vsel %vm537_vm7, %v2344_v28, 1e+10 }
 0x7c9   :  { %547 = vmin.xlane.f32.xlu1 %v542_v56 }
 0x7ca   :  { %v2596_v53 = vpop.xlane.xlu0 %531 }
 0x7cb   :  { %vm539_vm8 = vcmp.le.f32.partialorder %v513_v43, %v2596_v53 }
 0x7cc   :  { %v544_v47 = vsel %vm539_vm8, %v2344_v28, 1e+10 }
 0x7cd   :  { %551 = vmin.xlane.f32.xlu1 %v544_v47 }
 0x7ce   :  { %v2600_v51 = vpop.xlane.xlu0 %535  ;;  %v2602_v57 = vpop.xlane.xlu1 %533 }
 0x7cf   :  { %5043 = vst [vmem:[#allocation39_spill] sm:$0xff] %v2600_v51  ;;  %5044 = vst [vmem:[#allocation40_spill] sm:$0xff] %v2602_v57  ;;  %vm541_vm9 = vcmp.le.f32.partialorder %v515_v32, %v2600_v51  ;;  %vm540_vm10 = vcmp.le.f32.partialorder %v514_v24, %v2602_v57 }
 0x7d0   :  { %v546_v41 = vsel %vm541_vm9, %v2344_v28, 1e+10  ;;  %v545_v49 = vsel %vm540_vm10, %v2344_v28, 1e+10 }
 0x7d1   :  { %555 = vmin.xlane.f32.xlu1 %v546_v41  ;;  %553 = vmin.xlane.f32.xlu0 %v545_v49 }
 0x84d   :  { %v2608_v56 = vpop.xlane.xlu0 %549 }
 0x84e   :  { %5045 = vst [vmem:[#allocation41_spill] sm:$0xff] %v2608_v56  ;;  %vm558_vm11 = vcmp.eq.f32.partialorder %v2344_v28, %v2608_v56 }
 0x84f   :  { %v563_v47 = vsel %vm558_vm11, 1e+10, %v512_v61 }
 0x850   :  { %580 = vmin.xlane.f32.xlu1 %v563_v47 }
 0x852   :  { %v2612_v22 = vpop.xlane.xlu1 %547 }
 0x853   :  { %5046 = vst [vmem:[#allocation42_spill] sm:$0xff] %v2612_v22  ;;  %vm557_vm12 = vcmp.eq.f32.partialorder %v2344_v28, %v2612_v22 }
 0x854   :  { %v562_v21 = vsel %vm557_vm12, 1e+10, %v511_v26 }
 0x855   :  { %578 = vmin.xlane.f32.xlu0 %v562_v21 }
 0x856   :  { %v2616_v20 = vpop.xlane.xlu1 %551 }
 0x857   :  { %5047 = vst [vmem:[#allocation43_spill] sm:$0xff] %v2616_v20  ;;  %vm559_vm13 = vcmp.eq.f32.partialorder %v2344_v28, %v2616_v20 }
 0x858   :  { %v564_v49 = vsel %vm559_vm13, 1e+10, %v513_v43 }
 0x859   :  { %582 = vmin.xlane.f32.xlu0 %v564_v49 }
 0x85a   :  { %v2620_v41 = vpop.xlane.xlu0 %553  ;;  %v2622_v18 = vpop.xlane.xlu1 %555 }
 0x85b   :  { %5048 = vst [vmem:[#allocation44_spill] sm:$0xff] %v2620_v41  ;;  %5049 = vst [vmem:[#allocation45_spill] sm:$0xff] %v2622_v18  ;;  %vm560_vm14 = vcmp.eq.f32.partialorder %v2344_v28, %v2620_v41  ;;  %vm561_vm15 = vcmp.eq.f32.partialorder %v2344_v28, %v2622_v18 }
 0x85c   :  { %v565_v61 = vsel %vm560_vm14, 1e+10, %v514_v24  ;;  %v566_v26 = vsel %vm561_vm15, 1e+10, %v515_v32 }
 0x85d   :  { %584 = vmin.xlane.f32.xlu1 %v565_v61  ;;  %586 = vmin.xlane.f32.xlu0 %v566_v26 }
 0x8d9   :  { %v2628_v22 = vpop.xlane.xlu1 %580 }
 0x8da   :  { %vm589_vm1 = vcmp.le.f32.partialorder %v563_v47, %v2628_v22 }
 0x8db   :  { %v594_v43 = vsel %vm589_vm1, %v2344_v28, 1e+10 }
 0x8dc   :  { %600 = vmin.xlane.f32.xlu0 %v594_v43 }
 0x8de   :  { %v2632_v20 = vpop.xlane.xlu0 %578 }
 0x8df   :  { %vm588_vm2 = vcmp.le.f32.partialorder %v562_v21, %v2632_v20 }
 0x8e0   :  { %v593_v41 = vsel %vm588_vm2, %v2344_v28, 1e+10 }
 0x8e1   :  { %598 = vmin.xlane.f32.xlu1 %v593_v41 }
 0x8e2   :  { %v2636_v56 = vpop.xlane.xlu0 %582 }
 0x8e3   :  { %vm590_vm3 = vcmp.le.f32.partialorder %v564_v49, %v2636_v56 }
 0x8e4   :  { %v595_v24 = vsel %vm590_vm3, %v2344_v28, 1e+10 }
 0x8e5   :  { %602 = vmin.xlane.f32.xlu1 %v595_v24 }
 0x8e6   :  { %v2640_v32 = vpop.xlane.xlu0 %586  ;;  %v2642_v18 = vpop.xlane.xlu1 %584 }
 0x8e7   :  { %5050 = vst [vmem:[#allocation46_spill] sm:$0xff] %v2640_v32  ;;  %5051 = vst [vmem:[#allocation47_spill] sm:$0xff] %v2642_v18  ;;  %vm592_vm4 = vcmp.le.f32.partialorder %v566_v26, %v2640_v32  ;;  %vm591_vm5 = vcmp.le.f32.partialorder %v565_v61, %v2642_v18 }
 0x8e8   :  { %v597_v43 = vsel %vm592_vm4, %v2344_v28, 1e+10  ;;  %v596_v16 = vsel %vm591_vm5, %v2344_v28, 1e+10 }
 0x8e9   :  { %606 = vmin.xlane.f32.xlu1 %v597_v43  ;;  %604 = vmin.xlane.f32.xlu0 %v596_v16 }
 0x965   :  { %v2648_v41 = vpop.xlane.xlu0 %600 }
 0x966   :  { %5052 = vst [vmem:[#allocation48_spill] sm:$0xff] %v2648_v41  ;;  %vm609_vm6 = vcmp.eq.f32.partialorder %v2344_v28, %v2648_v41 }
 0x967   :  { %v614_v24 = vsel %vm609_vm6, 1e+10, %v563_v47 }
 0x968   :  { %631 = vmin.xlane.f32.xlu1 %v614_v24 }
 0x96a   :  { %v2652_v1 = vpop.xlane.xlu1 %598 }
 0x96b   :  { %5053 = vst [vmem:[#allocation49_spill] sm:$0xff] %v2652_v1  ;;  %vm608_vm7 = vcmp.eq.f32.partialorder %v2344_v28, %v2652_v1 }
 0x96c   :  { %v613_v0 = vsel %vm608_vm7, 1e+10, %v562_v21 }
 0x96d   :  { %629 = vmin.xlane.f32.xlu0 %v613_v0 }
 0x96e   :  { %v2656_v23 = vpop.xlane.xlu1 %602 }
 0x96f   :  { %5054 = vst [vmem:[#allocation50_spill] sm:$0xff] %v2656_v23  ;;  %vm610_vm8 = vcmp.eq.f32.partialorder %v2344_v28, %v2656_v23 }
 0x970   :  { %v615_v16 = vsel %vm610_vm8, 1e+10, %v564_v49 }
 0x971   :  { %633 = vmin.xlane.f32.xlu0 %v615_v16 }
 0x972   :  { %v2660_v43 = vpop.xlane.xlu0 %604  ;;  %v2662_v62 = vpop.xlane.xlu1 %606 }
 0x973   :  { %5055 = vst [vmem:[#allocation51_spill] sm:$0xff] %v2660_v43  ;;  %5056 = vst [vmem:[#allocation52_spill] sm:$0xff] %v2662_v62  ;;  %vm611_vm9 = vcmp.eq.f32.partialorder %v2344_v28, %v2660_v43  ;;  %vm612_vm10 = vcmp.eq.f32.partialorder %v2344_v28, %v2662_v62 }
 0x974   :  { %v616_v47 = vsel %vm611_vm9, 1e+10, %v565_v61  ;;  %v617_v21 = vsel %vm612_vm10, 1e+10, %v566_v26 }
 0x975   :  { %635 = vmin.xlane.f32.xlu1 %v616_v47  ;;  %637 = vmin.xlane.f32.xlu0 %v617_v21 }
 0x9f1   :  { %v2668_v1 = vpop.xlane.xlu1 %631 }
 0x9f2   :  { %vm640_vm11 = vcmp.le.f32.partialorder %v614_v24, %v2668_v1 }
 0x9f3   :  { %v645_v49 = vsel %vm640_vm11, %v2344_v28, 1e+10 }
 0x9f4   :  { %651 = vmin.xlane.f32.xlu0 %v645_v49 }
 0x9f6   :  { %v2672_v23 = vpop.xlane.xlu0 %629 }
 0x9f7   :  { %vm639_vm12 = vcmp.le.f32.partialorder %v613_v0, %v2672_v23 }
 0x9f8   :  { %v644_v43 = vsel %vm639_vm12, %v2344_v28, 1e+10 }
 0x9f9   :  { %649 = vmin.xlane.f32.xlu1 %v644_v43 }
 0x9fa   :  { %v2676_v41 = vpop.xlane.xlu0 %633 }
 0x9fb   :  { %vm641_vm13 = vcmp.le.f32.partialorder %v615_v16, %v2676_v41 }
 0x9fc   :  { %v646_v61 = vsel %vm641_vm13, %v2344_v28, 1e+10 }
 0x9fd   :  { %653 = vmin.xlane.f32.xlu1 %v646_v61 }
 0x9fe   :  { %v2680_v26 = vpop.xlane.xlu0 %637  ;;  %v2682_v62 = vpop.xlane.xlu1 %635 }
 0x9ff   :  { %5057 = vst [vmem:[#allocation53_spill] sm:$0xff] %v2680_v26  ;;  %5058 = vst [vmem:[#allocation54_spill] sm:$0xff] %v2682_v62  ;;  %vm643_vm14 = vcmp.le.f32.partialorder %v617_v21, %v2680_v26  ;;  %vm642_vm15 = vcmp.le.f32.partialorder %v616_v47, %v2682_v62 }
 0xa00   :  { %v648_v49 = vsel %vm643_vm14, %v2344_v28, 1e+10  ;;  %v647_v60 = vsel %vm642_vm15, %v2344_v28, 1e+10 }
 0xa01   :  { %657 = vmin.xlane.f32.xlu1 %v648_v49  ;;  %655 = vmin.xlane.f32.xlu0 %v647_v60 }
 0xa7d   :  { %v2688_v43 = vpop.xlane.xlu0 %651 }
 0xa7e   :  { %5059 = vst [vmem:[#allocation55_spill] sm:$0xff] %v2688_v43  ;;  %vm660_vm1 = vcmp.eq.f32.partialorder %v2344_v28, %v2688_v43 }
 0xa7f   :  { %v665_v61 = vsel %vm660_vm1, 1e+10, %v614_v24 }
 0xa80   :  { %682 = vmin.xlane.f32.xlu1 %v665_v61 }
 0xa82   :  { %v2692_v45 = vpop.xlane.xlu1 %649 }
 0xa83   :  { %5060 = vst [vmem:[#allocation56_spill] sm:$0xff] %v2692_v45  ;;  %vm659_vm2 = vcmp.eq.f32.partialorder %v2344_v28, %v2692_v45 }
 0xa84   :  { %v664_v46 = vsel %vm659_vm2, 1e+10, %v613_v0 }
 0xa85   :  { %680 = vmin.xlane.f32.xlu0 %v664_v46 }
 0xa86   :  { %v2696_v44 = vpop.xlane.xlu1 %653 }
 0xa87   :  { %5061 = vst [vmem:[#allocation57_spill] sm:$0xff] %v2696_v44  ;;  %vm661_vm3 = vcmp.eq.f32.partialorder %v2344_v28, %v2696_v44 }
 0xa88   :  { %v666_v60 = vsel %vm661_vm3, 1e+10, %v615_v16 }
 0xa89   :  { %684 = vmin.xlane.f32.xlu0 %v666_v60 }
 0xa8a   :  { %v2700_v49 = vpop.xlane.xlu0 %655  ;;  %v2702_v42 = vpop.xlane.xlu1 %657 }
 0xa8b   :  { %5062 = vst [vmem:[#allocation58_spill] sm:$0xff] %v2700_v49  ;;  %5063 = vst [vmem:[#allocation59_spill] sm:$0xff] %v2702_v42  ;;  %vm662_vm4 = vcmp.eq.f32.partialorder %v2344_v28, %v2700_v49  ;;  %vm663_vm5 = vcmp.eq.f32.partialorder %v2344_v28, %v2702_v42 }
 0xa8c   :  { %v667_v24 = vsel %vm662_vm4, 1e+10, %v616_v47  ;;  %v668_v0 = vsel %vm663_vm5, 1e+10, %v617_v21 }
 0xa8d   :  { %686 = vmin.xlane.f32.xlu1 %v667_v24  ;;  %688 = vmin.xlane.f32.xlu0 %v668_v0 }
 0xb09   :  { %v2708_v45 = vpop.xlane.xlu1 %682 }
 0xb0a   :  { %vm691_vm6 = vcmp.le.f32.partialorder %v665_v61, %v2708_v45 }
 0xb0b   :  { %v696_v16 = vsel %vm691_vm6, %v2344_v28, 1e+10 }
 0xb0c   :  { %702 = vmin.xlane.f32.xlu0 %v696_v16 }
 0xb0e   :  { %v2712_v44 = vpop.xlane.xlu0 %680 }
 0xb0f   :  { %vm690_vm7 = vcmp.le.f32.partialorder %v664_v46, %v2712_v44 }
 0xb10   :  { %v695_v49 = vsel %vm690_vm7, %v2344_v28, 1e+10 }
 0xb11   :  { %700 = vmin.xlane.f32.xlu1 %v695_v49 }
 0xb12   :  { %v2716_v43 = vpop.xlane.xlu0 %684 }
 0xb13   :  { %5064 = vst [vmem:[#allocation60_spill] sm:$0xff] %v2716_v43  ;;  %vm692_vm8 = vcmp.le.f32.partialorder %v666_v60, %v2716_v43 }
 0xb14   :  { %v697_v47 = vsel %vm692_vm8, %v2344_v28, 1e+10 }
 0xb15   :  { %704 = vmin.xlane.f32.xlu1 %v697_v47 }
 0xb16   :  { %v2720_v21 = vpop.xlane.xlu0 %688  ;;  %v2722_v42 = vpop.xlane.xlu1 %686 }
 0xb17   :  { %5065 = vst [vmem:[#allocation61_spill] sm:$0xff] %v2720_v21  ;;  %5066 = vst [vmem:[#allocation62_spill] sm:$0xff] %v2722_v42  ;;  %vm694_vm9 = vcmp.le.f32.partialorder %v668_v0, %v2720_v21  ;;  %vm693_vm10 = vcmp.le.f32.partialorder %v667_v24, %v2722_v42 }
 0xb18   :  { %v699_v16 = vsel %vm694_vm9, %v2344_v28, 1e+10  ;;  %v698_v40 = vsel %vm693_vm10, %v2344_v28, 1e+10 }
 0xb19   :  { %708 = vmin.xlane.f32.xlu1 %v699_v16  ;;  %706 = vmin.xlane.f32.xlu0 %v698_v40 }
 0xb95   :  { %v2728_v49 = vpop.xlane.xlu0 %702 }
 0xb96   :  { %5067 = vst [vmem:[#allocation63_spill] sm:$0xff] %v2728_v49  ;;  %vm711_vm11 = vcmp.eq.f32.partialorder %v2344_v28, %v2728_v49 }
 0xb97   :  { %v716_v47 = vsel %vm711_vm11, 1e+10, %v665_v61 }
 0xb98   :  { %733 = vmin.xlane.f32.xlu1 %v716_v47 }
 0xb9a   :  { %v2732_v14 = vpop.xlane.xlu1 %700 }
 0xb9b   :  { %5068 = vst [vmem:[#allocation64_spill] sm:$0xff] %v2732_v14  ;;  %vm710_vm12 = vcmp.eq.f32.partialorder %v2344_v28, %v2732_v14 }
 0xb9c   :  { %v715_v58 = vsel %vm710_vm12, 1e+10, %v664_v46 }
 0xb9d   :  { %731 = vmin.xlane.f32.xlu0 %v715_v58 }
 0xb9e   :  { %v2736_v38 = vpop.xlane.xlu1 %704 }
 0xb9f   :  { %5069 = vst [vmem:[#allocation65_spill] sm:$0xff] %v2736_v38  ;;  %vm712_vm13 = vcmp.eq.f32.partialorder %v2344_v28, %v2736_v38 }
 0xba0   :  { %v717_v40 = vsel %vm712_vm13, 1e+10, %v666_v60 }
 0xba1   :  { %735 = vmin.xlane.f32.xlu0 %v717_v40 }
 0xba2   :  { %v2740_v16 = vpop.xlane.xlu0 %706  ;;  %v2742_v42 = vpop.xlane.xlu1 %708 }
 0xba3   :  { %5070 = vst [vmem:[#allocation66_spill] sm:$0xff] %v2740_v16  ;;  %5071 = vst [vmem:[#allocation67_spill] sm:$0xff] %v2742_v42  ;;  %vm713_vm14 = vcmp.eq.f32.partialorder %v2344_v28, %v2740_v16  ;;  %vm714_vm15 = vcmp.eq.f32.partialorder %v2344_v28, %v2742_v42 }
 0xba4   :  { %v718_v61 = vsel %vm713_vm14, 1e+10, %v667_v24  ;;  %v719_v46 = vsel %vm714_vm15, 1e+10, %v668_v0 }
 0xba5   :  { %737 = vmin.xlane.f32.xlu1 %v718_v61  ;;  %739 = vmin.xlane.f32.xlu0 %v719_v46 }
 0xc21   :  { %v2748_v14 = vpop.xlane.xlu1 %733 }
 0xc22   :  { %vm742_vm1 = vcmp.le.f32.partialorder %v716_v47, %v2748_v14 }
 0xc23   :  { %v747_v60 = vsel %vm742_vm1, %v2344_v28, 1e+10 }
 0xc24   :  { %753 = vmin.xlane.f32.xlu0 %v747_v60 }
 0xc26   :  { %v2752_v38 = vpop.xlane.xlu0 %731 }
 0xc27   :  { %vm741_vm2 = vcmp.le.f32.partialorder %v715_v58, %v2752_v38 }
 0xc28   :  { %v746_v16 = vsel %vm741_vm2, %v2344_v28, 1e+10 }
 0xc29   :  { %751 = vmin.xlane.f32.xlu1 %v746_v16 }
 0xc2a   :  { %v2756_v49 = vpop.xlane.xlu0 %735 }
 0xc2b   :  { %5072 = vst [vmem:[#allocation68_spill] sm:$0xff] %v2756_v49  ;;  %vm743_vm3 = vcmp.le.f32.partialorder %v717_v40, %v2756_v49 }
 0xc2c   :  { %v748_v24 = vsel %vm743_vm3, %v2344_v28, 1e+10 }
 0xc2d   :  { %755 = vmin.xlane.f32.xlu1 %v748_v24 }
 0xc2e   :  { %v2760_v0 = vpop.xlane.xlu0 %739  ;;  %v2762_v42 = vpop.xlane.xlu1 %737 }
 0xc2f   :  { %5073 = vst [vmem:[#allocation69_spill] sm:$0xff] %v2760_v0  ;;  %5074 = vst [vmem:[#allocation70_spill] sm:$0xff] %v2762_v42  ;;  %vm745_vm4 = vcmp.le.f32.partialorder %v719_v46, %v2760_v0  ;;  %vm744_vm5 = vcmp.le.f32.partialorder %v718_v61, %v2762_v42 }
 0xc30   :  { %v750_v60 = vsel %vm745_vm4, %v2344_v28, 1e+10  ;;  %v749_v21 = vsel %vm744_vm5, %v2344_v28, 1e+10 }
 0xc31   :  { %759 = vmin.xlane.f32.xlu1 %v750_v60  ;;  %757 = vmin.xlane.f32.xlu0 %v749_v21 }
 0xcad   :  { %v2768_v16 = vpop.xlane.xlu0 %753 }
 0xcae   :  { %5075 = vst [vmem:[#allocation71_spill] sm:$0xff] %v2768_v16  ;;  %vm762_vm6 = vcmp.eq.f32.partialorder %v2344_v28, %v2768_v16 }
 0xcaf   :  { %v767_v24 = vsel %vm762_vm6, 1e+10, %v716_v47 }
 0xcb0   :  { %784 = vmin.xlane.f32.xlu1 %v767_v24 }
 0xcb2   :  { %v2772_v62 = vpop.xlane.xlu1 %751 }
 0xcb3   :  { %5076 = vst [vmem:[#allocation72_spill] sm:$0xff] %v2772_v62  ;;  %vm761_vm7 = vcmp.eq.f32.partialorder %v2344_v28, %v2772_v62 }
 0xcb4   :  { %v766_v0 = vsel %vm761_vm7, 1e+10, %v715_v58 }
 0xcb5   :  { %782 = vmin.xlane.f32.xlu0 %v766_v0 }
 0xcb6   :  { %v2776_v42 = vpop.xlane.xlu1 %755 }
 0xcb7   :  { %5077 = vst [vmem:[#allocation73_spill] sm:$0xff] %v2776_v42  ;;  %vm763_vm8 = vcmp.eq.f32.partialorder %v2344_v28, %v2776_v42 }
 0xcb8   :  { %v768_v21 = vsel %vm763_vm8, 1e+10, %v717_v40 }
 0xcb9   :  { %786 = vmin.xlane.f32.xlu0 %v768_v21 }
 0xcba   :  { %v2780_v60 = vpop.xlane.xlu0 %757  ;;  %v2782_v26 = vpop.xlane.xlu1 %759 }
 0xcbb   :  { %5078 = vst [vmem:[#allocation74_spill] sm:$0xff] %v2780_v60  ;;  %5079 = vst [vmem:[#allocation75_spill] sm:$0xff] %v2782_v26  ;;  %vm764_vm9 = vcmp.eq.f32.partialorder %v2344_v28, %v2780_v60  ;;  %vm765_vm10 = vcmp.eq.f32.partialorder %v2344_v28, %v2782_v26 }
 0xcbc   :  { %v769_v47 = vsel %vm764_vm9, 1e+10, %v718_v61  ;;  %v770_v58 = vsel %vm765_vm10, 1e+10, %v719_v46 }
 0xcbd   :  { %788 = vmin.xlane.f32.xlu1 %v769_v47  ;;  %790 = vmin.xlane.f32.xlu0 %v770_v58 }
 0xd39   :  { %v2788_v62 = vpop.xlane.xlu1 %784 }
 0xd3a   :  { %vm793_vm11 = vcmp.le.f32.partialorder %v767_v24, %v2788_v62 }
 0xd3b   :  { %v798_v40 = vsel %vm793_vm11, %v2344_v28, 1e+10 }
 0xd3c   :  { %804 = vmin.xlane.f32.xlu0 %v798_v40 }
 0xd3e   :  { %v2792_v42 = vpop.xlane.xlu0 %782 }
 0xd3f   :  { %vm792_vm12 = vcmp.le.f32.partialorder %v766_v0, %v2792_v42 }
 0xd40   :  { %v797_v60 = vsel %vm792_vm12, %v2344_v28, 1e+10 }
 0xd41   :  { %802 = vmin.xlane.f32.xlu1 %v797_v60 }
 0xd42   :  { %v2796_v16 = vpop.xlane.xlu0 %786 }
 0xd43   :  { %5080 = vst [vmem:[#allocation76_spill] sm:$0xff] %v2796_v16  ;;  %vm794_vm13 = vcmp.le.f32.partialorder %v768_v21, %v2796_v16 }
 0xd44   :  { %v799_v61 = vsel %vm794_vm13, %v2344_v28, 1e+10 }
 0xd45   :  { %806 = vmin.xlane.f32.xlu1 %v799_v61 }
 0xd46   :  { %v2800_v46 = vpop.xlane.xlu0 %790  ;;  %v2802_v26 = vpop.xlane.xlu1 %788 }
 0xd47   :  { %5081 = vst [vmem:[#allocation77_spill] sm:$0xff] %v2800_v46  ;;  %5082 = vst [vmem:[#allocation78_spill] sm:$0xff] %v2802_v26  ;;  %vm796_vm14 = vcmp.le.f32.partialorder %v770_v58, %v2800_v46  ;;  %vm795_vm15 = vcmp.le.f32.partialorder %v769_v47, %v2802_v26 }
 0xd48   :  { %v801_v40 = vsel %vm796_vm14, %v2344_v28, 1e+10  ;;  %v800_v18 = vsel %vm795_vm15, %v2344_v28, 1e+10 }
 0xd49   :  { %810 = vmin.xlane.f32.xlu1 %v801_v40  ;;  %808 = vmin.xlane.f32.xlu0 %v800_v18 }
 0xdc5   :  { %v2808_v60 = vpop.xlane.xlu0 %804 }
 0xdc6   :  { %5083 = vst [vmem:[#allocation79_spill] sm:$0xff] %v2808_v60  ;;  %vm813_vm1 = vcmp.eq.f32.partialorder %v2344_v28, %v2808_v60 }
 0xdc7   :  { %v818_v61 = vsel %vm813_vm1, 1e+10, %v767_v24 }
 0xdc8   :  { %835 = vmin.xlane.f32.xlu1 %v818_v61 }
 0xdca   :  { %v2812_v16 = vpop.xlane.xlu1 %802 }
 0xdcb   :  { %5084 = vst [vmem:[#allocation80_spill] sm:$0xff] %v2812_v16  ;;  %vm812_vm2 = vcmp.eq.f32.partialorder %v2344_v28, %v2812_v16 }
 0xdcc   :  { %v817_v46 = vsel %vm812_vm2, 1e+10, %v766_v0 }
 0xdcd   :  { %833 = vmin.xlane.f32.xlu0 %v817_v46 }
 0xdce   :  { %v2816_v26 = vpop.xlane.xlu1 %806 }
 0xdcf   :  { %5085 = vst [vmem:[#allocation81_spill] sm:$0xff] %v2816_v26  ;;  %vm814_vm3 = vcmp.eq.f32.partialorder %v2344_v28, %v2816_v26 }
 0xdd0   :  { %v819_v18 = vsel %vm814_vm3, 1e+10, %v768_v21 }
 0xdd1   :  { %837 = vmin.xlane.f32.xlu0 %v819_v18 }
 0xdd2   :  { %v2820_v40 = vpop.xlane.xlu0 %808  ;;  %v2822_v32 = vpop.xlane.xlu1 %810 }
 0xdd3   :  { %5086 = vst [vmem:[#allocation82_spill] sm:$0xff] %v2820_v40  ;;  %5087 = vst [vmem:[#allocation83_spill] sm:$0xff] %v2822_v32  ;;  %vm815_vm4 = vcmp.eq.f32.partialorder %v2344_v28, %v2820_v40  ;;  %vm816_vm5 = vcmp.eq.f32.partialorder %v2344_v28, %v2822_v32 }
 0xdd4   :  { %v820_v24 = vsel %vm815_vm4, 1e+10, %v769_v47  ;;  %v821_v0 = vsel %vm816_vm5, 1e+10, %v770_v58 }
 0xdd5   :  { %839 = vmin.xlane.f32.xlu1 %v820_v24  ;;  %841 = vmin.xlane.f32.xlu0 %v821_v0 }
 0xe51   :  { %v2828_v16 = vpop.xlane.xlu1 %835 }
 0xe52   :  { %vm844_vm6 = vcmp.le.f32.partialorder %v818_v61, %v2828_v16 }
 0xe53   :  { %v849_v21 = vsel %vm844_vm6, %v2344_v28, 1e+10 }
 0xe54   :  { %855 = vmin.xlane.f32.xlu0 %v849_v21 }
 0xe56   :  { %v2832_v26 = vpop.xlane.xlu0 %833 }
 0xe57   :  { %vm843_vm7 = vcmp.le.f32.partialorder %v817_v46, %v2832_v26 }
 0xe58   :  { %v848_v40 = vsel %vm843_vm7, %v2344_v28, 1e+10 }
 0xe59   :  { %853 = vmin.xlane.f32.xlu1 %v848_v40 }
 0xe5a   :  { %v2836_v60 = vpop.xlane.xlu0 %837 }
 0xe5b   :  { %5088 = vst [vmem:[#allocation84_spill] sm:$0xff] %v2836_v60  ;;  %vm845_vm8 = vcmp.le.f32.partialorder %v819_v18, %v2836_v60 }
 0xe5c   :  { %v850_v47 = vsel %vm845_vm8, %v2344_v28, 1e+10 }
 0xe5d   :  { %857 = vmin.xlane.f32.xlu1 %v850_v47 }
 0xe5e   :  { %v2840_v58 = vpop.xlane.xlu0 %841  ;;  %v2842_v32 = vpop.xlane.xlu1 %839 }
 0xe5f   :  { %5089 = vst [vmem:[#allocation85_spill] sm:$0xff] %v2840_v58  ;;  %5090 = vst [vmem:[#allocation86_spill] sm:$0xff] %v2842_v32  ;;  %vm847_vm9 = vcmp.le.f32.partialorder %v821_v0, %v2840_v58  ;;  %vm846_vm10 = vcmp.le.f32.partialorder %v820_v24, %v2842_v32 }
 0xe60   :  { %v852_v21 = vsel %vm847_vm9, %v2344_v28, 1e+10  ;;  %v851_v49 = vsel %vm846_vm10, %v2344_v28, 1e+10 }
 0xe61   :  { %861 = vmin.xlane.f32.xlu1 %v852_v21  ;;  %859 = vmin.xlane.f32.xlu0 %v851_v49 }
 0xedd   :  { %v2848_v40 = vpop.xlane.xlu0 %855 }
 0xede   :  { %5091 = vst [vmem:[#allocation87_spill] sm:$0xff] %v2848_v40  ;;  %vm864_vm11 = vcmp.eq.f32.partialorder %v2344_v28, %v2848_v40 }
 0xedf   :  { %v869_v47 = vsel %vm864_vm11, 1e+10, %v818_v61 }
 0xee0   :  { %886 = vmin.xlane.f32.xlu1 %v869_v47 }
 0xee2   :  { %v2852_v60 = vpop.xlane.xlu1 %853 }
 0xee3   :  { %5092 = vst [vmem:[#allocation88_spill] sm:$0xff] %v2852_v60  ;;  %vm863_vm12 = vcmp.eq.f32.partialorder %v2344_v28, %v2852_v60 }
 0xee4   :  { %v868_v58 = vsel %vm863_vm12, 1e+10, %v817_v46 }
 0xee5   :  { %884 = vmin.xlane.f32.xlu0 %v868_v58 }
 0xee6   :  { %v2856_v32 = vpop.xlane.xlu1 %857 }
 0xee7   :  { %5093 = vst [vmem:[#allocation89_spill] sm:$0xff] %v2856_v32  ;;  %vm865_vm13 = vcmp.eq.f32.partialorder %v2344_v28, %v2856_v32 }
 0xee8   :  { %v870_v49 = vsel %vm865_vm13, 1e+10, %v819_v18 }
 0xee9   :  { %888 = vmin.xlane.f32.xlu0 %v870_v49 }
 0xeea   :  { %v2860_v21 = vpop.xlane.xlu0 %859  ;;  %v2862_v57 = vpop.xlane.xlu1 %861 }
 0xeeb   :  { %5094 = vst [vmem:[#allocation90_spill] sm:$0xff] %v2860_v21  ;;  %5095 = vst [vmem:[#allocation91_spill] sm:$0xff] %v2862_v57  ;;  %vm866_vm14 = vcmp.eq.f32.partialorder %v2344_v28, %v2860_v21  ;;  %vm867_vm15 = vcmp.eq.f32.partialorder %v2344_v28, %v2862_v57 }
 0xeec   :  { %v871_v61 = vsel %vm866_vm14, 1e+10, %v820_v24  ;;  %v872_v46 = vsel %vm867_vm15, 1e+10, %v821_v0 }
 0xeed   :  { %890 = vmin.xlane.f32.xlu1 %v871_v61  ;;  %892 = vmin.xlane.f32.xlu0 %v872_v46 }
 0xf69   :  { %v2868_v60 = vpop.xlane.xlu1 %886 }
 0xf6a   :  { %vm895_vm1 = vcmp.le.f32.partialorder %v869_v47, %v2868_v60 }
 0xf6b   :  { %v900_v18 = vsel %vm895_vm1, %v2344_v28, 1e+10 }
 0xf6c   :  { %906 = vmin.xlane.f32.xlu0 %v900_v18 }
 0xf6e   :  { %v2872_v32 = vpop.xlane.xlu0 %884 }
 0xf6f   :  { %5096 = vst [vmem:[#allocation92_spill] sm:$0xff] %v2872_v32  ;;  %vm894_vm2 = vcmp.le.f32.partialorder %v868_v58, %v2872_v32 }
 0xf70   :  { %v899_v21 = vsel %vm894_vm2, %v2344_v28, 1e+10 }
 0xf71   :  { %904 = vmin.xlane.f32.xlu1 %v899_v21 }
 0xf72   :  { %v2876_v40 = vpop.xlane.xlu0 %888 }
 0xf73   :  { %5097 = vst [vmem:[#allocation93_spill] sm:$0xff] %v2876_v40  ;;  %vm896_vm3 = vcmp.le.f32.partialorder %v870_v49, %v2876_v40 }
 0xf74   :  { %v901_v24 = vsel %vm896_vm3, %v2344_v28, 1e+10 }
 0xf75   :  { %908 = vmin.xlane.f32.xlu1 %v901_v24 }
 0xf76   :  { %v2880_v0 = vpop.xlane.xlu0 %892  ;;  %v2882_v57 = vpop.xlane.xlu1 %890 }
 0xf77   :  { %5098 = vst [vmem:[#allocation94_spill] sm:$0xff] %v2880_v0  ;;  %5099 = vst [vmem:[#allocation95_spill] sm:$0xff] %v2882_v57  ;;  %vm898_vm4 = vcmp.le.f32.partialorder %v872_v46, %v2880_v0  ;;  %vm897_vm5 = vcmp.le.f32.partialorder %v871_v61, %v2882_v57 }
 0xf78   :  { %v903_v18 = vsel %vm898_vm4, %v2344_v28, 1e+10  ;;  %v902_v51 = vsel %vm897_vm5, %v2344_v28, 1e+10 }
 0xf79   :  { %912 = vmin.xlane.f32.xlu1 %v903_v18  ;;  %910 = vmin.xlane.f32.xlu0 %v902_v51 }
 0xff5   :  { %v2888_v21 = vpop.xlane.xlu0 %906 }
 0xff6   :  { %5100 = vst [vmem:[#allocation96_spill] sm:$0xff] %v2888_v21  ;;  %vm915_vm6 = vcmp.eq.f32.partialorder %v2344_v28, %v2888_v21 }
 0xff7   :  { %v920_v24 = vsel %vm915_vm6, 1e+10, %v869_v47 }
 0xff8   :  { %937 = vmin.xlane.f32.xlu1 %v920_v24 }
 0xffa   :  { %v2892_v40 = vpop.xlane.xlu1 %904 }
 0xffb   :  { %5101 = vst [vmem:[#allocation97_spill] sm:$0xff] %v2892_v40  ;;  %vm914_vm7 = vcmp.eq.f32.partialorder %v2344_v28, %v2892_v40 }
 0xffc   :  { %v919_v0 = vsel %vm914_vm7, 1e+10, %v868_v58 }
 0xffd   :  { %935 = vmin.xlane.f32.xlu0 %v919_v0 }
 0xffe   :  { %v2896_v57 = vpop.xlane.xlu1 %908 }
 0xfff   :  { %5102 = vst [vmem:[#allocation98_spill] sm:$0xff] %v2896_v57  ;;  %vm916_vm8 = vcmp.eq.f32.partialorder %v2344_v28, %v2896_v57 }
0x1000   :  { %v921_v51 = vsel %vm916_vm8, 1e+10, %v870_v49 }
0x1001   :  { %939 = vmin.xlane.f32.xlu0 %v921_v51 }
0x1002   :  { %v2900_v18 = vpop.xlane.xlu0 %910  ;;  %v2902_v32 = vpop.xlane.xlu1 %912 }
0x1003   :  { %5103 = vst [vmem:[#allocation99_spill] sm:$0xff] %v2900_v18  ;;  %5104 = vst [vmem:[#allocation100_spill] sm:$0xff] %v2902_v32  ;;  %vm917_vm9 = vcmp.eq.f32.partialorder %v2344_v28, %v2900_v18  ;;  %vm918_vm10 = vcmp.eq.f32.partialorder %v2344_v28, %v2902_v32 }
0x1004   :  { %v922_v47 = vsel %vm917_vm9, 1e+10, %v871_v61  ;;  %v923_v58 = vsel %vm918_vm10, 1e+10, %v872_v46 }
0x1005   :  { %941 = vmin.xlane.f32.xlu1 %v922_v47  ;;  %943 = vmin.xlane.f32.xlu0 %v923_v58 }
0x1081   :  { %v2908_v40 = vpop.xlane.xlu1 %937 }
0x1082   :  { %vm946_vm11 = vcmp.le.f32.partialorder %v920_v24, %v2908_v40 }
0x1083   :  { %v951_v49 = vsel %vm946_vm11, %v2344_v28, 1e+10 }
0x1084   :  { %957 = vmin.xlane.f32.xlu0 %v951_v49 }
0x1086   :  { %v2912_v57 = vpop.xlane.xlu0 %935 }
0x1087   :  { %5105 = vst [vmem:[#allocation101_spill] sm:$0xff] %v2912_v57  ;;  %vm945_vm12 = vcmp.le.f32.partialorder %v919_v0, %v2912_v57 }
0x1088   :  { %v950_v18 = vsel %vm945_vm12, %v2344_v28, 1e+10 }
0x1089   :  { %955 = vmin.xlane.f32.xlu1 %v950_v18 }
0x108a   :  { %v2916_v21 = vpop.xlane.xlu0 %939 }
0x108b   :  { %5106 = vst [vmem:[#allocation102_spill] sm:$0xff] %v2916_v21  ;;  %vm947_vm13 = vcmp.le.f32.partialorder %v921_v51, %v2916_v21 }
0x108c   :  { %v952_v61 = vsel %vm947_vm13, %v2344_v28, 1e+10 }
0x108d   :  { %959 = vmin.xlane.f32.xlu1 %v952_v61 }
0x108e   :  { %v2920_v46 = vpop.xlane.xlu0 %943  ;;  %v2922_v32 = vpop.xlane.xlu1 %941 }
0x108f   :  { %5107 = vst [vmem:[#allocation103_spill] sm:$0xff] %v2920_v46  ;;  %5108 = vst [vmem:[#allocation104_spill] sm:$0xff] %v2922_v32  ;;  %vm949_vm14 = vcmp.le.f32.partialorder %v923_v58, %v2920_v46  ;;  %vm948_vm15 = vcmp.le.f32.partialorder %v922_v47, %v2922_v32 }
0x1090   :  { %v954_v49 = vsel %vm949_vm14, %v2344_v28, 1e+10  ;;  %v953_v57 = vsel %vm948_vm15, %v2344_v28, 1e+10 }
0x1091   :  { %963 = vmin.xlane.f32.xlu1 %v954_v49  ;;  %961 = vmin.xlane.f32.xlu0 %v953_v57 }
0x110d   :  { %v2928_v18 = vpop.xlane.xlu0 %957 }
0x110e   :  { %5109 = vst [vmem:[#allocation105_spill] sm:$0xff] %v2928_v18  ;;  %vm966_vm1 = vcmp.eq.f32.partialorder %v2344_v28, %v2928_v18 }
0x110f   :  { %v971_v61 = vsel %vm966_vm1, 1e+10, %v920_v24  ;;  %vm4968_vm1 = vcmp.eq.s32.totalorder %v2341_v27, 0 }
0x1110   :  { %988 = vmin.xlane.f32.xlu1 %v971_v61 }
0x1112   :  { %v2932_v21 = vpop.xlane.xlu1 %955 }
0x1113   :  { %5110 = vst [vmem:[#allocation106_spill] sm:$0xff] %v2932_v21  ;;  %vm965_vm2 = vcmp.eq.f32.partialorder %v2344_v28, %v2932_v21 }
0x1114   :  { %v970_v46 = vsel %vm965_vm2, 1e+10, %v919_v0  ;;  %vm4967_vm2 = vcmp.eq.s32.totalorder %v2341_v27, 1 }
0x1115   :  { %986 = vmin.xlane.f32.xlu0 %v970_v46 }
0x1116   :  { %v2936_v32 = vpop.xlane.xlu1 %959 }
0x1117   :  { %5111 = vst [vmem:[#allocation107_spill] sm:$0xff] %v2936_v32  ;;  %vm967_vm3 = vcmp.eq.f32.partialorder %v2344_v28, %v2936_v32 }
0x1118   :  { %v972_v57 = vsel %vm967_vm3, 1e+10, %v921_v51  ;;  %vm363_vm3 = vcmp.eq.s32.totalorder %v2341_v27, 2 }
0x1119   :  { %990 = vmin.xlane.f32.xlu0 %v972_v57 }
0x111a   :  { %v2940_v49 = vpop.xlane.xlu0 %961  ;;  %v2942_v43 = vpop.xlane.xlu1 %963 }
0x111b   :  { %5112 = vst [vmem:[#allocation108_spill] sm:$0xff] %v2940_v49  ;;  %5113 = vst [vmem:[#allocation109_spill] sm:$0xff] %v2942_v43  ;;  %vm968_vm4 = vcmp.eq.f32.partialorder %v2344_v28, %v2940_v49  ;;  %vm969_vm5 = vcmp.eq.f32.partialorder %v2344_v28, %v2942_v43 }
0x111c   :  { %v973_v24 = vsel %vm968_vm4, 1e+10, %v922_v47  ;;  %v974_v0 = vsel %vm969_vm5, 1e+10, %v923_v58  ;;  %vm414_vm4 = vcmp.eq.s32.totalorder %v2341_v27, 3  ;;  %vm465_vm5 = vcmp.eq.s32.totalorder %v2341_v27, 4 }
0x111d   :  { %992 = vmin.xlane.f32.xlu1 %v973_v24  ;;  %994 = vmin.xlane.f32.xlu0 %v974_v0 }
0x1199   :  { %v2948_v21 = vpop.xlane.xlu1 %988 }
0x119a   :  { %vm997_vm6 = vcmp.le.f32.partialorder %v971_v61, %v2948_v21 }
0x119b   :  { %v1002_v51 = vsel %vm997_vm6, %v2344_v28, 1e+10  ;;  %vm516_vm6 = vcmp.eq.s32.totalorder %v2341_v27, 5 }
0x119c   :  { %1008 = vmin.xlane.f32.xlu0 %v1002_v51 }
0x119e   :  { %v2952_v32 = vpop.xlane.xlu0 %986 }
0x119f   :  { %5114 = vst [vmem:[#allocation110_spill] sm:$0xff] %v2952_v32  ;;  %vm996_vm7 = vcmp.le.f32.partialorder %v970_v46, %v2952_v32 }
0x11a0   :  { %v1001_v49 = vsel %vm996_vm7, %v2344_v28, 1e+10  ;;  %vm567_vm7 = vcmp.eq.s32.totalorder %v2341_v27, 6 }
0x11a1   :  { %1006 = vmin.xlane.f32.xlu1 %v1001_v49 }
0x11a2   :  { %v2956_v18 = vpop.xlane.xlu0 %990 }
0x11a3   :  { %5115 = vst [vmem:[#allocation111_spill] sm:$0xff] %v2956_v18  ;;  %vm998_vm8 = vcmp.le.f32.partialorder %v972_v57, %v2956_v18 }
0x11a4   :  { %v1003_v47 = vsel %vm998_vm8, %v2344_v28, 1e+10  ;;  %vm618_vm8 = vcmp.eq.s32.totalorder %v2341_v27, 7 }
0x11a5   :  { %1010 = vmin.xlane.f32.xlu1 %v1003_v47 }
0x11a6   :  { %v2960_v58 = vpop.xlane.xlu0 %994  ;;  %v2962_v43 = vpop.xlane.xlu1 %992 }
0x11a7   :  { %5116 = vst [vmem:[#allocation112_spill] sm:$0xff] %v2962_v43  ;;  %vm1000_vm9 = vcmp.le.f32.partialorder %v974_v0, %v2960_v58  ;;  %vm999_vm10 = vcmp.le.f32.partialorder %v973_v24, %v2962_v43 }
0x11a8   :  { %v1005_v51 = vsel %vm1000_vm9, %v2344_v28, 1e+10  ;;  %v1004_v32 = vsel %vm999_vm10, %v2344_v28, 1e+10  ;;  %vm669_vm9 = vcmp.eq.s32.totalorder %v2341_v27, 8  ;;  %vm5012_vm10 = vcmp.eq.s32.totalorder %v2341_v27, 9 }
0x11a9   :  { %1014 = vmin.xlane.f32.xlu1 %v1005_v51  ;;  %1012 = vmin.xlane.f32.xlu0 %v1004_v32 }
0x1225   :  { %v2968_v49 = vpop.xlane.xlu0 %1008 }
0x1226   :  { %5117 = vst [vmem:[#allocation113_spill] sm:$0xff] %v2968_v49  ;;  %vm1017_vm11 = vcmp.eq.f32.partialorder %v2344_v28, %v2968_v49 }
0x1227   :  { %v2972_v47 = vsel %vm1017_vm11, 1e+10, %v971_v61  ;;  %vm5011_vm11 = vcmp.eq.s32.totalorder %v2341_v27, 10 }
0x1228   :  { %1039 = vmin.xlane.f32.xlu1 %v2972_v47 }
0x122a   :  { %v2975_v18 = vpop.xlane.xlu1 %1006 }
0x122b   :  { %5118 = vst [vmem:[#allocation114_spill] sm:$0xff] %v2975_v18  ;;  %vm1016_vm12 = vcmp.eq.f32.partialorder %v2344_v28, %v2975_v18 }
0x122c   :  { %v2979_v43 = vsel %vm1016_vm12, 1e+10, %v970_v46  ;;  %vm4975_vm12 = vcmp.eq.s32.totalorder %v2341_v27, 11 }
0x122d   :  { %1037 = vmin.xlane.f32.xlu0 %v2979_v43 }
0x122e   :  { %v2982_v51 = vpop.xlane.xlu1 %1010 }
0x122f   :  { %vm1018_vm13 = vcmp.eq.f32.partialorder %v2344_v28, %v2982_v51 }
0x1230   :  { %v2986_v32 = vsel %vm1018_vm13, 1e+10, %v972_v57  ;;  %v263_v57 = vsel %vm4968_vm1, %v2346_v29, 1e+10  ;;  %v262_v29 = vsel %vm4968_vm1, %v2351_v31, 1e+10 }
0x1231   :  { %1041 = vmin.xlane.f32.xlu0 %v2986_v32  ;;  %v265_v31 = vsel %vm4968_vm1, %v2361_v35, 1e+10  ;;  %vm4973_vm13 = vcmp.eq.s32.totalorder %v2341_v27, 12 }
0x1232   :  { %v2989_v61 = vpop.xlane.xlu0 %1012  ;;  %v2991_v49 = vpop.xlane.xlu1 %1014 }
0x1233   :  { %5119 = vst [vmem:[#allocation115_spill] sm:$0xff] %v2989_v61  ;;  %vm1019_vm14 = vcmp.eq.f32.partialorder %v2344_v28, %v2989_v61  ;;  %vm1020_vm15 = vcmp.eq.f32.partialorder %v2344_v28, %v2991_v49 }
0x1234   :  { %v2997_v46 = vsel %vm1019_vm14, 1e+10, %v973_v24  ;;  %v2999_v18 = vsel %vm1020_vm15, 1e+10, %v974_v0  ;;  %v314_v24 = vsel %vm4967_vm2, %v2388_v48, %v263_v57  ;;  %vm4970_vm14 = vcmp.eq.s32.totalorder %v2341_v27, 13 }
0x1235   :  { %1043 = vmin.xlane.f32.xlu1 %v2997_v46  ;;  %1045 = vmin.xlane.f32.xlu0 %v2999_v18  ;;  %v365_v0 = vsel %vm363_vm3, %v2428_v4, %v314_v24  ;;  %v264_v4 = vsel %vm4968_vm1, %v2355_v19, 1e+10  ;;  %vm4969_vm15 = vcmp.eq.s32.totalorder %v2341_v27, 14 }
0x1236   :  { %v416_v61 = vsel %vm414_vm4, %v2468_v25, %v365_v0  ;;  %v266_v25 = vsel %vm4968_vm1, %v2359_v34, 1e+10  ;;  %v315_v34 = vsel %vm4967_vm2, %v2396_v52, %v264_v4  ;;  %vm4972_vm1 = vcmp.eq.s32.totalorder %v2341_v27, 16  ;;  %v5123_v4 = vld [vmem:[#allocation40_spill] sm:$0xff] }
0x1237   :  { %v467_v48 = vsel %vm465_vm5, %v2508_v2, %v416_v61  ;;  %v313_v2 = vsel %vm4967_vm2, %v2392_v50, %v262_v29  ;;  %v317_v50 = vsel %vm4967_vm2, %v2400_v54, %v266_v25  ;;  %v5124_v25 = vld [vmem:[#allocation68_spill] sm:$0xff] }
0x1238   :  { %v518_v57 = vsel %vm516_vm6, %v2548_v7, %v467_v48  ;;  %v364_v7 = vsel %vm363_vm3, %v2432_v6, %v313_v2  ;;  %v316_v6 = vsel %vm4967_vm2, %v2402_v55, %v265_v31  ;;  %vm4971_vm2 = vcmp.eq.s32.totalorder %v2341_v27, 15  ;;  %v5126_v2 = vld [vmem:[#allocation46_spill] sm:$0xff] }
0x1239   :  { %v569_v19 = vsel %vm567_vm7, %v2588_v36, %v518_v57  ;;  %v415_v36 = vsel %vm414_vm4, %v2472_v30, %v364_v7  ;;  %v5125_v57 = vld [vmem:[#allocation101_spill] sm:$0xff] }
0x123a   :  { %v620_v35 = vsel %vm618_vm8, %v2628_v22, %v569_v19  ;;  %v466_v22 = vsel %vm465_vm5, %v2512_v5, %v415_v36  ;;  %v5129_v36 = vld [vmem:[#allocation110_spill] sm:$0xff] }
0x123b   :  { %v671_v52 = vsel %vm669_vm9, %v2668_v1, %v620_v35  ;;  %v366_v1 = vsel %vm363_vm3, %v2436_v8, %v315_v34  ;;  %v517_v30 = vsel %vm516_vm6, %v2552_v12, %v466_v22  ;;  %v5127_v34 = vld [vmem:[#allocation47_spill] sm:$0xff]  ;;  %v5128_v35 = vld [vmem:[#allocation76_spill] sm:$0xff]  ;;  %v5130_v22 = vld [vmem:[#allocation53_spill] sm:$0xff] }
0x123c   :  { %v722_v54 = vsel %vm5012_vm10, %v2708_v45, %v671_v52  ;;  %v368_v45 = vsel %vm363_vm3, %v2440_v10, %v317_v50  ;;  %v568_v5 = vsel %vm567_vm7, %v2592_v59, %v517_v30 }
0x123d   :  { %v773_v55 = vsel %vm5011_vm11, %v2748_v14, %v722_v54  ;;  %v417_v14 = vsel %vm414_vm4, %v2476_v33, %v366_v1  ;;  %v619_v12 = vsel %vm618_vm8, %v2632_v20, %v568_v5  ;;  %v367_v20 = vsel %vm363_vm3, %v2442_v11, %v316_v6  ;;  %v5131_v1 = vld [vmem:[#allocation54_spill] sm:$0xff] }
0x123e   :  { %v824_v8 = vsel %vm4975_vm12, %v2788_v62, %v773_v55  ;;  %v468_v62 = vsel %vm465_vm5, %v2516_v9, %v417_v14  ;;  %v670_v59 = vsel %vm669_vm9, %v2672_v23, %v619_v12  ;;  %v5132_v55 = vld [vmem:[#allocation84_spill] sm:$0xff]  ;;  %v5134_v12 = vld [vmem:[#allocation62_spill] sm:$0xff] }
0x123f   :  { %v875_v10 = vsel %vm4973_vm13, %v2828_v16, %v824_v8  ;;  %v519_v16 = vsel %vm516_vm6, %v2556_v17, %v468_v62  ;;  %v721_v9 = vsel %vm5012_vm10, %v2712_v44, %v670_v59  ;;  %v5133_v8 = vld [vmem:[#allocation61_spill] sm:$0xff] }
0x1240   :  { %v926_v33 = vsel %vm4970_vm14, %v2868_v60, %v875_v10  ;;  %v419_v60 = vsel %vm414_vm4, %v2480_v37, %v368_v45  ;;  %v570_v11 = vsel %vm567_vm7, %v2596_v53, %v519_v16  ;;  %v772_v17 = vsel %vm5011_vm11, %v2752_v38, %v721_v9  ;;  %v5135_v62 = vld [vmem:[#allocation93_spill] sm:$0xff]  ;;  %v5137_v16 = vld [vmem:[#allocation70_spill] sm:$0xff] }
0x1241   :  { %v977_v23 = vsel %vm4969_vm15, %v2908_v40, %v926_v33  ;;  %v418_v40 = vsel %vm414_vm4, %v2482_v39, %v367_v20  ;;  %v621_v37 = vsel %vm618_vm8, %v2636_v56, %v570_v11  ;;  %v823_v53 = vsel %vm4975_vm12, %v2792_v42, %v772_v17  ;;  %v5136_v33 = vld [vmem:[#allocation69_spill] sm:$0xff] }
0x1242   :  { %v1028_v44 = vsel %vm4971_vm2, %v2948_v21, %v977_v23  ;;  %v470_v21 = vsel %vm465_vm5, %v2520_v13, %v419_v60  ;;  %v469_v24 = vsel %vm465_vm5, %v2522_v15, %v418_v40  ;;  %v672_v39 = vsel %vm669_vm9, %v2676_v41, %v621_v37  ;;  %v5120_v15 = vld [vmem:[#allocation60_spill] sm:$0xff]  ;;  %v5138_v23 = vld [vmem:[#allocation102_spill] sm:$0xff]  ;;  %v5139_v11 = vld [vmem:[#allocation77_spill] sm:$0xff] }
0x1243   :  { %v874_v56 = vsel %vm4973_vm13, %v2832_v26, %v823_v53  ;;  %v521_v42 = vsel %vm516_vm6, %v2560_v63, %v470_v21  ;;  %v520_v13 = vsel %vm516_vm6, %v2562_v3, %v469_v24  ;;  %v723_v0 = vsel %vm5012_vm10, %v5120_v15, %v672_v39  ;;  %v5121_v41 = vld [vmem:[#allocation92_spill] sm:$0xff]  ;;  %v5122_v26 = vld [vmem:[#allocation39_spill] sm:$0xff]  ;;  %v5142_v21 = vld [vmem:[#allocation85_spill] sm:$0xff] }
0x1244   :  { %v925_v29 = vsel %vm4970_vm14, %v5121_v41, %v874_v56  ;;  %v572_v48 = vsel %vm567_vm7, %v5122_v26, %v521_v42  ;;  %v571_v63 = vsel %vm567_vm7, %v5123_v4, %v520_v13  ;;  %v774_v3 = vsel %vm5011_vm11, %v5124_v25, %v723_v0  ;;  %v5141_v37 = vld [vmem:[#allocation111_spill] sm:$0xff]  ;;  %v5143_v39 = vld [vmem:[#allocation86_spill] sm:$0xff]  ;;  %v5148_v25 = vld [vmem:[#allocation112_spill] sm:$0xff] }
0x1245   :  { %v976_v31 = vsel %vm4969_vm15, %v5125_v57, %v925_v29  ;;  %v623_v19 = vsel %vm618_vm8, %v5126_v2, %v572_v48  ;;  %v622_v7 = vsel %vm618_vm8, %v5127_v34, %v571_v63  ;;  %v825_v50 = vsel %vm4975_vm12, %v5128_v35, %v774_v3  ;;  %v5144_v13 = vld [vmem:[#allocation94_spill] sm:$0xff]  ;;  %v5145_v0 = vld [vmem:[#allocation95_spill] sm:$0xff]  ;;  %v5147_v48 = vld [vmem:[#allocation104_spill] sm:$0xff] }
0x1246   :  { %v1027_v52 = vsel %vm4971_vm2, %v5129_v36, %v976_v31  ;;  %v674_v54 = vsel %vm669_vm9, %v5130_v22, %v623_v19  ;;  %v673_v30 = vsel %vm669_vm9, %v5131_v1, %v622_v7  ;;  %v876_v45 = vsel %vm4973_vm13, %v5132_v55, %v825_v50  ;;  %v5146_v29 = vld [vmem:[#allocation103_spill] sm:$0xff] }
0x1247   :  { %v725_v14 = vsel %vm5012_vm10, %v5133_v8, %v674_v54  ;;  %v724_v10 = vsel %vm5012_vm10, %v5134_v12, %v673_v30  ;;  %v927_v59 = vsel %vm4970_vm14, %v5135_v62, %v876_v45  ;;  %v1082_v1 = vld [vmem:[#allocation2 + $0x20] sm:$0xff]  ;;  %v1081_v30 = vld [vmem:[#allocation2 + $0x18] sm:$0xff] }
0x1248   :  { %v776_v20 = vsel %vm5011_vm11, %v5136_v33, %v725_v14  ;;  %v775_v9 = vsel %vm5011_vm11, %v5137_v16, %v724_v10  ;;  %v978_v60 = vsel %vm4969_vm15, %v5138_v23, %v927_v59  ;;  %v5149_v10 = vld [vmem:[#allocation9_spill] sm:$0xff]  ;;  %v5151_v59 = vld [vmem:[#allocation14_spill] sm:$0xff] }
0x1249   :  { %v827_v17 = vsel %vm4975_vm12, %v5139_v11, %v776_v20  ;;  %v1029_v53 = vsel %vm4971_vm2, %v5141_v37, %v978_v60  ;;  %v5153_v20 = vld [vmem:[#allocation19_spill] sm:$0xff] }
0x124a   :  { %v878_v24 = vsel %vm4973_vm13, %v5142_v21, %v827_v17  ;;  %v5156_v60 = vld [vmem:[#allocation11_spill] sm:$0xff]  ;;  %v5158_v17 = vld [vmem:[#allocation12_spill] sm:$0xff] }
0x124b   :  { %v929_v15 = vsel %vm4970_vm14, %v5144_v13, %v878_v24  ;;  %v5162_v21 = vld [vmem:[#allocation15_spill] sm:$0xff] }
0x124c   :  { %v980_v26 = vsel %vm4969_vm15, %v5146_v29, %v929_v15  ;;  %v5166_v15 = vld [vmem:[#allocation17_spill] sm:$0xff] }
0x124d   :  { %v1031_v63 = vsel %vm4971_vm2, %v2960_v58, %v980_v26  ;;  %v5170_v26 = vld [vmem:[#allocation20_spill] sm:$0xff] }
0x12b1   :  { %v1040_v61 = vpop.xlane.xlu1 %1039 }
0x12b2   :  { %v1069_v38 = vsel %vm4972_vm1, %v1040_v61, %v1028_v44  ;;  %v5140_v44 = vld [vmem:[#allocation78_spill] sm:$0xff] }
0x12b3   :  { %1090 = vrot.lane.b32.xlu0 %v1069_v38, %s2227_s7  ;;  %v826_v40 = vsel %vm4975_vm12, %v5140_v44, %v775_v9  ;;  %v5154_v9 = vld [vmem:[#allocation10_spill] sm:$0xff] }
0x12b4   :  { %v877_v56 = vsel %vm4973_vm13, %v5143_v39, %v826_v40  ;;  %v5160_v40 = vld [vmem:[#allocation24_spill] sm:$0xff] }
0x12b5   :  { %v928_v41 = vsel %vm4970_vm14, %v5145_v0, %v877_v56  ;;  %v5163_v39 = vld [vmem:[#allocation16_spill] sm:$0xff] }
0x12b6   :  { %v1038_v6 = vpop.xlane.xlu0 %1037  ;;  %v979_v4 = vsel %vm4969_vm15, %v5147_v48, %v928_v41  ;;  %vm1048_vm15 = vcmp.le.f32.partialorder %v2972_v47, %v1040_v61  ;;  %v1079_v61 = vld [vmem:[#allocation2 + $0x8] sm:$0xff]  ;;  %v5168_v41 = vld [vmem:[#allocation18_spill] sm:$0xff] }
0x12b7   :  { %v1068_v5 = vsel %vm4972_vm1, %v1038_v6, %v1027_v52  ;;  %v1030_v3 = vsel %vm4971_vm2, %v5148_v25, %v979_v4  ;;  %v1053_v58 = vsel %vm1048_vm15, %v2344_v28, 1e+10  ;;  %vm1047_vm2 = vcmp.le.f32.partialorder %v2979_v43, %v1038_v6  ;;  %v5171_v4 = vld [vmem:[#allocation34_spill] sm:$0xff]  ;;  %v5172_v25 = vld [vmem:[#allocation21_spill] sm:$0xff] }
0x12b8   :  { %1088 = vrot.lane.b32.xlu1 %v1068_v5, %s2227_s7  ;;  %v1052_v7 = vsel %vm1047_vm2, %v2344_v28, 1e+10  ;;  %vm4974_vm15 = vcmask 277504   ;;  %vm5152_vm2 = vcmp.eq.s32.totalorder %v2341_v27, 1 }
0x12ba   :  { %v1042_v38 = vpop.xlane.xlu0 %1041 }
0x12bb   :  { %v1070_v42 = vsel %vm4972_vm1, %v1042_v38, %v1029_v53  ;;  %vm1049_vm14 = vcmp.le.f32.partialorder %v2986_v32, %v1042_v38  ;;  %v5161_v53 = vld [vmem:[#allocation13_spill] sm:$0xff] }
0x12bc   :  { %1092 = vrot.lane.b32.xlu1 %v1070_v42, %s2227_s7  ;;  %v1054_v34 = vsel %vm1049_vm14, %v2344_v28, 1e+10  ;;  %v5165_v42 = vld [vmem:[#allocation29_spill] sm:$0xff] }
0x12be   :  { %v1046_v57 = vpop.xlane.xlu0 %1045  ;;  %v1044_v31 = vpop.xlane.xlu1 %1043 }
0x12bf   :  { %v1072_v2 = vsel %vm4972_vm1, %v1046_v57, %v1031_v63  ;;  %v1071_v19 = vsel %vm4972_vm1, %v1044_v31, %v1030_v3  ;;  %vm1051_vm1 = vcmp.le.f32.partialorder %v2999_v18, %v1046_v57  ;;  %vm1050_vm13 = vcmp.le.f32.partialorder %v2997_v46, %v1044_v31  ;;  %v1078_v18 = vld [vmem:[#allocation2] sm:$0xff]  ;;  %v5173_v57 = vld [vmem:[#allocation22_spill] sm:$0xff] }
0x12c0   :  { %1096 = vrot.lane.b32.xlu0 %v1072_v2, %s2227_s7  ;;  %1094 = vrot.lane.b32.xlu1 %v1071_v19, %s2227_s7  ;;  %v1056_v35 = vsel %vm1051_vm1, %v2344_v28, 1e+10  ;;  %v1055_v47 = vsel %vm1050_vm13, %v2344_v28, 1e+10  ;;  %v1080_v28 = vld [vmem:[#allocation2 + $0x10] sm:$0xff]  ;;  %vm5150_vm1 = vcmp.eq.s32.totalorder %v2341_v27, 0 }
0x12c1   :  { %v268_v62 = vsel %vm5150_vm1, %v5149_v10, 0.0  ;;  %vm5155_vm13 = vmmov %vm5150_vm1  ;;  %v271_v38 = vsel %vm5150_vm1, %v5161_v53, 0.0  ;;  %v5174_v2 = vld [vmem:[#allocation23_spill] sm:$0xff]  ;;  %v5185_v10 = vld [vmem:[#allocation33_spill] sm:$0xff] }
0x12c2   :  { %v319_v33 = vsel %vm5152_vm2, %v5151_v59, %v268_v62  ;;  %v267_v23 = vsel %vm5155_vm13, %v5154_v9, 0.0  ;;  %vm5157_vm14 = vmmov %vm5150_vm1  ;;  %v5186_v59 = vld [vmem:[#allocation36_spill] sm:$0xff]  ;;  %v5188_v9 = vld [vmem:[#allocation35_spill] sm:$0xff] }
0x12c3   :  { %v370_v16 = vsel %vm363_vm3, %v5153_v20, %v319_v33  ;;  %v269_v11 = vsel %vm5157_vm14, %v5156_v60, 0.0  ;;  %v318_v24 = vsel %vm5152_vm2, %v5162_v21, %v267_v23  ;;  %vm5164_vm13 = vmmov %vm5152_vm2  ;;  %v5187_v20 = vld [vmem:[#allocation63_spill] sm:$0xff]  ;;  %v5189_v60 = vld [vmem:[#allocation37_spill] sm:$0xff] }
0x12c4   :  { %v421_v37 = vsel %vm414_vm4, %v5160_v40, %v370_v16  ;;  %v320_v56 = vsel %vm5164_vm13, %v5163_v39, %v269_v11  ;;  %vm5169_vm14 = vmmov %vm5152_vm2  ;;  %v369_v48 = vsel %vm363_vm3, %v5170_v26, %v318_v24  ;;  %v5191_v40 = vld [vmem:[#allocation71_spill] sm:$0xff]  ;;  %v5192_v53 = vld [vmem:[#allocation38_spill] sm:$0xff]  ;;  %vm5210_vm13 = vcmp.eq.s32.totalorder %v2341_v27, 14 }
0x12c5   :  { %v472_v13 = vsel %vm465_vm5, %v5165_v42, %v421_v37  ;;  %v322_v29 = vsel %vm5169_vm14, %v5168_v41, %v271_v38  ;;  %v371_v3 = vsel %vm363_vm3, %v5172_v25, %v320_v56  ;;  %v5193_v21 = vld [vmem:[#allocation42_spill] sm:$0xff]  ;;  %v5195_v42 = vld [vmem:[#allocation79_spill] sm:$0xff]  ;;  %v5197_v41 = vld [vmem:[#allocation49_spill] sm:$0xff] }
0x12c6   :  { %v523_v63 = vsel %vm516_vm6, %v5171_v4, %v472_v13  ;;  %v373_v19 = vsel %vm363_vm3, %v5174_v2, %v322_v29  ;;  %v5194_v39 = vld [vmem:[#allocation50_spill] sm:$0xff]  ;;  %v5198_v26 = vld [vmem:[#allocation57_spill] sm:$0xff]  ;;  %v5199_v4 = vld [vmem:[#allocation87_spill] sm:$0xff] }
0x12c7   :  { %v5201_v25 = vld [vmem:[#allocation45_spill] sm:$0xff] }
0x12c8   :  { %v5203_v2 = vld [vmem:[#allocation65_spill] sm:$0xff] }
0x12df   :  { %1059 = vmin.xlane.f32.xlu0 %v1053_v58  ;;  %v5175_v58 = vld [vmem:[#allocation41_spill] sm:$0xff] }
0x12e3   :  { %1061 = vmin.xlane.f32.xlu0 %v1054_v34  ;;  %v574_v34 = vsel %vm567_vm7, %v5175_v58, %v523_v63  ;;  %v5204_v58 = vld [vmem:[#allocation96_spill] sm:$0xff] }
0x12e4   :  { %1057 = vmin.xlane.f32.xlu1 %v1052_v7  ;;  %v5176_v7 = vld [vmem:[#allocation25_spill] sm:$0xff] }
0x12e7   :  { %1065 = vmin.xlane.f32.xlu0 %v1056_v35  ;;  %v420_v35 = vsel %vm414_vm4, %v5176_v7, %v369_v48  ;;  %v5206_v7 = vld [vmem:[#allocation51_spill] sm:$0xff] }
0x12e8   :  { %1063 = vmin.xlane.f32.xlu1 %v1055_v47  ;;  %v5177_v47 = vld [vmem:[#allocation26_spill] sm:$0xff] }
0x1325   :  { %v1091_v32 = vpop.permute.xlu0 %1090 }
0x1326   :  { %v3286_v43 = vsel %vm31_vm0, %v1079_v61, %v1091_v32  ;;  %v422_v61 = vsel %vm414_vm4, %v5177_v47, %v371_v3  ;;  %v5178_v32 = vld [vmem:[#allocation27_spill] sm:$0xff]  ;;  %v5207_v47 = vld [vmem:[#allocation64_spill] sm:$0xff] }
0x1327   :  { %v1143_v50 = vsel %vm4974_vm15, %v3286_v43, inf }
0x1328   :  { %1144 = vmin.xlane.f32.xlu0 %v1143_v50 }
0x132a   :  { %v1089_v36 = vpop.permute.xlu1 %1088 }
0x132b   :  { %v3291_v46 = vsel %vm31_vm0, %v1078_v18, %v1089_v36  ;;  %v5179_v18 = vld [vmem:[#allocation48_spill] sm:$0xff] }
0x132c   :  { %v1140_v52 = vsel %vm4974_vm15, %v3291_v46, inf  ;;  %v625_v36 = vsel %vm618_vm8, %v5179_v18, %v574_v34  ;;  %v5209_v18 = vld [vmem:[#allocation105_spill] sm:$0xff] }
0x132d   :  { %1141 = vmin.xlane.f32.xlu1 %v1140_v52  ;;  %v5180_v52 = vld [vmem:[#allocation28_spill] sm:$0xff] }
0x132e   :  { %v1093_v6 = vpop.permute.xlu1 %1092 }
0x132f   :  { %v3296_v22 = vsel %vm31_vm0, %v1080_v28, %v1093_v6  ;;  %v424_v28 = vsel %vm414_vm4, %v5180_v52, %v373_v19  ;;  %v5181_v6 = vld [vmem:[#allocation30_spill] sm:$0xff]  ;;  %v5211_v52 = vld [vmem:[#allocation52_spill] sm:$0xff] }
0x1330   :  { %v1146_v54 = vsel %vm4974_vm15, %v3296_v22, inf  ;;  %v475_v62 = vsel %vm465_vm5, %v5185_v10, %v424_v28 }
0x1331   :  { %1147 = vmin.xlane.f32.xlu1 %v1146_v54  ;;  %v471_v54 = vsel %vm465_vm5, %v5181_v6, %v420_v35  ;;  %v526_v38 = vsel %vm516_vm6, %v5192_v53, %v475_v62  ;;  %v5212_v6 = vld [vmem:[#allocation72_spill] sm:$0xff]  ;;  %v5227_v53 = vld [vmem:[#allocation66_spill] sm:$0xff] }
0x1332   :  { %v1097_v55 = vpop.permute.xlu0 %1096  ;;  %v1095_v45 = vpop.permute.xlu1 %1094  ;;  %v522_v23 = vsel %vm516_vm6, %v5188_v9, %v471_v54  ;;  %v577_v3 = vsel %vm567_vm7, %v5201_v25, %v526_v38  ;;  %v5217_v62 = vld [vmem:[#allocation80_spill] sm:$0xff]  ;;  %v5221_v9 = vld [vmem:[#allocation58_spill] sm:$0xff] }
0x1333   :  { %v3301_v5 = vsel %vm31_vm0, %v1082_v1, %v1097_v55  ;;  %v3304_v8 = vsel %vm31_vm0, %v1081_v30, %v1095_v45  ;;  %v5182_v1 = vld [vmem:[#allocation31_spill] sm:$0xff]  ;;  %v573_v24 = vsel %vm567_vm7, %v5193_v21, %v522_v23  ;;  %v628_v28 = vsel %vm618_vm8, %v5211_v52, %v577_v3  ;;  %v5238_v25 = vld [vmem:[#allocation82_spill] sm:$0xff]  ;;  %v5253_v52 = vld [vmem:[#allocation108_spill] sm:$0xff] }
0x1334   :  { %v1152_v14 = vsel %vm4974_vm15, %v3301_v5, inf  ;;  %v1149_v12 = vsel %vm4974_vm15, %v3304_v8, inf  ;;  %vm5159_vm15 = vmmov %vm5150_vm1  ;;  %v473_v30 = vsel %vm465_vm5, %v5182_v1, %v422_v61  ;;  %v5183_v55 = vld [vmem:[#allocation55_spill] sm:$0xff]  ;;  %v624_v29 = vsel %vm618_vm8, %v5197_v41, %v573_v24  ;;  %v5213_v1 = vld [vmem:[#allocation81_spill] sm:$0xff] }
0x1335   :  { %1153 = vmin.xlane.f32.xlu1 %v1152_v14  ;;  %1150 = vmin.xlane.f32.xlu0 %v1149_v12  ;;  %v270_v44 = vsel %vm5159_vm15, %v5158_v17, 0.0  ;;  %vm5167_vm15 = vmmov %vm5152_vm2  ;;  %v676_v45 = vsel %vm669_vm9, %v5183_v55, %v625_v36  ;;  %v5184_v14 = vld [vmem:[#allocation32_spill] sm:$0xff]  ;;  %v524_v33 = vsel %vm516_vm6, %v5186_v59, %v473_v30  ;;  %v5190_v17 = vld [vmem:[#allocation43_spill] sm:$0xff]  ;;  %vm5200_vm1 = vcmp.eq.s32.totalorder %v2341_v27, 12 }
0x1336   :  { %v321_v0 = vsel %vm5167_vm15, %v5166_v15, %v270_v44  ;;  %v727_v16 = vsel %vm5012_vm10, %v5187_v20, %v676_v45  ;;  %v575_v44 = vsel %vm567_vm7, %v5190_v17, %v524_v33  ;;  %v5196_v15 = vld [vmem:[#allocation44_spill] sm:$0xff]  ;;  %vm5205_vm2 = vcmp.eq.s32.totalorder %v2341_v27, 13  ;;  %v5214_v55 = vld [vmem:[#allocation113_spill] sm:$0xff]  ;;  %vm5219_vm14 = vmmov %vm5200_vm1 }
0x1337   :  { %v372_v31 = vsel %vm363_vm3, %v5173_v57, %v321_v0  ;;  %v778_v37 = vsel %vm5011_vm11, %v5191_v40, %v727_v16  ;;  %v626_v56 = vsel %vm618_vm8, %v5194_v39, %v575_v44  ;;  %v5202_v57 = vld [vmem:[#allocation56_spill] sm:$0xff]  ;;  %vm5215_vm15 = vcmp.eq.s32.totalorder %v2341_v27, 15  ;;  %v5218_v33 = vld [vmem:[#allocation89_spill] sm:$0xff]  ;;  %v5225_v40 = vld [vmem:[#allocation98_spill] sm:$0xff] }
0x1338   :  { %v423_v50 = vsel %vm414_vm4, %v5178_v32, %v372_v31  ;;  %v829_v13 = vsel %vm4975_vm12, %v5195_v42, %v778_v37  ;;  %v677_v48 = vsel %vm669_vm9, %v5198_v26, %v626_v56  ;;  %v675_v31 = vsel %vm669_vm9, %v5202_v57, %v624_v29  ;;  %v5208_v32 = vld [vmem:[#allocation73_spill] sm:$0xff]  ;;  %v5223_v17 = vld [vmem:[#allocation88_spill] sm:$0xff]  ;;  %v5228_v21 = vld [vmem:[#allocation75_spill] sm:$0xff] }
0x1339   :  { %v474_v12 = vsel %vm465_vm5, %v5184_v14, %v423_v50  ;;  %v880_v63 = vsel %vm5200_vm1, %v5199_v4, %v829_v13  ;;  %v728_v19 = vsel %vm5012_vm10, %v5203_v2, %v677_v48  ;;  %v726_v61 = vsel %vm5012_vm10, %v5207_v47, %v675_v31  ;;  %v5229_v39 = vld [vmem:[#allocation97_spill] sm:$0xff]  ;;  %v5231_v42 = vld [vmem:[#allocation107_spill] sm:$0xff]  ;;  %v5235_v26 = vld [vmem:[#allocation106_spill] sm:$0xff] }
0x133a   :  { %v525_v11 = vsel %vm516_vm6, %v5189_v60, %v474_v12  ;;  %v931_v34 = vsel %vm5205_vm2, %v5204_v58, %v880_v63  ;;  %v779_v50 = vsel %vm5011_vm11, %v5208_v32, %v728_v19  ;;  %v777_v54 = vsel %vm5011_vm11, %v5212_v6, %v726_v61  ;;  %v5216_v12 = vld [vmem:[#allocation59_spill] sm:$0xff]  ;;  %vm5224_vm2 = vmmov %vm5219_vm14  ;;  %v5241_v2 = vld [vmem:[#allocation114_spill] sm:$0xff] }
0x133b   :  { %v576_v0 = vsel %vm567_vm7, %v5196_v15, %v525_v11  ;;  %v982_v36 = vsel %vm5210_vm13, %v5209_v18, %v931_v34  ;;  %v830_v30 = vsel %vm4975_vm12, %v5213_v1, %v779_v50  ;;  %v679_v10 = vsel %vm669_vm9, %v5216_v12, %v628_v28  ;;  %v5222_v60 = vld [vmem:[#allocation67_spill] sm:$0xff]  ;;  %v5233_v15 = vld [vmem:[#allocation74_spill] sm:$0xff]  ;;  %v5251_v18 = vld [vmem:[#allocation109_spill] sm:$0xff] }
0x133c   :  { %v627_v35 = vsel %vm618_vm8, %v5206_v7, %v576_v0  ;;  %v1033_v45 = vsel %vm5215_vm15, %v5214_v55, %v982_v36  ;;  %v828_v59 = vsel %vm4975_vm12, %v5217_v62, %v777_v54  ;;  %v881_v20 = vsel %vm5219_vm14, %v5218_v33, %v830_v30  ;;  %v5234_v41 = vld [vmem:[#allocation83_spill] sm:$0xff]  ;;  %v5244_v7 = vld [vmem:[#allocation90_spill] sm:$0xff] }
0x133d   :  { %vm5220_vm1 = vcmp.eq.s32.totalorder %v2341_v27, 16  ;;  %v678_v23 = vsel %vm669_vm9, %v5221_v9, %v627_v35  ;;  %v730_v11 = vsel %vm5012_vm10, %v5222_v60, %v679_v10  ;;  %v879_v44 = vsel %vm5224_vm2, %v5223_v17, %v828_v59  ;;  %v5239_v57 = vld [vmem:[#allocation91_spill] sm:$0xff]  ;;  %v5246_v35 = vld [vmem:[#allocation100_spill] sm:$0xff]  ;;  %v1110_v59 = vld [vmem:[#allocation3 + $0x8] sm:$0xff] }
0x133e   :  { %vm5226_vm13 = vcmp.eq.s32.totalorder %v2341_v27, 13  ;;  %v729_v38 = vsel %vm5012_vm10, %v5227_v53, %v678_v23  ;;  %v781_v24 = vsel %vm5011_vm11, %v5228_v21, %v730_v11  ;;  %vm5232_vm14 = vcmp.eq.s32.totalorder %v2341_v27, 14  ;;  %v5249_v32 = vld [vmem:[#allocation99_spill] sm:$0xff]  ;;  %v1111_v60 = vld [vmem:[#allocation3 + $0x10] sm:$0xff]  ;;  %v1109_v11 = vld [vmem:[#allocation3] sm:$0xff] }
0x133f   :  { %v932_v37 = vsel %vm5226_vm13, %v5225_v40, %v881_v20  ;;  %vm5230_vm15 = vmmov %vm5226_vm13  ;;  %v780_v0 = vsel %vm5011_vm11, %v5233_v15, %v729_v38  ;;  %v832_v29 = vsel %vm4975_vm12, %v5234_v41, %v781_v24  ;;  %vm5237_vm2 = vcmp.eq.s32.totalorder %v2341_v27, 15  ;;  %v5256_v1 = vld [vmem:[#allocation115_spill] sm:$0xff]  ;;  %v1113_v53 = vld [vmem:[#allocation3 + $0x20] sm:$0xff] }
0x1340   :  { %v930_v56 = vsel %vm5230_vm15, %v5229_v39, %v879_v44  ;;  %v983_v13 = vsel %vm5232_vm14, %v5231_v42, %v932_v37  ;;  %v831_v3 = vsel %vm4975_vm12, %v5238_v25, %v780_v0  ;;  %vm5240_vm13 = vcmp.eq.s32.totalorder %v2341_v27, 12  ;;  %vm5242_vm15 = vmmov %vm5237_vm2  ;;  %v1112_v38 = vld [vmem:[#allocation3 + $0x18] sm:$0xff] }
0x1341   :  { %v1034_v4 = vsel %vm5237_vm2, %v2982_v51, %v983_v13  ;;  %v883_v31 = vsel %vm5240_vm13, %v5239_v57, %v832_v29  ;;  %vm5247_vm2 = vcmp.eq.s32.totalorder %v2341_v27, 13 }
0x1342   :  { %v934_v47 = vsel %vm5247_vm2, %v5246_v35, %v883_v31 }
0x1368   :  { %v1060_v14 = vpop.xlane.xlu0 %1059 }
0x1369   :  { %v1074_v16 = vsel %vm5220_vm1, %v1060_v14, %v1033_v45  ;;  %vm5236_vm1 = vmmov %vm5232_vm14  ;;  %vm5243_vm14 = vcmp.eq.s32.totalorder %v2341_v27, 16 }
0x136a   :  { %1121 = vrot.lane.b32.xlu1 %v1074_v16, %s2227_s7  ;;  %v981_v48 = vsel %vm5236_vm1, %v5235_v26, %v930_v56  ;;  %vm5245_vm1 = vmmov %vm5240_vm13 }
0x136b   :  { %v1032_v19 = vsel %vm5242_vm15, %v5241_v2, %v981_v48  ;;  %v882_v51 = vsel %vm5245_vm1, %v5244_v7, %v831_v3  ;;  %vm5248_vm12 = vmmov %vm5243_vm14  ;;  %vm5252_vm15 = vcmp.eq.s32.totalorder %v2341_v27, 14  ;;  %vm5255_vm1 = vcmp.eq.s32.totalorder %v2341_v27, 15 }
0x136c   :  { %v1062_v63 = vpop.xlane.xlu0 %1061  ;;  %vm5250_vm13 = vmmov %vm5247_vm2  ;;  %v985_v36 = vsel %vm5252_vm15, %v5251_v18, %v934_v47  ;;  %vm5258_vm2 = vcmp.eq.s32.totalorder %v2341_v27, 16 }
0x136d   :  { %v1075_v58 = vsel %vm5243_vm14, %v1062_v63, %v1034_v4  ;;  %v1058_v34 = vpop.xlane.xlu1 %1057  ;;  %v933_v50 = vsel %vm5250_vm13, %v5249_v32, %v882_v51  ;;  %vm5254_vm14 = vmmov %vm5252_vm15  ;;  %v1036_v6 = vsel %vm5255_vm1, %v2991_v49, %v985_v36 }
0x136e   :  { %v1073_v61 = vsel %vm5248_vm12, %v1058_v34, %v1032_v19  ;;  %1123 = vrot.lane.b32.xlu1 %v1075_v58, %s2227_s7  ;;  %v984_v28 = vsel %vm5254_vm14, %v5253_v52, %v933_v50  ;;  %vm5257_vm12 = vmmov %vm5255_vm1  ;;  %vm5262_vm14 = vcmask 277504  }
0x136f   :  { %1119 = vrot.lane.b32.xlu0 %v1073_v61, %s2227_s7  ;;  %v1035_v30 = vsel %vm5257_vm12, %v5256_v1, %v984_v28  ;;  %vm5259_vm13 = vmmov %vm5258_vm2 }
0x1370   :  { %v1066_v54 = vpop.xlane.xlu0 %1065 }
0x1371   :  { %v1077_v55 = vsel %vm5258_vm2, %v1066_v54, %v1036_v6  ;;  %v1064_v45 = vpop.xlane.xlu1 %1063  ;;  %vm5263_vm2 = vmmov %vm5262_vm14 }
0x1372   :  { %v1076_v14 = vsel %vm5259_vm13, %v1064_v45, %v1035_v30  ;;  %1127 = vrot.lane.b32.xlu1 %v1077_v55, %s2227_s7 }
0x1373   :  { %1125 = vrot.lane.b32.xlu0 %v1076_v14, %s2227_s7 }
0x13b1   :  { %v3571_v62 = vpop.xlane.xlu0 %1144 }
0x13b2   :  { %vm1156_vm15 = vcmp.le.f32.partialorder %v3286_v43, %v3571_v62 }
0x13b6   :  { %v3565_v12 = vpop.xlane.xlu1 %1141 }
0x13b7   :  { %vm1155_vm1 = vcmp.le.f32.partialorder %v3291_v46, %v3565_v12 }
0x13ba   :  { %v3567_v10 = vpop.xlane.xlu1 %1147 }
0x13bb   :  { %vm1157_vm12 = vcmp.le.f32.partialorder %v3296_v22, %v3567_v10 }
0x13be   :  { %v3569_v49 = vpop.xlane.xlu1 %1153  ;;  %v3575_v20 = vpop.xlane.xlu0 %1150 }
0x13bf   :  { %5260 = vst [vmem:[#allocation60_spill] sm:$0xff] %v3569_v49  ;;  %5261 = vst [vmem:[#allocation92_spill] sm:$0xff] %v3575_v20  ;;  %vm1159_vm13 = vcmp.le.f32.partialorder %v3301_v5, %v3569_v49 }
0x13dc   :  { %v1122_v33 = vpop.permute.xlu1 %1121 }
0x13dd   :  { %v3578_v16 = vsel %vm31_vm0, %v1110_v59, %v1122_v33 }
0x13de   :  { %v1161_v9 = vsel %vm1156_vm15, %v3578_v16, 1e+10  ;;  %vm5264_vm15 = vmmov %vm5263_vm2 }
0x13df   :  { %v1168_v23 = vsel %vm5262_vm14, %v1161_v9, inf  ;;  %vm1158_vm14 = vcmp.le.f32.partialorder %v3304_v8, %v3575_v20 }
0x13e0   :  { %1169 = vmin.xlane.f32.xlu1 %v1168_v23  ;;  %v1124_v17 = vpop.permute.xlu1 %1123 }
0x13e1   :  { %v1120_v44 = vpop.permute.xlu0 %1119  ;;  %v3585_v40 = vsel %vm31_vm0, %v1111_v60, %v1124_v17 }
0x13e2   :  { %v3588_v37 = vsel %vm31_vm0, %v1109_v11, %v1120_v44  ;;  %v1162_v13 = vsel %vm1157_vm12, %v3585_v40, 1e+10 }
0x13e3   :  { %v1160_v21 = vsel %vm1155_vm1, %v3588_v37, 1e+10  ;;  %vm5265_vm1 = vmmov %vm5263_vm2 }
0x13e4   :  { %v1128_v24 = vpop.permute.xlu1 %1127  ;;  %v1165_v39 = vsel %vm5263_vm2, %v1160_v21, inf  ;;  %v1171_v29 = vsel %vm5265_vm1, %v1162_v13, inf  ;;  %vm5266_vm2 = vmmov %vm5265_vm1 }
0x13e5   :  { %v3597_v56 = vsel %vm31_vm0, %v1113_v53, %v1128_v24  ;;  %v1126_v42 = vpop.permute.xlu0 %1125  ;;  %1166 = vmin.xlane.f32.xlu0 %v1165_v39 }
0x13e6   :  { %v3601_v15 = vsel %vm31_vm0, %v1112_v38, %v1126_v42  ;;  %v1164_v0 = vsel %vm1159_vm13, %v3597_v56, 1e+10  ;;  %vm5267_vm13 = vmmov %vm5265_vm1 }
0x13e7   :  { %v1177_v41 = vsel %vm5264_vm15, %v1164_v0, inf  ;;  %v1163_v26 = vsel %vm1158_vm14, %v3601_v15, 1e+10  ;;  %vm5269_vm14 = vmmov %vm5265_vm1 }
0x13e8   :  { %1178 = vmin.xlane.f32.xlu1 %v1177_v41  ;;  %v1174_v48 = vsel %vm5266_vm2, %v1163_v26, inf }
0x13e9   :  { %1172 = vmin.xlane.f32.xlu0 %v1171_v29 }
0x13ed   :  { %1175 = vmin.xlane.f32.xlu0 %v1174_v48 }
0x1469   :  { %v3610_v4 = vpop.xlane.xlu1 %1169 }
0x146a   :  { %vm1181_vm12 = vcmp.eq.f32.partialorder %v3578_v16, %v3610_v4 }
0x146b   :  { %v1186_v63 = vsel %vm1181_vm12, 1e+10, %v3286_v43  ;;  %vm5270_vm12 = vmmov %vm5267_vm13 }
0x146c   :  { %v1203_v25 = vsel %vm5267_vm13, %v1186_v63, inf }
0x146d   :  { %1204 = vmin.xlane.f32.xlu1 %v1203_v25 }
0x146e   :  { %v3616_v3 = vpop.xlane.xlu0 %1166 }
0x146f   :  { %vm1180_vm15 = vcmp.eq.f32.partialorder %v3588_v37, %v3616_v3 }
0x1470   :  { %v1185_v57 = vsel %vm1180_vm15, 1e+10, %v3291_v46  ;;  %vm5272_vm15 = vmmov %vm5270_vm12 }
0x1471   :  { %v3621_v31 = vpop.xlane.xlu1 %1178  ;;  %v1200_v2 = vsel %vm5269_vm14, %v1185_v57, inf  ;;  %vm5273_vm14 = vmmov %vm5270_vm12 }
0x1472   :  { %5268 = vst [vmem:[#allocation39_spill] sm:$0xff] %v3621_v31  ;;  %1201 = vmin.xlane.f32.xlu0 %v1200_v2  ;;  %v3624_v19 = vpop.xlane.xlu0 %1172  ;;  %vm1184_vm1 = vcmp.eq.f32.partialorder %v3597_v56, %v3621_v31 }
0x1473   :  { %vm1182_vm2 = vcmp.eq.f32.partialorder %v3585_v40, %v3624_v19  ;;  %v1189_v46 = vsel %vm1184_vm1, 1e+10, %v3301_v5 }
0x1474   :  { %v1187_v43 = vsel %vm1182_vm2, 1e+10, %v3296_v22  ;;  %v1212_v35 = vsel %vm5273_vm14, %v1189_v46, inf  ;;  %vm5275_vm14 = vmmov %vm5270_vm12 }
0x1475   :  { %v1206_v58 = vsel %vm5270_vm12, %v1187_v43, inf }
0x1476   :  { %1207 = vmin.xlane.f32.xlu0 %v1206_v58  ;;  %v3632_v34 = vpop.xlane.xlu0 %1175 }
0x1477   :  { %5271 = vst [vmem:[#allocation40_spill] sm:$0xff] %v3632_v34  ;;  %vm1183_vm13 = vcmp.eq.f32.partialorder %v3601_v15, %v3632_v34 }
0x1478   :  { %v1188_v7 = vsel %vm1183_vm13, 1e+10, %v3304_v8  ;;  %vm5274_vm13 = vmmov %vm5270_vm12 }
0x1479   :  { %v1209_v51 = vsel %vm5272_vm15, %v1188_v7, inf }
0x147a   :  { %1210 = vmin.xlane.f32.xlu1 %v1209_v51  ;;  %1213 = vmin.xlane.f32.xlu0 %v1212_v35 }
0x14f6   :  { %v3640_v47 = vpop.xlane.xlu1 %1204 }
0x14f7   :  { %vm1216_vm2 = vcmp.le.f32.partialorder %v1186_v63, %v3640_v47 }
0x14f8   :  { %v1221_v22 = vsel %vm1216_vm2, %v3578_v16, 1e+10 }
0x14f9   :  { %v1228_v61 = vsel %vm5270_vm12, %v1221_v22, inf }
0x14fa   :  { %1229 = vmin.xlane.f32.xlu0 %v1228_v61 }
0x14fb   :  { %v3645_v5 = vpop.xlane.xlu0 %1201 }
0x14fc   :  { %vm1215_vm1 = vcmp.le.f32.partialorder %v1185_v57, %v3645_v5 }
0x14fd   :  { %v1220_v8 = vsel %vm1215_vm1, %v3588_v37, 1e+10  ;;  %vm5278_vm1 = vmmov %vm5274_vm13 }
0x14fe   :  { %v1225_v32 = vsel %vm5274_vm13, %v1220_v8, inf  ;;  %vm5279_vm13 = vmmov %vm5278_vm1 }
0x14ff   :  { %v3650_v50 = vpop.xlane.xlu0 %1207  ;;  %1226 = vmin.xlane.f32.xlu1 %v1225_v32 }
0x1500   :  { %vm1217_vm15 = vcmp.le.f32.partialorder %v1187_v43, %v3650_v50 }
0x1501   :  { %v1222_v18 = vsel %vm1217_vm15, %v3585_v40, 1e+10 }
0x1502   :  { %v1231_v36 = vsel %vm5275_vm14, %v1222_v18, inf  ;;  %vm5280_vm14 = vmmov %vm5278_vm1 }
0x1503   :  { %1232 = vmin.xlane.f32.xlu1 %v1231_v36  ;;  %v3655_v52 = vpop.xlane.xlu0 %1213  ;;  %v3657_v28 = vpop.xlane.xlu1 %1210 }
0x1504   :  { %5276 = vst [vmem:[#allocation68_spill] sm:$0xff] %v3655_v52  ;;  %5277 = vst [vmem:[#allocation101_spill] sm:$0xff] %v3657_v28  ;;  %vm1219_vm2 = vcmp.le.f32.partialorder %v1189_v46, %v3655_v52  ;;  %vm1218_vm12 = vcmp.le.f32.partialorder %v1188_v7, %v3657_v28 }
0x1505   :  { %v1224_v6 = vsel %vm1219_vm2, %v3597_v56, 1e+10  ;;  %v1223_v54 = vsel %vm1218_vm12, %v3601_v15, 1e+10  ;;  %vm5281_vm12 = vmmov %vm5278_vm1 }
0x1506   :  { %v1237_v1 = vsel %vm5278_vm1, %v1224_v6, inf  ;;  %v1234_v30 = vsel %vm5279_vm13, %v1223_v54, inf  ;;  %vm5282_vm13 = vmmov %vm5281_vm12 }
0x1507   :  { %1238 = vmin.xlane.f32.xlu1 %v1237_v1  ;;  %1235 = vmin.xlane.f32.xlu0 %v1234_v30 }
0x1583   :  { %v3665_v55 = vpop.xlane.xlu0 %1229 }
0x1584   :  { %vm1241_vm15 = vcmp.eq.f32.partialorder %v3578_v16, %v3665_v55 }
0x1585   :  { %v1246_v45 = vsel %vm1241_vm15, 1e+10, %v1186_v63 }
0x1586   :  { %v1263_v14 = vsel %vm5280_vm14, %v1246_v45, inf }
0x1587   :  { %1264 = vmin.xlane.f32.xlu1 %v1263_v14 }
0x1588   :  { %v3670_v59 = vpop.xlane.xlu1 %1226 }
0x1589   :  { %vm1240_vm2 = vcmp.eq.f32.partialorder %v3588_v37, %v3670_v59 }
0x158a   :  { %v1245_v33 = vsel %vm1240_vm2, 1e+10, %v1185_v57  ;;  %vm5285_vm2 = vmmov %vm5281_vm12 }
0x158b   :  { %v1260_v9 = vsel %vm5281_vm12, %v1245_v33, inf  ;;  %vm5286_vm12 = vmmov %vm5285_vm2 }
0x158c   :  { %1261 = vmin.xlane.f32.xlu0 %v1260_v9  ;;  %v3675_v23 = vpop.xlane.xlu1 %1232 }
0x158d   :  { %vm1242_vm1 = vcmp.eq.f32.partialorder %v3585_v40, %v3675_v23 }
0x158e   :  { %v1247_v60 = vsel %vm1242_vm1, 1e+10, %v1187_v43 }
0x158f   :  { %v1266_v11 = vsel %vm5282_vm13, %v1247_v60, inf  ;;  %vm5287_vm13 = vmmov %vm5285_vm2 }
0x1590   :  { %v3680_v17 = vpop.xlane.xlu0 %1235  ;;  %1267 = vmin.xlane.f32.xlu0 %v1266_v11  ;;  %v3682_v44 = vpop.xlane.xlu1 %1238 }
0x1591   :  { %5283 = vst [vmem:[#allocation46_spill] sm:$0xff] %v3680_v17  ;;  %5284 = vst [vmem:[#allocation47_spill] sm:$0xff] %v3682_v44  ;;  %vm1243_vm15 = vcmp.eq.f32.partialorder %v3601_v15, %v3680_v17  ;;  %vm1244_vm14 = vcmp.eq.f32.partialorder %v3597_v56, %v3682_v44 }
0x1592   :  { %v1248_v53 = vsel %vm1243_vm15, 1e+10, %v1188_v7  ;;  %v1249_v38 = vsel %vm1244_vm14, 1e+10, %v1189_v46  ;;  %vm5288_vm14 = vmmov %vm5285_vm2 }
0x1593   :  { %v1269_v21 = vsel %vm5285_vm2, %v1248_v53, inf  ;;  %v1272_v24 = vsel %vm5286_vm12, %v1249_v38, inf }
0x1594   :  { %1270 = vmin.xlane.f32.xlu1 %v1269_v21  ;;  %1273 = vmin.xlane.f32.xlu0 %v1272_v24 }
0x1610   :  { %v3690_v39 = vpop.xlane.xlu1 %1264 }
0x1611   :  { %vm1276_vm1 = vcmp.le.f32.partialorder %v1246_v45, %v3690_v39 }
0x1612   :  { %v1281_v42 = vsel %vm1276_vm1, %v3578_v16, 1e+10 }
0x1613   :  { %v1288_v13 = vsel %vm5287_vm13, %v1281_v42, inf }
0x1614   :  { %1289 = vmin.xlane.f32.xlu0 %v1288_v13 }
0x1615   :  { %v3695_v0 = vpop.xlane.xlu0 %1261 }
0x1616   :  { %vm1275_vm15 = vcmp.le.f32.partialorder %v1245_v33, %v3695_v0 }
0x1617   :  { %v1280_v41 = vsel %vm1275_vm15, %v3588_v37, 1e+10  ;;  %vm5291_vm15 = vmmov %vm5286_vm12 }
0x1618   :  { %v1285_v29 = vsel %vm5288_vm14, %v1280_v41, inf  ;;  %vm5292_vm14 = vmmov %vm5286_vm12 }
0x1619   :  { %1286 = vmin.xlane.f32.xlu1 %v1285_v29  ;;  %v3700_v26 = vpop.xlane.xlu0 %1267 }
0x161a   :  { %vm1277_vm2 = vcmp.le.f32.partialorder %v1247_v60, %v3700_v26 }
0x161b   :  { %v1282_v48 = vsel %vm1277_vm2, %v3585_v40, 1e+10 }
0x161c   :  { %v1291_v63 = vsel %vm5286_vm12, %v1282_v48, inf }
0x161d   :  { %1292 = vmin.xlane.f32.xlu1 %v1291_v63  ;;  %v3705_v25 = vpop.xlane.xlu0 %1273  ;;  %v3707_v57 = vpop.xlane.xlu1 %1270 }
0x161e   :  { %5289 = vst [vmem:[#allocation76_spill] sm:$0xff] %v3705_v25  ;;  %5290 = vst [vmem:[#allocation110_spill] sm:$0xff] %v3707_v57  ;;  %vm1279_vm1 = vcmp.le.f32.partialorder %v1249_v38, %v3705_v25  ;;  %vm1278_vm13 = vcmp.le.f32.partialorder %v1248_v53, %v3707_v57 }
0x161f   :  { %v1284_v2 = vsel %vm1279_vm1, %v3597_v56, 1e+10  ;;  %v1283_v43 = vsel %vm1278_vm13, %v3601_v15, 1e+10  ;;  %vm5293_vm13 = vmmov %vm5286_vm12 }
0x1620   :  { %v1297_v58 = vsel %vm5291_vm15, %v1284_v2, inf  ;;  %v1294_v46 = vsel %vm5292_vm14, %v1283_v43, inf  ;;  %vm5294_vm14 = vmmov %vm5286_vm12 }
0x1621   :  { %1298 = vmin.xlane.f32.xlu1 %v1297_v58  ;;  %1295 = vmin.xlane.f32.xlu0 %v1294_v46 }
0x169d   :  { %v3715_v7 = vpop.xlane.xlu0 %1289 }
0x169e   :  { %vm1301_vm2 = vcmp.eq.f32.partialorder %v3578_v16, %v3715_v7 }
0x169f   :  { %v1306_v51 = vsel %vm1301_vm2, 1e+10, %v1246_v45 }
0x16a0   :  { %v1323_v35 = vsel %vm5286_vm12, %v1306_v51, inf }
0x16a1   :  { %1324 = vmin.xlane.f32.xlu1 %v1323_v35 }
0x16a2   :  { %v3720_v22 = vpop.xlane.xlu1 %1286 }
0x16a3   :  { %vm1300_vm1 = vcmp.eq.f32.partialorder %v3588_v37, %v3720_v22 }
0x16a4   :  { %v1305_v61 = vsel %vm1300_vm1, 1e+10, %v1245_v33  ;;  %vm5297_vm1 = vmmov %vm5293_vm13 }
0x16a5   :  { %v1320_v8 = vsel %vm5293_vm13, %v1305_v61, inf  ;;  %vm5298_vm13 = vmmov %vm5297_vm1 }
0x16a6   :  { %1321 = vmin.xlane.f32.xlu0 %v1320_v8  ;;  %v3725_v32 = vpop.xlane.xlu1 %1292 }
0x16a7   :  { %vm1302_vm15 = vcmp.eq.f32.partialorder %v3585_v40, %v3725_v32 }
0x16a8   :  { %v1307_v18 = vsel %vm1302_vm15, 1e+10, %v1247_v60 }
0x16a9   :  { %v1326_v36 = vsel %vm5294_vm14, %v1307_v18, inf  ;;  %vm5299_vm14 = vmmov %vm5297_vm1 }
0x16aa   :  { %v3730_v6 = vpop.xlane.xlu0 %1295  ;;  %1327 = vmin.xlane.f32.xlu0 %v1326_v36  ;;  %v3732_v54 = vpop.xlane.xlu1 %1298 }
0x16ab   :  { %5295 = vst [vmem:[#allocation53_spill] sm:$0xff] %v3730_v6  ;;  %5296 = vst [vmem:[#allocation54_spill] sm:$0xff] %v3732_v54  ;;  %vm1303_vm2 = vcmp.eq.f32.partialorder %v3601_v15, %v3730_v6  ;;  %vm1304_vm12 = vcmp.eq.f32.partialorder %v3597_v56, %v3732_v54 }
0x16ac   :  { %v1308_v1 = vsel %vm1303_vm2, 1e+10, %v1248_v53  ;;  %v1309_v30 = vsel %vm1304_vm12, 1e+10, %v1249_v38  ;;  %vm5300_vm12 = vmmov %vm5297_vm1 }
0x16ad   :  { %v1329_v45 = vsel %vm5297_vm1, %v1308_v1, inf  ;;  %v1332_v14 = vsel %vm5298_vm13, %v1309_v30, inf  ;;  %vm5301_vm13 = vmmov %vm5300_vm12 }
0x16ae   :  { %1330 = vmin.xlane.f32.xlu1 %v1329_v45  ;;  %1333 = vmin.xlane.f32.xlu0 %v1332_v14 }
0x172a   :  { %v3740_v33 = vpop.xlane.xlu1 %1324 }
0x172b   :  { %vm1336_vm15 = vcmp.le.f32.partialorder %v1306_v51, %v3740_v33 }
0x172c   :  { %v1341_v9 = vsel %vm1336_vm15, %v3578_v16, 1e+10 }
0x172d   :  { %v1348_v60 = vsel %vm5299_vm14, %v1341_v9, inf }
0x172e   :  { %1349 = vmin.xlane.f32.xlu0 %v1348_v60 }
0x172f   :  { %v3745_v11 = vpop.xlane.xlu0 %1321 }
0x1730   :  { %vm1335_vm2 = vcmp.le.f32.partialorder %v1305_v61, %v3745_v11 }
0x1731   :  { %v1340_v53 = vsel %vm1335_vm2, %v3588_v37, 1e+10  ;;  %vm5304_vm2 = vmmov %vm5300_vm12 }
0x1732   :  { %v1345_v38 = vsel %vm5300_vm12, %v1340_v53, inf  ;;  %vm5305_vm12 = vmmov %vm5304_vm2 }
0x1733   :  { %1346 = vmin.xlane.f32.xlu1 %v1345_v38  ;;  %v3750_v21 = vpop.xlane.xlu0 %1327 }
0x1734   :  { %vm1337_vm1 = vcmp.le.f32.partialorder %v1307_v18, %v3750_v21 }
0x1735   :  { %v1342_v24 = vsel %vm1337_vm1, %v3585_v40, 1e+10 }
0x1736   :  { %v1351_v42 = vsel %vm5301_vm13, %v1342_v24, inf  ;;  %vm5306_vm13 = vmmov %vm5304_vm2 }
0x1737   :  { %1352 = vmin.xlane.f32.xlu1 %v1351_v42  ;;  %v3755_v13 = vpop.xlane.xlu0 %1333  ;;  %v3757_v41 = vpop.xlane.xlu1 %1330 }
0x1738   :  { %5302 = vst [vmem:[#allocation84_spill] sm:$0xff] %v3755_v13  ;;  %5303 = vst [vmem:[#allocation61_spill] sm:$0xff] %v3757_v41  ;;  %vm1339_vm15 = vcmp.le.f32.partialorder %v1309_v30, %v3755_v13  ;;  %vm1338_vm14 = vcmp.le.f32.partialorder %v1308_v1, %v3757_v41 }
0x1739   :  { %v1344_v29 = vsel %vm1339_vm15, %v3597_v56, 1e+10  ;;  %v1343_v48 = vsel %vm1338_vm14, %v3601_v15, 1e+10  ;;  %vm5307_vm14 = vmmov %vm5304_vm2 }
0x173a   :  { %v1357_v63 = vsel %vm5304_vm2, %v1344_v29, inf  ;;  %v1354_v2 = vsel %vm5305_vm12, %v1343_v48, inf }
0x173b   :  { %1358 = vmin.xlane.f32.xlu1 %v1357_v63  ;;  %1355 = vmin.xlane.f32.xlu0 %v1354_v2 }
0x17b7   :  { %v3765_v43 = vpop.xlane.xlu0 %1349 }
0x17b8   :  { %vm1361_vm1 = vcmp.eq.f32.partialorder %v3578_v16, %v3765_v43 }
0x17b9   :  { %v1366_v58 = vsel %vm1361_vm1, 1e+10, %v1306_v51 }
0x17ba   :  { %v1383_v46 = vsel %vm5306_vm13, %v1366_v58, inf }
0x17bb   :  { %1384 = vmin.xlane.f32.xlu1 %v1383_v46 }
0x17bc   :  { %v3770_v35 = vpop.xlane.xlu1 %1346 }
0x17bd   :  { %vm1360_vm15 = vcmp.eq.f32.partialorder %v3588_v37, %v3770_v35 }
0x17be   :  { %v1365_v8 = vsel %vm1360_vm15, 1e+10, %v1305_v61  ;;  %vm5310_vm15 = vmmov %vm5305_vm12 }
0x17bf   :  { %v1380_v36 = vsel %vm5307_vm14, %v1365_v8, inf  ;;  %vm5311_vm14 = vmmov %vm5305_vm12 }
0x17c0   :  { %1381 = vmin.xlane.f32.xlu0 %v1380_v36  ;;  %v3775_v45 = vpop.xlane.xlu1 %1352 }
0x17c1   :  { %vm1362_vm2 = vcmp.eq.f32.partialorder %v3585_v40, %v3775_v45 }
0x17c2   :  { %v1367_v14 = vsel %vm1362_vm2, 1e+10, %v1307_v18 }
0x17c3   :  { %v1386_v51 = vsel %vm5305_vm12, %v1367_v14, inf }
0x17c4   :  { %v3780_v9 = vpop.xlane.xlu0 %1355  ;;  %1387 = vmin.xlane.f32.xlu0 %v1386_v51  ;;  %v3782_v60 = vpop.xlane.xlu1 %1358 }
0x17c5   :  { %5308 = vst [vmem:[#allocation62_spill] sm:$0xff] %v3780_v9  ;;  %5309 = vst [vmem:[#allocation93_spill] sm:$0xff] %v3782_v60  ;;  %vm1363_vm1 = vcmp.eq.f32.partialorder %v3601_v15, %v3780_v9  ;;  %vm1364_vm13 = vcmp.eq.f32.partialorder %v3597_v56, %v3782_v60 }
0x17c6   :  { %v1368_v61 = vsel %vm1363_vm1, 1e+10, %v1308_v1  ;;  %v1369_v53 = vsel %vm1364_vm13, 1e+10, %v1309_v30  ;;  %vm5312_vm13 = vmmov %vm5305_vm12 }
0x17c7   :  { %v1389_v38 = vsel %vm5310_vm15, %v1368_v61, inf  ;;  %v1392_v24 = vsel %vm5311_vm14, %v1369_v53, inf  ;;  %vm5313_vm14 = vmmov %vm5305_vm12 }
0x17c8   :  { %1390 = vmin.xlane.f32.xlu1 %v1389_v38  ;;  %1393 = vmin.xlane.f32.xlu0 %v1392_v24 }
0x1844   :  { %v3790_v18 = vpop.xlane.xlu1 %1384 }
0x1845   :  { %vm1396_vm2 = vcmp.le.f32.partialorder %v1366_v58, %v3790_v18 }
0x1846   :  { %v1401_v42 = vsel %vm1396_vm2, %v3578_v16, 1e+10 }
0x1847   :  { %v1408_v29 = vsel %vm5305_vm12, %v1401_v42, inf }
0x1848   :  { %1409 = vmin.xlane.f32.xlu0 %v1408_v29 }
0x1849   :  { %v3795_v48 = vpop.xlane.xlu0 %1381 }
0x184a   :  { %vm1395_vm1 = vcmp.le.f32.partialorder %v1365_v8, %v3795_v48 }
0x184b   :  { %v1400_v1 = vsel %vm1395_vm1, %v3588_v37, 1e+10  ;;  %vm5316_vm1 = vmmov %vm5312_vm13 }
0x184c   :  { %v1405_v30 = vsel %vm5312_vm13, %v1400_v1, inf  ;;  %vm5317_vm13 = vmmov %vm5316_vm1 }
0x184d   :  { %1406 = vmin.xlane.f32.xlu1 %v1405_v30  ;;  %v3800_v63 = vpop.xlane.xlu0 %1387 }
0x184e   :  { %vm1397_vm15 = vcmp.le.f32.partialorder %v1367_v14, %v3800_v63 }
0x184f   :  { %v1402_v2 = vsel %vm1397_vm15, %v3585_v40, 1e+10 }
0x1850   :  { %v1411_v46 = vsel %vm5313_vm14, %v1402_v2, inf  ;;  %vm5318_vm14 = vmmov %vm5316_vm1 }
0x1851   :  { %1412 = vmin.xlane.f32.xlu1 %v1411_v46  ;;  %v3805_v36 = vpop.xlane.xlu0 %1393  ;;  %v3807_v51 = vpop.xlane.xlu1 %1390 }
0x1852   :  { %5314 = vst [vmem:[#allocation69_spill] sm:$0xff] %v3805_v36  ;;  %5315 = vst [vmem:[#allocation70_spill] sm:$0xff] %v3807_v51  ;;  %vm1399_vm2 = vcmp.le.f32.partialorder %v1369_v53, %v3805_v36  ;;  %vm1398_vm12 = vcmp.le.f32.partialorder %v1368_v61, %v3807_v51 }
0x1853   :  { %v1404_v38 = vsel %vm1399_vm2, %v3597_v56, 1e+10  ;;  %v1403_v24 = vsel %vm1398_vm12, %v3601_v15, 1e+10  ;;  %vm5319_vm12 = vmmov %vm5316_vm1 }
0x1854   :  { %v1417_v42 = vsel %vm5316_vm1, %v1404_v38, inf  ;;  %v1414_v29 = vsel %vm5317_vm13, %v1403_v24, inf  ;;  %vm5320_vm13 = vmmov %vm5319_vm12 }
0x1855   :  { %1418 = vmin.xlane.f32.xlu1 %v1417_v42  ;;  %1415 = vmin.xlane.f32.xlu0 %v1414_v29 }
0x18d1   :  { %v3815_v1 = vpop.xlane.xlu0 %1409 }
0x18d2   :  { %vm1421_vm15 = vcmp.eq.f32.partialorder %v3578_v16, %v3815_v1 }
0x18d3   :  { %v1426_v30 = vsel %vm1421_vm15, 1e+10, %v1366_v58 }
0x18d4   :  { %v1443_v2 = vsel %vm5318_vm14, %v1426_v30, inf }
0x18d5   :  { %1444 = vmin.xlane.f32.xlu1 %v1443_v2 }
0x18d6   :  { %v3820_v46 = vpop.xlane.xlu1 %1406 }
0x18d7   :  { %vm1420_vm2 = vcmp.eq.f32.partialorder %v3588_v37, %v3820_v46 }
0x18d8   :  { %v1425_v60 = vsel %vm1420_vm2, 1e+10, %v1365_v8  ;;  %vm5323_vm2 = vmmov %vm5319_vm12 }
0x18d9   :  { %v1440_v38 = vsel %vm5319_vm12, %v1425_v60, inf  ;;  %vm5324_vm12 = vmmov %vm5323_vm2 }
0x18da   :  { %1441 = vmin.xlane.f32.xlu0 %v1440_v38  ;;  %v3825_v24 = vpop.xlane.xlu1 %1412 }
0x18db   :  { %vm1422_vm1 = vcmp.eq.f32.partialorder %v3585_v40, %v3825_v24 }
0x18dc   :  { %v1427_v42 = vsel %vm1422_vm1, 1e+10, %v1367_v14 }
0x18dd   :  { %v1446_v58 = vsel %vm5320_vm13, %v1427_v42, inf  ;;  %vm5325_vm13 = vmmov %vm5323_vm2 }
0x18de   :  { %v3830_v29 = vpop.xlane.xlu0 %1415  ;;  %1447 = vmin.xlane.f32.xlu0 %v1446_v58  ;;  %v3832_v2 = vpop.xlane.xlu1 %1418 }
0x18df   :  { %5321 = vst [vmem:[#allocation102_spill] sm:$0xff] %v3830_v29  ;;  %5322 = vst [vmem:[#allocation77_spill] sm:$0xff] %v3832_v2  ;;  %vm1423_vm15 = vcmp.eq.f32.partialorder %v3601_v15, %v3830_v29  ;;  %vm1424_vm14 = vcmp.eq.f32.partialorder %v3597_v56, %v3832_v2 }
0x18e0   :  { %v1428_v8 = vsel %vm1423_vm15, 1e+10, %v1368_v61  ;;  %v1429_v38 = vsel %vm1424_vm14, 1e+10, %v1369_v53  ;;  %vm5327_vm14 = vmmov %vm5323_vm2 }
0x18e1   :  { %v1449_v9 = vsel %vm5323_vm2, %v1428_v8, inf  ;;  %v1452_v54 = vsel %vm5324_vm12, %v1429_v38, inf }
0x18e2   :  { %1450 = vmin.xlane.f32.xlu1 %v1449_v9  ;;  %1453 = vmin.xlane.f32.xlu0 %v1452_v54 }
0x195e   :  { %v3840_v14 = vpop.xlane.xlu1 %1444 }
0x195f   :  { %vm1456_vm1 = vcmp.le.f32.partialorder %v1426_v30, %v3840_v14 }
0x1960   :  { %v1461_v58 = vsel %vm1456_vm1, %v3578_v16, 1e+10 }
0x1961   :  { %v1468_v6 = vsel %vm5325_vm13, %v1461_v58, inf }
0x1962   :  { %1469 = vmin.xlane.f32.xlu0 %v1468_v6 }
0x1963   :  { %v3845_v29 = vpop.xlane.xlu0 %1441 }
0x1964   :  { %5326 = vst [vmem:[#allocation78_spill] sm:$0xff] %v3845_v29  ;;  %vm1455_vm15 = vcmp.le.f32.partialorder %v1425_v60, %v3845_v29 }
0x1965   :  { %v1460_v61 = vsel %vm1455_vm15, %v3588_v37, 1e+10  ;;  %vm5330_vm15 = vmmov %vm5324_vm12 }
0x1966   :  { %v1465_v53 = vsel %vm5327_vm14, %v1460_v61, inf  ;;  %vm5331_vm14 = vmmov %vm5324_vm12 }
0x1967   :  { %1466 = vmin.xlane.f32.xlu1 %v1465_v53  ;;  %v3850_v9 = vpop.xlane.xlu0 %1447 }
0x1968   :  { %vm1457_vm2 = vcmp.le.f32.partialorder %v1427_v42, %v3850_v9 }
0x1969   :  { %v1462_v54 = vsel %vm1457_vm2, %v3585_v40, 1e+10 }
0x196a   :  { %v1471_v2 = vsel %vm5324_vm12, %v1462_v54, inf }
0x196b   :  { %1472 = vmin.xlane.f32.xlu1 %v1471_v2  ;;  %v3855_v58 = vpop.xlane.xlu0 %1453  ;;  %v3857_v6 = vpop.xlane.xlu1 %1450 }
0x196c   :  { %5328 = vst [vmem:[#allocation111_spill] sm:$0xff] %v3855_v58  ;;  %5329 = vst [vmem:[#allocation85_spill] sm:$0xff] %v3857_v6  ;;  %vm1459_vm1 = vcmp.le.f32.partialorder %v1429_v38, %v3855_v58  ;;  %vm1458_vm13 = vcmp.le.f32.partialorder %v1428_v8, %v3857_v6 }
0x196d   :  { %v1464_v61 = vsel %vm1459_vm1, %v3597_v56, 1e+10  ;;  %v1463_v53 = vsel %vm1458_vm13, %v3601_v15, 1e+10  ;;  %vm5332_vm13 = vmmov %vm5324_vm12 }
0x196e   :  { %v1477_v44 = vsel %vm5330_vm15, %v1464_v61, inf  ;;  %v1474_v17 = vsel %vm5331_vm14, %v1463_v53, inf  ;;  %vm5333_vm14 = vmmov %vm5324_vm12 }
0x196f   :  { %1478 = vmin.xlane.f32.xlu1 %v1477_v44  ;;  %1475 = vmin.xlane.f32.xlu0 %v1474_v17 }
0x19eb   :  { %v3865_v54 = vpop.xlane.xlu0 %1469 }
0x19ec   :  { %vm1481_vm2 = vcmp.eq.f32.partialorder %v3578_v16, %v3865_v54 }
0x19ed   :  { %v1486_v2 = vsel %vm1481_vm2, 1e+10, %v1426_v30 }
0x19ee   :  { %v1503_v34 = vsel %vm5324_vm12, %v1486_v2, inf }
0x19ef   :  { %1504 = vmin.xlane.f32.xlu1 %v1503_v34 }
0x19f0   :  { %v3870_v31 = vpop.xlane.xlu1 %1466 }
0x19f1   :  { %vm1480_vm1 = vcmp.eq.f32.partialorder %v3588_v37, %v3870_v31 }
0x19f2   :  { %v1485_v6 = vsel %vm1480_vm1, 1e+10, %v1425_v60  ;;  %vm5336_vm1 = vmmov %vm5332_vm13 }
0x19f3   :  { %v1500_v61 = vsel %vm5332_vm13, %v1485_v6, inf  ;;  %vm5337_vm13 = vmmov %vm5336_vm1 }
0x19f4   :  { %1501 = vmin.xlane.f32.xlu0 %v1500_v61  ;;  %v3875_v44 = vpop.xlane.xlu1 %1472 }
0x19f5   :  { %vm1482_vm15 = vcmp.eq.f32.partialorder %v3585_v40, %v3875_v44 }
0x19f6   :  { %v1487_v17 = vsel %vm1482_vm15, 1e+10, %v1427_v42 }
0x19f7   :  { %v1506_v30 = vsel %vm5333_vm14, %v1487_v17, inf  ;;  %vm5338_vm14 = vmmov %vm5336_vm1 }
0x19f8   :  { %v3880_v53 = vpop.xlane.xlu0 %1475  ;;  %1507 = vmin.xlane.f32.xlu0 %v1506_v30  ;;  %v3882_v34 = vpop.xlane.xlu1 %1478 }
0x19f9   :  { %5334 = vst [vmem:[#allocation86_spill] sm:$0xff] %v3880_v53  ;;  %5335 = vst [vmem:[#allocation94_spill] sm:$0xff] %v3882_v34  ;;  %vm1483_vm2 = vcmp.eq.f32.partialorder %v3601_v15, %v3880_v53  ;;  %vm1484_vm12 = vcmp.eq.f32.partialorder %v3597_v56, %v3882_v34 }
0x19fa   :  { %v1488_v60 = vsel %vm1483_vm2, 1e+10, %v1428_v8  ;;  %v1489_v61 = vsel %vm1484_vm12, 1e+10, %v1429_v38  ;;  %vm5340_vm12 = vmmov %vm5336_vm1 }
0x19fb   :  { %v1509_v58 = vsel %vm5336_vm1, %v1488_v60, inf  ;;  %v1512_v51 = vsel %vm5337_vm13, %v1489_v61, inf  ;;  %vm5341_vm13 = vmmov %vm5340_vm12 }
0x19fc   :  { %1510 = vmin.xlane.f32.xlu1 %v1509_v58  ;;  %1513 = vmin.xlane.f32.xlu0 %v1512_v51 }
0x1a78   :  { %v3890_v42 = vpop.xlane.xlu1 %1504 }
0x1a79   :  { %vm1516_vm15 = vcmp.le.f32.partialorder %v1486_v2, %v3890_v42 }
0x1a7a   :  { %v1521_v30 = vsel %vm1516_vm15, %v3578_v16, 1e+10 }
0x1a7b   :  { %v1528_v36 = vsel %vm5338_vm14, %v1521_v30, inf }
0x1a7c   :  { %1529 = vmin.xlane.f32.xlu0 %v1528_v36 }
0x1a7d   :  { %v3895_v53 = vpop.xlane.xlu0 %1501 }
0x1a7e   :  { %5339 = vst [vmem:[#allocation95_spill] sm:$0xff] %v3895_v53  ;;  %vm1515_vm2 = vcmp.le.f32.partialorder %v1485_v6, %v3895_v53 }
0x1a7f   :  { %v1520_v8 = vsel %vm1515_vm2, %v3588_v37, 1e+10  ;;  %vm5344_vm2 = vmmov %vm5340_vm12 }
0x1a80   :  { %v1525_v38 = vsel %vm5340_vm12, %v1520_v8, inf  ;;  %vm5345_vm12 = vmmov %vm5344_vm2 }
0x1a81   :  { %1526 = vmin.xlane.f32.xlu1 %v1525_v38  ;;  %v3900_v58 = vpop.xlane.xlu0 %1507 }
0x1a82   :  { %vm1517_vm1 = vcmp.le.f32.partialorder %v1487_v17, %v3900_v58 }
0x1a83   :  { %v1522_v51 = vsel %vm1517_vm1, %v3585_v40, 1e+10 }
0x1a84   :  { %v1531_v34 = vsel %vm5341_vm13, %v1522_v51, inf  ;;  %vm5346_vm13 = vmmov %vm5344_vm2 }
0x1a85   :  { %1532 = vmin.xlane.f32.xlu1 %v1531_v34  ;;  %v3905_v30 = vpop.xlane.xlu0 %1513  ;;  %v3907_v36 = vpop.xlane.xlu1 %1510 }
0x1a86   :  { %5342 = vst [vmem:[#allocation103_spill] sm:$0xff] %v3905_v30  ;;  %5343 = vst [vmem:[#allocation104_spill] sm:$0xff] %v3907_v36  ;;  %vm1519_vm15 = vcmp.le.f32.partialorder %v1489_v61, %v3905_v30  ;;  %vm1518_vm14 = vcmp.le.f32.partialorder %v1488_v60, %v3907_v36 }
0x1a87   :  { %v1524_v8 = vsel %vm1519_vm15, %v3597_v56, 1e+10  ;;  %v1523_v38 = vsel %vm1518_vm14, %v3601_v15, 1e+10  ;;  %vm5347_vm14 = vmmov %vm5344_vm2 }
0x1a88   :  { %v1537_v41 = vsel %vm5344_vm2, %v1524_v8, inf  ;;  %v1534_v13 = vsel %vm5345_vm12, %v1523_v38, inf }
0x1a89   :  { %1538 = vmin.xlane.f32.xlu1 %v1537_v41  ;;  %1535 = vmin.xlane.f32.xlu0 %v1534_v13 }
0x1b05   :  { %v3915_v51 = vpop.xlane.xlu0 %1529 }
0x1b06   :  { %vm1541_vm1 = vcmp.eq.f32.partialorder %v3578_v16, %v3915_v51 }
0x1b07   :  { %v1546_v34 = vsel %vm1541_vm1, 1e+10, %v1486_v2 }
0x1b08   :  { %v1563_v30 = vsel %vm5346_vm13, %v1546_v34, inf }
0x1b09   :  { %1564 = vmin.xlane.f32.xlu1 %v1563_v30 }
0x1b0a   :  { %v3920_v36 = vpop.xlane.xlu1 %1526 }
0x1b0b   :  { %vm1540_vm15 = vcmp.eq.f32.partialorder %v3588_v37, %v3920_v36 }
0x1b0c   :  { %v1545_v57 = vsel %vm1540_vm15, 1e+10, %v1485_v6  ;;  %vm5350_vm15 = vmmov %vm5345_vm12 }
0x1b0d   :  { %v1560_v8 = vsel %vm5347_vm14, %v1545_v57, inf  ;;  %vm5351_vm14 = vmmov %vm5345_vm12 }
0x1b0e   :  { %1561 = vmin.xlane.f32.xlu0 %v1560_v8  ;;  %v3925_v41 = vpop.xlane.xlu1 %1532 }
0x1b0f   :  { %vm1542_vm2 = vcmp.eq.f32.partialorder %v3585_v40, %v3925_v41 }
0x1b10   :  { %v1547_v13 = vsel %vm1542_vm2, 1e+10, %v1487_v17 }
0x1b11   :  { %v1566_v2 = vsel %vm5345_vm12, %v1547_v13, inf }
0x1b12   :  { %v3930_v38 = vpop.xlane.xlu0 %1535  ;;  %1567 = vmin.xlane.f32.xlu0 %v1566_v2  ;;  %v3932_v30 = vpop.xlane.xlu1 %1538 }
0x1b13   :  { %5348 = vst [vmem:[#allocation112_spill] sm:$0xff] %v3930_v38  ;;  %5349 = vst [vmem:[#allocation9_spill] sm:$0xff] %v3932_v30  ;;  %vm1543_vm1 = vcmp.eq.f32.partialorder %v3601_v15, %v3930_v38  ;;  %vm1544_vm13 = vcmp.eq.f32.partialorder %v3597_v56, %v3932_v30 }
0x1b14   :  { %v1548_v6 = vsel %vm1543_vm1, 1e+10, %v1488_v60  ;;  %v1549_v8 = vsel %vm1544_vm13, 1e+10, %v1489_v61  ;;  %vm5353_vm13 = vmmov %vm5345_vm12 }
0x1b15   :  { %v1569_v25 = vsel %vm5350_vm15, %v1548_v6, inf  ;;  %v1572_v28 = vsel %vm5351_vm14, %v1549_v8, inf  ;;  %vm5354_vm14 = vmmov %vm5345_vm12 }
0x1b16   :  { %1570 = vmin.xlane.f32.xlu1 %v1569_v25  ;;  %1573 = vmin.xlane.f32.xlu0 %v1572_v28 }
0x1b92   :  { %v3940_v17 = vpop.xlane.xlu1 %1564 }
0x1b93   :  { %vm1576_vm2 = vcmp.le.f32.partialorder %v1546_v34, %v3940_v17 }
0x1b94   :  { %v1581_v2 = vsel %vm1576_vm2, %v3578_v16, 1e+10 }
0x1b95   :  { %v1588_v52 = vsel %vm5345_vm12, %v1581_v2, inf }
0x1b96   :  { %1589 = vmin.xlane.f32.xlu0 %v1588_v52 }
0x1b97   :  { %v3945_v38 = vpop.xlane.xlu0 %1561 }
0x1b98   :  { %5352 = vst [vmem:[#allocation14_spill] sm:$0xff] %v3945_v38  ;;  %vm1575_vm1 = vcmp.le.f32.partialorder %v1545_v57, %v3945_v38 }
0x1b99   :  { %v1580_v60 = vsel %vm1575_vm1, %v3588_v37, 1e+10  ;;  %vm5357_vm1 = vmmov %vm5353_vm13 }
0x1b9a   :  { %v1585_v61 = vsel %vm5353_vm13, %v1580_v60, inf  ;;  %vm5358_vm13 = vmmov %vm5357_vm1 }
0x1b9b   :  { %1586 = vmin.xlane.f32.xlu1 %v1585_v61  ;;  %v1568_v25 = vpop.xlane.xlu0 %1567 }
0x1b9c   :  { %vm1577_vm15 = vcmp.le.f32.partialorder %v1547_v13, %v1568_v25 }
0x1b9d   :  { %v1582_v28 = vsel %vm1577_vm15, %v3585_v40, 1e+10 }
0x1b9e   :  { %v1591_v30 = vsel %vm5354_vm14, %v1582_v28, inf  ;;  %vm5359_vm14 = vmmov %vm5357_vm1 }
0x1b9f   :  { %1592 = vmin.xlane.f32.xlu1 %v1591_v30  ;;  %v3952_v49 = vpop.xlane.xlu0 %1573  ;;  %v3954_v2 = vpop.xlane.xlu1 %1570 }
0x1ba0   :  { %5355 = vst [vmem:[#allocation19_spill] sm:$0xff] %v3952_v49  ;;  %5356 = vst [vmem:[#allocation10_spill] sm:$0xff] %v3954_v2  ;;  %vm1579_vm2 = vcmp.le.f32.partialorder %v1549_v8, %v3952_v49  ;;  %vm1578_vm12 = vcmp.le.f32.partialorder %v1548_v6, %v3954_v2 }
0x1ba1   :  { %v1584_v52 = vsel %vm1579_vm2, %v3597_v56, 1e+10  ;;  %v1583_v60 = vsel %vm1578_vm12, %v3601_v15, 1e+10  ;;  %vm5360_vm12 = vmmov %vm5357_vm1 }
0x1ba2   :  { %v1597_v61 = vsel %vm5357_vm1, %v1584_v52, inf  ;;  %v1594_v20 = vsel %vm5358_vm13, %v1583_v60, inf  ;;  %vm5361_vm13 = vmmov %vm5360_vm12 }
0x1ba3   :  { %1598 = vmin.xlane.f32.xlu1 %v1597_v61  ;;  %1595 = vmin.xlane.f32.xlu0 %v1594_v20 }
0x1c1f   :  { %v3962_v28 = vpop.xlane.xlu0 %1589 }
0x1c20   :  { %vm1601_vm15 = vcmp.eq.f32.partialorder %v3578_v16, %v3962_v28 }
0x1c21   :  { %v3966_v30 = vsel %vm1601_vm15, 1e+10, %v1546_v34 }
0x1c22   :  { %v1623_v2 = vsel %vm5359_vm14, %v3966_v30, inf }
0x1c23   :  { %1624 = vmin.xlane.f32.xlu1 %v1623_v2 }
0x1c24   :  { %v3970_v49 = vpop.xlane.xlu1 %1586 }
0x1c25   :  { %vm1600_vm2 = vcmp.eq.f32.partialorder %v3588_v37, %v3970_v49 }
0x1c26   :  { %v3974_v52 = vsel %vm1600_vm2, 1e+10, %v1545_v57  ;;  %vm5364_vm2 = vmmov %vm5360_vm12 }
0x1c27   :  { %v1620_v20 = vsel %vm5360_vm12, %v3974_v52, inf  ;;  %vm5365_vm12 = vmmov %vm5364_vm2 }
0x1c28   :  { %1621 = vmin.xlane.f32.xlu0 %v1620_v20  ;;  %v3978_v60 = vpop.xlane.xlu1 %1592 }
0x1c29   :  { %vm1602_vm1 = vcmp.eq.f32.partialorder %v3585_v40, %v3978_v60 }
0x1c2a   :  { %v3982_v34 = vsel %vm1602_vm1, 1e+10, %v1547_v13 }
0x1c2b   :  { %v1626_v2 = vsel %vm5361_vm13, %v3982_v34, inf  ;;  %vm5366_vm13 = vcmp.eq.s32.totalorder %v2341_v27, 0 }
0x1c2c   :  { %v3986_v61 = vpop.xlane.xlu0 %1595  ;;  %1627 = vmin.xlane.f32.xlu0 %v1626_v2  ;;  %v3988_v38 = vpop.xlane.xlu1 %1598 }
0x1c2d   :  { %5362 = vst [vmem:[#allocation11_spill] sm:$0xff] %v3986_v61  ;;  %5363 = vst [vmem:[#allocation12_spill] sm:$0xff] %v3988_v38  ;;  %vm1603_vm15 = vcmp.eq.f32.partialorder %v3601_v15, %v3986_v61  ;;  %vm1604_vm14 = vcmp.eq.f32.partialorder %v3597_v56, %v3988_v38 }
0x1c2e   :  { %v3994_v57 = vsel %vm1603_vm15, 1e+10, %v1548_v6  ;;  %v3996_v20 = vsel %vm1604_vm14, 1e+10, %v1549_v8  ;;  %v1192_v6 = vsel %vm5366_vm13, %v3567_v10, 1e+10  ;;  %vm5368_vm14 = vmmov %vm5364_vm2 }
0x1c2f   :  { %v1629_v13 = vsel %vm5364_vm2, %v3994_v57, inf  ;;  %v1632_v53 = vsel %vm5365_vm12, %v3996_v20, inf  ;;  %vm5367_vm15 = vcmp.eq.s32.totalorder %v2341_v27, 1  ;;  %vm5369_vm13 = vmmov %vm5365_vm12 }
0x1c30   :  { %1630 = vmin.xlane.f32.xlu1 %v1629_v13  ;;  %1633 = vmin.xlane.f32.xlu0 %v1632_v53  ;;  %v1252_v38 = vsel %vm5367_vm15, %v3650_v50, %v1192_v6 }
0x1c31   :  { %v1312_v53 = vsel %vm363_vm3, %v3700_v26, %v1252_v38 }
0x1c32   :  { %v1372_v13 = vsel %vm414_vm4, %v3750_v21, %v1312_v53 }
0x1c33   :  { %v1432_v10 = vsel %vm465_vm5, %v3800_v63, %v1372_v13 }
0x1c34   :  { %v1492_v50 = vsel %vm516_vm6, %v3850_v9, %v1432_v10 }
0x1c35   :  { %v1552_v38 = vsel %vm567_vm7, %v3900_v58, %v1492_v50 }
0x1cac   :  { %v4002_v2 = vpop.xlane.xlu1 %1624 }
0x1cad   :  { %vm1636_vm1 = vcmp.le.f32.partialorder %v3966_v30, %v4002_v2 }
0x1cae   :  { %v1641_v8 = vsel %vm1636_vm1, %v3578_v16, 1e+10 }
0x1caf   :  { %v1648_v61 = vsel %vm5368_vm14, %v1641_v8, inf }
0x1cb0   :  { %1649 = vmin.xlane.f32.xlu0 %v1648_v61  ;;  %v1612_v61 = vsel %vm618_vm8, %v1568_v25, %v1552_v38 }
0x1cb1   :  { %v4020_v29 = vpop.xlane.xlu0 %1621 }
0x1cb2   :  { %vm1635_vm2 = vcmp.le.f32.partialorder %v3974_v52, %v4020_v29 }
0x1cb3   :  { %v1640_v26 = vsel %vm1635_vm2, %v3588_v37, 1e+10  ;;  %vm5370_vm2 = vmmov %vm5365_vm12 }
0x1cb4   :  { %v1645_v21 = vsel %vm5365_vm12, %v1640_v26, inf  ;;  %vm5371_vm12 = vmmov %vm5370_vm2 }
0x1cb5   :  { %1646 = vmin.xlane.f32.xlu1 %v1645_v21  ;;  %v1628_v63 = vpop.xlane.xlu0 %1627 }
0x1cb6   :  { %vm1637_vm1 = vcmp.le.f32.partialorder %v3982_v34, %v1628_v63  ;;  %v4040_v6 = vsel %vm669_vm9, %v1628_v63, %v1612_v61 }
0x1cb7   :  { %v1642_v9 = vsel %vm1637_vm1, %v3585_v40, 1e+10  ;;  %vm5372_vm1 = vcmp.eq.s32.totalorder %v2341_v27, 0 }
0x1cb8   :  { %v1651_v8 = vsel %vm5369_vm13, %v1642_v9, inf  ;;  %v1196_v26 = vsel %vm5372_vm1, %v3610_v4, 0.0  ;;  %vm5373_vm13 = vcmp.eq.s32.totalorder %v2341_v27, 1 }
0x1cb9   :  { %1652 = vmin.xlane.f32.xlu1 %v1651_v8  ;;  %v4044_v53 = vpop.xlane.xlu0 %1633  ;;  %v4046_v58 = vpop.xlane.xlu1 %1630  ;;  %v1256_v38 = vsel %vm5373_vm13, %v3665_v55, %v1196_v26 }
0x1cba   :  { %vm1639_vm15 = vcmp.le.f32.partialorder %v3996_v20, %v4044_v53  ;;  %vm1638_vm14 = vcmp.le.f32.partialorder %v3994_v57, %v4046_v58  ;;  %v1316_v21 = vsel %vm363_vm3, %v3715_v7, %v1256_v38 }
0x1cbb   :  { %v1644_v25 = vsel %vm1639_vm15, %v3597_v56, 1e+10  ;;  %v1643_v13 = vsel %vm1638_vm14, %v3601_v15, 1e+10  ;;  %v1376_v61 = vsel %vm414_vm4, %v3765_v43, %v1316_v21  ;;  %vm5374_vm15 = vmmov %vm5372_vm1 }
0x1cbc   :  { %v1657_v10 = vsel %vm5370_vm2, %v1644_v25, inf  ;;  %v1654_v50 = vsel %vm5371_vm12, %v1643_v13, inf  ;;  %v1436_v63 = vsel %vm465_vm5, %v3815_v1, %v1376_v61  ;;  %v1195_v4 = vsel %vm5374_vm15, %v3616_v3, 0.0  ;;  %vm5375_vm14 = vmmov %vm5373_vm13 }
0x1cbd   :  { %1658 = vmin.xlane.f32.xlu1 %v1657_v10  ;;  %1655 = vmin.xlane.f32.xlu0 %v1654_v50  ;;  %v1496_v55 = vsel %vm516_vm6, %v3865_v54, %v1436_v63  ;;  %v1255_v7 = vsel %vm5375_vm14, %v3670_v59, %v1195_v4  ;;  %vm5376_vm12 = vmmov %vm5372_vm1 }
0x1cbe   :  { %v1556_v43 = vsel %vm567_vm7, %v3915_v51, %v1496_v55  ;;  %v1315_v1 = vsel %vm363_vm3, %v3720_v22, %v1255_v7  ;;  %v1197_v51 = vsel %vm5376_vm12, %v3624_v19, 0.0  ;;  %vm5377_vm1 = vmmov %vm5373_vm13  ;;  %vm5378_vm13 = vcmask 277504  }
0x1cbf   :  { %v1616_v3 = vsel %vm618_vm8, %v3962_v28, %v1556_v43  ;;  %v1375_v54 = vsel %vm414_vm4, %v3770_v35, %v1315_v1  ;;  %v1257_v35 = vsel %vm5377_vm1, %v3675_v23, %v1197_v51  ;;  %vm5379_vm14 = vmmov %vm5378_vm13  ;;  %v5387_v43 = vld [vmem:[#allocation78_spill] sm:$0xff]  ;;  %v5388_v1 = vld [vmem:[#allocation95_spill] sm:$0xff] }
0x1cc0   :  { %v1435_v22 = vsel %vm465_vm5, %v3820_v46, %v1375_v54  ;;  %v1317_v19 = vsel %vm363_vm3, %v3725_v32, %v1257_v35  ;;  %vm5380_vm12 = vmmov %vm5378_vm13 }
0x1cc1   :  { %v1495_v8 = vsel %vm516_vm6, %v3870_v31, %v1435_v22  ;;  %v1377_v23 = vsel %vm414_vm4, %v3775_v45, %v1317_v19 }
0x1cc2   :  { %v1555_v46 = vsel %vm567_vm7, %v3920_v36, %v1495_v8  ;;  %v1437_v13 = vsel %vm465_vm5, %v3825_v24, %v1377_v23 }
0x1cc3   :  { %v1615_v31 = vsel %vm618_vm8, %v3970_v49, %v1555_v46  ;;  %v1497_v36 = vsel %vm516_vm6, %v3875_v44, %v1437_v13 }
0x1cc4   :  { %v1557_v49 = vsel %vm567_vm7, %v3925_v41, %v1497_v36 }
0x1cc5   :  { %v1617_v10 = vsel %vm618_vm8, %v3978_v60, %v1557_v49 }
0x1d39   :  { %v1650_v9 = vpop.xlane.xlu0 %1649 }
0x1d3a   :  { %vm1661_vm2 = vcmp.eq.f32.partialorder %v3578_v16, %v1650_v9  ;;  %v4095_v59 = vsel %vm669_vm9, %v1650_v9, %v1616_v3  ;;  %v5389_v9 = vld [vmem:[#allocation14_spill] sm:$0xff] }
0x1d3b   :  { %v4104_v28 = vsel %vm1661_vm2, 1e+10, %v3966_v30 }
0x1d3c   :  { %v1683_v25 = vsel %vm5378_vm13, %v4104_v28, inf }
0x1d3d   :  { %1684 = vmin.xlane.f32.xlu1 %v1683_v25 }
0x1d3e   :  { %v1647_v30 = vpop.xlane.xlu1 %1646 }
0x1d3f   :  { %vm1660_vm15 = vcmp.eq.f32.partialorder %v3588_v37, %v1647_v30  ;;  %v4132_v32 = vsel %vm669_vm9, %v1647_v30, %v1615_v31 }
0x1d40   :  { %v4138_v45 = vsel %vm1660_vm15, 1e+10, %v3974_v52  ;;  %vm5381_vm15 = vmmov %vm5380_vm12 }
0x1d41   :  { %v1680_v24 = vsel %vm5379_vm14, %v4138_v45, inf  ;;  %vm5382_vm14 = vmmov %vm5380_vm12 }
0x1d42   :  { %1681 = vmin.xlane.f32.xlu0 %v1680_v24  ;;  %v1653_v50 = vpop.xlane.xlu1 %1652 }
0x1d43   :  { %vm1662_vm2 = vcmp.eq.f32.partialorder %v3585_v40, %v1653_v50  ;;  %v4151_v44 = vsel %vm669_vm9, %v1653_v50, %v1617_v10 }
0x1d44   :  { %v4154_v52 = vsel %vm1662_vm2, 1e+10, %v3982_v34  ;;  %vm5383_vm2 = vcmp.eq.s32.totalorder %v2341_v27, 0 }
0x1d45   :  { %v1686_v41 = vsel %vm5380_vm12, %v4154_v52, inf  ;;  %v1191_v63 = vsel %vm5383_vm2, %v3571_v62, 1e+10  ;;  %vm5384_vm12 = vcmp.eq.s32.totalorder %v2341_v27, 1 }
0x1d46   :  { %v4158_v26 = vpop.xlane.xlu0 %1655  ;;  %1687 = vmin.xlane.f32.xlu0 %v1686_v41  ;;  %v4160_v38 = vpop.xlane.xlu1 %1658 }
0x1d47   :  { %vm1663_vm1 = vcmp.eq.f32.partialorder %v3601_v15, %v4158_v26  ;;  %vm1664_vm13 = vcmp.eq.f32.partialorder %v3597_v56, %v4160_v38 }
0x1d48   :  { %v4167_v60 = vsel %vm1663_vm1, 1e+10, %v3994_v57  ;;  %v4170_v34 = vsel %vm1664_vm13, 1e+10, %v3996_v20  ;;  %v1251_v57 = vsel %vm5384_vm12, %v3640_v47, %v1191_v63  ;;  %vm5385_vm1 = vmmov %vm5383_vm2 }
0x1d49   :  { %v1689_v21 = vsel %vm5381_vm15, %v4167_v60, inf  ;;  %v1692_v61 = vsel %vm5382_vm14, %v4170_v34, inf  ;;  %v1311_v20 = vsel %vm363_vm3, %v3690_v39, %v1251_v57  ;;  %v1190_v62 = vsel %vm5385_vm1, %v3565_v12, 1e+10  ;;  %vm5386_vm13 = vmmov %vm5384_vm12 }
0x1d4a   :  { %1690 = vmin.xlane.f32.xlu1 %v1689_v21  ;;  %1693 = vmin.xlane.f32.xlu0 %v1692_v61  ;;  %v1371_v4 = vsel %vm414_vm4, %v3740_v33, %v1311_v20  ;;  %v1250_v39 = vsel %vm5386_vm13, %v3645_v5, %v1190_v62  ;;  %vm5390_vm12 = vmmov %vm5382_vm14 }
0x1d4b   :  { %v1431_v55 = vsel %vm465_vm5, %v3790_v18, %v1371_v4  ;;  %v1310_v18 = vsel %vm363_vm3, %v3695_v0, %v1250_v39  ;;  %vm5391_vm13 = vmmov %vm5390_vm12 }
0x1d4c   :  { %v1491_v47 = vsel %vm516_vm6, %v3840_v14, %v1431_v55  ;;  %v1370_v14 = vsel %vm414_vm4, %v3745_v11, %v1310_v18 }
0x1d4d   :  { %v1551_v33 = vsel %vm567_vm7, %v3890_v42, %v1491_v47  ;;  %v1430_v42 = vsel %vm465_vm5, %v3795_v48, %v1370_v14 }
0x1d4e   :  { %v1611_v12 = vsel %vm618_vm8, %v3940_v17, %v1551_v33  ;;  %v1490_v17 = vsel %vm516_vm6, %v5387_v43, %v1430_v42 }
0x1d4f   :  { %v1671_v5 = vsel %vm669_vm9, %v4002_v2, %v1611_v12  ;;  %v1550_v2 = vsel %vm567_vm7, %v5388_v1, %v1490_v17 }
0x1d50   :  { %v1610_v48 = vsel %vm618_vm8, %v5389_v9, %v1550_v2 }
0x1d51   :  { %v1670_v54 = vsel %vm669_vm9, %v4020_v29, %v1610_v48 }
0x1dc6   :  { %v1685_v7 = vpop.xlane.xlu1 %1684 }
0x1dc7   :  { %vm1696_vm15 = vcmp.le.f32.partialorder %v4104_v28, %v1685_v7  ;;  %v1731_v0 = vsel %vm5012_vm10, %v1685_v7, %v1671_v5 }
0x1dc8   :  { %v1701_v11 = vsel %vm1696_vm15, %v3578_v16, 1e+10 }
0x1dc9   :  { %v1708_v3 = vsel %vm5382_vm14, %v1701_v11, inf }
0x1dca   :  { %1709 = vmin.xlane.f32.xlu0 %v1708_v3 }
0x1dcb   :  { %v1682_v51 = vpop.xlane.xlu0 %1681 }
0x1dcc   :  { %vm1695_vm2 = vcmp.le.f32.partialorder %v4138_v45, %v1682_v51  ;;  %v1730_v22 = vsel %vm5012_vm10, %v1682_v51, %v1670_v54 }
0x1dcd   :  { %v1700_v35 = vsel %vm1695_vm2, %v3588_v37, 1e+10  ;;  %vm5392_vm2 = vmmov %vm5390_vm12 }
0x1dce   :  { %v1705_v8 = vsel %vm5390_vm12, %v1700_v35, inf  ;;  %vm5393_vm12 = vmmov %vm5392_vm2 }
0x1dcf   :  { %1706 = vmin.xlane.f32.xlu1 %v1705_v8  ;;  %v1688_v25 = vpop.xlane.xlu0 %1687 }
0x1dd0   :  { %vm1697_vm1 = vcmp.le.f32.partialorder %v4154_v52, %v1688_v25  ;;  %v1732_v19 = vsel %vm5012_vm10, %v1688_v25, %v4040_v6 }
0x1dd1   :  { %v1702_v29 = vsel %vm1697_vm1, %v3585_v40, 1e+10 }
0x1dd2   :  { %v1711_v46 = vsel %vm5391_vm13, %v1702_v29, inf  ;;  %vm5394_vm13 = vmmov %vm5392_vm2 }
0x1dd3   :  { %1712 = vmin.xlane.f32.xlu1 %v1711_v46  ;;  %v4246_v23 = vpop.xlane.xlu0 %1693  ;;  %v4248_v31 = vpop.xlane.xlu1 %1690 }
0x1dd4   :  { %vm1699_vm15 = vcmp.le.f32.partialorder %v4170_v34, %v4246_v23  ;;  %vm1698_vm14 = vcmp.le.f32.partialorder %v4167_v60, %v4248_v31 }
0x1dd5   :  { %v1704_v30 = vsel %vm1699_vm15, %v3597_v56, 1e+10  ;;  %v1703_v13 = vsel %vm1698_vm14, %v3601_v15, 1e+10  ;;  %vm5395_vm14 = vmmov %vm5392_vm2 }
0x1dd6   :  { %v1717_v6 = vsel %vm5392_vm2, %v1704_v30, inf  ;;  %v1714_v36 = vsel %vm5393_vm12, %v1703_v13, inf }
0x1dd7   :  { %1718 = vmin.xlane.f32.xlu1 %v1717_v6  ;;  %1715 = vmin.xlane.f32.xlu0 %v1714_v36 }
0x1e53   :  { %v1710_v49 = vpop.xlane.xlu0 %1709 }
0x1e54   :  { %vm1721_vm1 = vcmp.eq.f32.partialorder %v3578_v16, %v1710_v49  ;;  %v1736_v24 = vsel %vm5012_vm10, %v1710_v49, %v4095_v59 }
0x1e55   :  { %v1726_v10 = vsel %vm1721_vm1, 1e+10, %v4104_v28 }
0x1e56   :  { %v1743_v50 = vsel %vm5394_vm13, %v1726_v10, inf }
0x1e57   :  { %1744 = vmin.xlane.f32.xlu1 %v1743_v50 }
0x1e58   :  { %v1707_v41 = vpop.xlane.xlu1 %1706 }
0x1e59   :  { %vm1720_vm15 = vcmp.eq.f32.partialorder %v3588_v37, %v1707_v41  ;;  %v1735_v21 = vsel %vm5012_vm10, %v1707_v41, %v4132_v32 }
0x1e5a   :  { %v1725_v61 = vsel %vm1720_vm15, 1e+10, %v4138_v45  ;;  %vm5396_vm15 = vmmov %vm5393_vm12 }
0x1e5b   :  { %v1740_v63 = vsel %vm5395_vm14, %v1725_v61, inf  ;;  %vm5397_vm14 = vmmov %vm5393_vm12 }
0x1e5c   :  { %1741 = vmin.xlane.f32.xlu0 %v1740_v63  ;;  %v1713_v57 = vpop.xlane.xlu1 %1712 }
0x1e5d   :  { %vm1722_vm2 = vcmp.eq.f32.partialorder %v3585_v40, %v1713_v57  ;;  %v1737_v59 = vsel %vm5012_vm10, %v1713_v57, %v4151_v44 }
0x1e5e   :  { %v1727_v28 = vsel %vm1722_vm2, 1e+10, %v4154_v52 }
0x1e5f   :  { %v1746_v20 = vsel %vm5393_vm12, %v1727_v28, inf }
0x1e60   :  { %v4276_v4 = vpop.xlane.xlu0 %1715  ;;  %1747 = vmin.xlane.f32.xlu0 %v1746_v20  ;;  %v4278_v32 = vpop.xlane.xlu1 %1718 }
0x1e61   :  { %vm1723_vm1 = vcmp.eq.f32.partialorder %v3601_v15, %v4276_v4  ;;  %vm1724_vm13 = vcmp.eq.f32.partialorder %v3597_v56, %v4278_v32 }
0x1e62   :  { %v1728_v45 = vsel %vm1723_vm1, 1e+10, %v4167_v60  ;;  %v1729_v55 = vsel %vm1724_vm13, 1e+10, %v4170_v34  ;;  %vm5398_vm13 = vmmov %vm5393_vm12 }
0x1e63   :  { %v1749_v44 = vsel %vm5396_vm15, %v1728_v45, inf  ;;  %v1752_v52 = vsel %vm5397_vm14, %v1729_v55, inf  ;;  %vm5399_vm14 = vmmov %vm5393_vm12 }
0x1e64   :  { %1750 = vmin.xlane.f32.xlu1 %v1749_v44  ;;  %1753 = vmin.xlane.f32.xlu0 %v1752_v52 }
0x1ee0   :  { %v1745_v62 = vpop.xlane.xlu1 %1744 }
0x1ee1   :  { %vm1756_vm2 = vcmp.le.f32.partialorder %v1726_v10, %v1745_v62  ;;  %v1791_v47 = vsel %vm5011_vm11, %v1745_v62, %v1731_v0 }
0x1ee2   :  { %v1761_v39 = vsel %vm1756_vm2, %v3578_v16, 1e+10 }
0x1ee3   :  { %v1768_v33 = vsel %vm5393_vm12, %v1761_v39, inf }
0x1ee4   :  { %1769 = vmin.xlane.f32.xlu0 %v1768_v33 }
0x1ee5   :  { %v1742_v18 = vpop.xlane.xlu0 %1741 }
0x1ee6   :  { %vm1755_vm1 = vcmp.le.f32.partialorder %v1725_v61, %v1742_v18  ;;  %v1790_v60 = vsel %vm5011_vm11, %v1742_v18, %v1730_v22 }
0x1ee7   :  { %v1760_v34 = vsel %vm1755_vm1, %v3588_v37, 1e+10  ;;  %vm5400_vm1 = vmmov %vm5398_vm13 }
0x1ee8   :  { %v1765_v12 = vsel %vm5398_vm13, %v1760_v34, inf  ;;  %vm5401_vm13 = vmmov %vm5400_vm1 }
0x1ee9   :  { %1766 = vmin.xlane.f32.xlu1 %v1765_v12  ;;  %v1748_v14 = vpop.xlane.xlu0 %1747 }
0x1eea   :  { %vm1757_vm15 = vcmp.le.f32.partialorder %v1727_v28, %v1748_v14  ;;  %v1792_v5 = vsel %vm5011_vm11, %v1748_v14, %v1732_v19 }
0x1eeb   :  { %v1762_v7 = vsel %vm1757_vm15, %v3585_v40, 1e+10 }
0x1eec   :  { %v1771_v42 = vsel %vm5399_vm14, %v1762_v7, inf  ;;  %vm5402_vm14 = vmmov %vm5400_vm1 }
0x1eed   :  { %1772 = vmin.xlane.f32.xlu1 %v1771_v42  ;;  %v4300_v0 = vpop.xlane.xlu0 %1753  ;;  %v4302_v43 = vpop.xlane.xlu1 %1750 }
0x1eee   :  { %vm1759_vm2 = vcmp.le.f32.partialorder %v1729_v55, %v4300_v0  ;;  %vm1758_vm12 = vcmp.le.f32.partialorder %v1728_v45, %v4302_v43 }
0x1eef   :  { %v1764_v17 = vsel %vm1759_vm2, %v3597_v56, 1e+10  ;;  %v1763_v11 = vsel %vm1758_vm12, %v3601_v15, 1e+10  ;;  %vm5403_vm12 = vmmov %vm5400_vm1 }
0x1ef0   :  { %v1777_v1 = vsel %vm5400_vm1, %v1764_v17, inf  ;;  %v1774_v2 = vsel %vm5401_vm13, %v1763_v11, inf  ;;  %vm5404_vm13 = vmmov %vm5403_vm12 }
0x1ef1   :  { %1778 = vmin.xlane.f32.xlu1 %v1777_v1  ;;  %1775 = vmin.xlane.f32.xlu0 %v1774_v2 }
0x1f6d   :  { %v1770_v3 = vpop.xlane.xlu0 %1769 }
0x1f6e   :  { %vm1781_vm15 = vcmp.eq.f32.partialorder %v3578_v16, %v1770_v3  ;;  %v1796_v9 = vsel %vm5011_vm11, %v1770_v3, %v1736_v24 }
0x1f6f   :  { %v1786_v48 = vsel %vm1781_vm15, 1e+10, %v1726_v10 }
0x1f70   :  { %v1803_v54 = vsel %vm5402_vm14, %v1786_v48, inf }
0x1f71   :  { %1804 = vmin.xlane.f32.xlu1 %v1803_v54 }
0x1f72   :  { %v1767_v51 = vpop.xlane.xlu1 %1766 }
0x1f73   :  { %vm1780_vm2 = vcmp.eq.f32.partialorder %v3588_v37, %v1767_v51  ;;  %v1795_v22 = vsel %vm5011_vm11, %v1767_v51, %v1735_v21 }
0x1f74   :  { %v1785_v35 = vsel %vm1780_vm2, 1e+10, %v1725_v61  ;;  %vm5405_vm2 = vmmov %vm5403_vm12 }
0x1f75   :  { %v1800_v8 = vsel %vm5403_vm12, %v1785_v35, inf  ;;  %vm5406_vm12 = vmmov %vm5405_vm2 }
0x1f76   :  { %1801 = vmin.xlane.f32.xlu0 %v1800_v8  ;;  %v1773_v25 = vpop.xlane.xlu1 %1772 }
0x1f77   :  { %vm1782_vm1 = vcmp.eq.f32.partialorder %v3585_v40, %v1773_v25  ;;  %v1797_v19 = vsel %vm5011_vm11, %v1773_v25, %v1737_v59  ;;  %vm5408_vm11 = vmmov %vm5405_vm2 }
0x1f78   :  { %v1787_v29 = vsel %vm1782_vm1, 1e+10, %v1727_v28 }
0x1f79   :  { %v1806_v46 = vsel %vm5404_vm13, %v1787_v29, inf  ;;  %vm5407_vm13 = vcmp.eq.s32.totalorder %v2341_v27, 11 }
0x1f7a   :  { %v4322_v30 = vpop.xlane.xlu0 %1775  ;;  %1807 = vmin.xlane.f32.xlu0 %v1806_v46  ;;  %v4324_v13 = vpop.xlane.xlu1 %1778 }
0x1f7b   :  { %vm1783_vm15 = vcmp.eq.f32.partialorder %v3601_v15, %v4322_v30  ;;  %vm1784_vm14 = vcmp.eq.f32.partialorder %v3597_v56, %v4324_v13 }
0x1f7c   :  { %v1788_v6 = vsel %vm1783_vm15, 1e+10, %v1728_v45  ;;  %v1789_v36 = vsel %vm1784_vm14, 1e+10, %v1729_v55  ;;  %vm5409_vm15 = vmmov %vm5407_vm13 }
0x1f7d   :  { %v1809_v49 = vsel %vm5405_vm2, %v1788_v6, inf  ;;  %v1812_v24 = vsel %vm5406_vm12, %v1789_v36, inf  ;;  %vm5410_vm14 = vmmov %vm5405_vm2 }
0x1f7e   :  { %1810 = vmin.xlane.f32.xlu1 %v1809_v49  ;;  %1813 = vmin.xlane.f32.xlu0 %v1812_v24  ;;  %vm5411_vm12 = vmmov %vm5407_vm13 }
0x1ffa   :  { %v1805_v10 = vpop.xlane.xlu1 %1804 }
0x1ffb   :  { %vm1816_vm1 = vcmp.le.f32.partialorder %v1786_v48, %v1805_v10  ;;  %v1851_v50 = vsel %vm5407_vm13, %v1805_v10, %v1791_v47 }
0x1ffc   :  { %v1821_v41 = vsel %vm1816_vm1, %v3578_v16, 1e+10  ;;  %vm5412_vm1 = vmmov %vm5408_vm11 }
0x1ffd   :  { %v1828_v21 = vsel %vm5408_vm11, %v1821_v41, inf  ;;  %vm5413_vm13 = vmmov %vm5412_vm1 }
0x1ffe   :  { %1829 = vmin.xlane.f32.xlu0 %v1828_v21 }
0x1fff   :  { %v1802_v61 = vpop.xlane.xlu0 %1801 }
0x2000   :  { %vm1815_vm10 = vcmp.le.f32.partialorder %v1785_v35, %v1802_v61  ;;  %v1850_v63 = vsel %vm5409_vm15, %v1802_v61, %v1790_v60  ;;  %vm5414_vm15 = vmmov %vm5412_vm1 }
0x2001   :  { %v1820_v57 = vsel %vm1815_vm10, %v3588_v37, 1e+10 }
0x2002   :  { %v1825_v59 = vsel %vm5410_vm14, %v1820_v57, inf }
0x2003   :  { %1826 = vmin.xlane.f32.xlu1 %v1825_v59  ;;  %v1808_v28 = vpop.xlane.xlu0 %1807 }
0x2004   :  { %vm1817_vm2 = vcmp.le.f32.partialorder %v1787_v29, %v1808_v28  ;;  %v1852_v20 = vsel %vm5411_vm12, %v1808_v28, %v1792_v5 }
0x2005   :  { %v1822_v45 = vsel %vm1817_vm2, %v3585_v40, 1e+10  ;;  %vm5415_vm2 = vmmov %vm5411_vm12 }
0x2006   :  { %v1831_v55 = vsel %vm5412_vm1, %v1822_v45, inf  ;;  %vm5416_vm12 = vmmov %vm5412_vm1 }
0x2007   :  { %1832 = vmin.xlane.f32.xlu1 %v1831_v55  ;;  %v4344_v44 = vpop.xlane.xlu0 %1813  ;;  %v4346_v52 = vpop.xlane.xlu1 %1810 }
0x2008   :  { %vm1819_vm11 = vcmp.le.f32.partialorder %v1789_v36, %v4344_v44  ;;  %vm1818_vm10 = vcmp.le.f32.partialorder %v1788_v6, %v4346_v52 }
0x2009   :  { %v1824_v62 = vsel %vm1819_vm11, %v3597_v56, 1e+10  ;;  %v1823_v47 = vsel %vm1818_vm10, %v3601_v15, 1e+10  ;;  %vm5417_vm11 = vmmov %vm5415_vm2 }
0x200a   :  { %v1837_v39 = vsel %vm5413_vm13, %v1824_v62, inf  ;;  %v1834_v33 = vsel %vm5414_vm15, %v1823_v47, inf  ;;  %vm5418_vm10 = vmmov %vm5416_vm12 }
0x200b   :  { %1838 = vmin.xlane.f32.xlu1 %v1837_v39  ;;  %1835 = vmin.xlane.f32.xlu0 %v1834_v33  ;;  %vm5419_vm15 = vmmov %vm5415_vm2 }
0x2087   :  { %v1830_v18 = vpop.xlane.xlu0 %1829 }
0x2088   :  { %vm1841_vm14 = vcmp.eq.f32.partialorder %v3578_v16, %v1830_v18  ;;  %v1856_v60 = vsel %vm5415_vm2, %v1830_v18, %v1796_v9 }
0x2089   :  { %v1846_v34 = vsel %vm1841_vm14, 1e+10, %v1786_v48  ;;  %vm5420_vm14 = vmmov %vm5418_vm10 }
0x208a   :  { %v1863_v12 = vsel %vm5416_vm12, %v1846_v34, inf }
0x208b   :  { %1864 = vmin.xlane.f32.xlu1 %v1863_v12 }
0x208c   :  { %v1827_v14 = vpop.xlane.xlu1 %1826 }
0x208d   :  { %vm1840_vm1 = vcmp.eq.f32.partialorder %v3588_v37, %v1827_v14  ;;  %v1855_v5 = vsel %vm5417_vm11, %v1827_v14, %v1795_v22 }
0x208e   :  { %v1845_v7 = vsel %vm1840_vm1, 1e+10, %v1785_v35  ;;  %vm5421_vm1 = vmmov %vm5418_vm10 }
0x208f   :  { %v1860_v42 = vsel %vm5418_vm10, %v1845_v7, inf  ;;  %vm5422_vm11 = vmmov %vm5421_vm1 }
0x2090   :  { %1861 = vmin.xlane.f32.xlu0 %v1860_v42  ;;  %v1833_v17 = vpop.xlane.xlu1 %1832 }
0x2091   :  { %vm1842_vm13 = vcmp.eq.f32.partialorder %v3585_v40, %v1833_v17  ;;  %v1857_v11 = vsel %vm5419_vm15, %v1833_v17, %v1797_v19  ;;  %vm5424_vm15 = vmmov %vm5421_vm1 }
0x2092   :  { %v1847_v1 = vsel %vm1842_vm13, 1e+10, %v1787_v29  ;;  %vm5423_vm13 = vcmp.eq.s32.totalorder %v2341_v27, 12 }
0x2093   :  { %v1866_v2 = vsel %vm5420_vm14, %v1847_v1, inf }
0x2094   :  { %v4366_v3 = vpop.xlane.xlu0 %1835  ;;  %1867 = vmin.xlane.f32.xlu0 %v1866_v2  ;;  %v4368_v9 = vpop.xlane.xlu1 %1838 }
0x2095   :  { %vm1843_vm2 = vcmp.eq.f32.partialorder %v3601_v15, %v4366_v3  ;;  %vm1844_vm12 = vcmp.eq.f32.partialorder %v3597_v56, %v4368_v9 }
0x2096   :  { %v1848_v48 = vsel %vm1843_vm2, 1e+10, %v1788_v6  ;;  %v1849_v54 = vsel %vm1844_vm12, 1e+10, %v1789_v36  ;;  %vm5425_vm2 = vmmov %vm5423_vm13 }
0x2097   :  { %v1869_v51 = vsel %vm5421_vm1, %v1848_v48, inf  ;;  %v1872_v22 = vsel %vm5422_vm11, %v1849_v54, inf  ;;  %vm5426_vm12 = vmmov %vm5421_vm1 }
0x2098   :  { %1870 = vmin.xlane.f32.xlu1 %v1869_v51  ;;  %1873 = vmin.xlane.f32.xlu0 %v1872_v22  ;;  %vm5427_vm11 = vmmov %vm5425_vm2 }
0x2114   :  { %v1865_v35 = vpop.xlane.xlu1 %1864 }
0x2115   :  { %vm1876_vm10 = vcmp.le.f32.partialorder %v1846_v34, %v1865_v35  ;;  %v1911_v8 = vsel %vm5423_vm13, %v1865_v35, %v1851_v50 }
0x2116   :  { %v1881_v25 = vsel %vm1876_vm10, %v3578_v16, 1e+10  ;;  %vm5428_vm10 = vmmov %vm5426_vm12 }
0x2117   :  { %v1888_v19 = vsel %vm5424_vm15, %v1881_v25, inf }
0x2118   :  { %1889 = vmin.xlane.f32.xlu0 %v1888_v19 }
0x2119   :  { %v1862_v29 = vpop.xlane.xlu0 %1861 }
0x211a   :  { %vm1875_vm14 = vcmp.le.f32.partialorder %v1845_v7, %v1862_v29  ;;  %v1910_v46 = vsel %vm5425_vm2, %v1862_v29, %v1850_v63  ;;  %vm5430_vm2 = vmmov %vm5428_vm10 }
0x211b   :  { %v1880_v6 = vsel %vm1875_vm14, %v3588_v37, 1e+10  ;;  %vm5429_vm14 = vmmov %vm5428_vm10 }
0x211c   :  { %v1885_v36 = vsel %vm5426_vm12, %v1880_v6, inf }
0x211d   :  { %1886 = vmin.xlane.f32.xlu1 %v1885_v36  ;;  %v1868_v49 = vpop.xlane.xlu0 %1867 }
0x211e   :  { %vm1877_vm1 = vcmp.le.f32.partialorder %v1847_v1, %v1868_v49  ;;  %v1912_v24 = vsel %vm5427_vm11, %v1868_v49, %v1852_v20 }
0x211f   :  { %v1882_v10 = vsel %vm1877_vm1, %v3585_v40, 1e+10  ;;  %vm5431_vm1 = vmmov %vm5427_vm11 }
0x2120   :  { %v1891_v50 = vsel %vm5428_vm10, %v1882_v10, inf  ;;  %vm5432_vm11 = vmmov %vm5430_vm2 }
0x2121   :  { %1892 = vmin.xlane.f32.xlu1 %v1891_v50  ;;  %v4388_v41 = vpop.xlane.xlu0 %1873  ;;  %v4390_v21 = vpop.xlane.xlu1 %1870 }
0x2122   :  { %vm1879_vm13 = vcmp.le.f32.partialorder %v1849_v54, %v4388_v41  ;;  %vm1878_vm15 = vcmp.le.f32.partialorder %v1848_v48, %v4390_v21 }
0x2123   :  { %v1884_v61 = vsel %vm1879_vm13, %v3597_v56, 1e+10  ;;  %v1883_v63 = vsel %vm1878_vm15, %v3601_v15, 1e+10  ;;  %vm5433_vm13 = vmmov %vm5431_vm1 }
0x2124   :  { %v1897_v57 = vsel %vm5429_vm14, %v1884_v61, inf  ;;  %v1894_v59 = vsel %vm5430_vm2, %v1883_v63, inf  ;;  %vm5434_vm15 = vmmov %vm5430_vm2 }
0x2125   :  { %1898 = vmin.xlane.f32.xlu1 %v1897_v57  ;;  %1895 = vmin.xlane.f32.xlu0 %v1894_v59  ;;  %vm5435_vm2 = vmmov %vm5431_vm1 }
0x21a1   :  { %v1890_v28 = vpop.xlane.xlu0 %1889 }
0x21a2   :  { %vm1901_vm12 = vcmp.eq.f32.partialorder %v3578_v16, %v1890_v28  ;;  %v1916_v20 = vsel %vm5431_vm1, %v1890_v28, %v1856_v60 }
0x21a3   :  { %v1906_v45 = vsel %vm1901_vm12, 1e+10, %v1846_v34  ;;  %vm5436_vm12 = vmmov %vm5432_vm11 }
0x21a4   :  { %v1923_v55 = vsel %vm5432_vm11, %v1906_v45, inf }
0x21a5   :  { %1924 = vmin.xlane.f32.xlu1 %v1923_v55 }
0x21a6   :  { %v1887_v62 = vpop.xlane.xlu1 %1886 }
0x21a7   :  { %vm1900_vm10 = vcmp.eq.f32.partialorder %v3588_v37, %v1887_v62  ;;  %v1915_v47 = vsel %vm5433_vm13, %v1887_v62, %v1855_v5 }
0x21a8   :  { %v1905_v39 = vsel %vm1900_vm10, 1e+10, %v1845_v7  ;;  %vm5437_vm10 = vmmov %vm5436_vm12 }
0x21a9   :  { %v1920_v33 = vsel %vm5434_vm15, %v1905_v39, inf  ;;  %vm5438_vm13 = vmmov %vm5437_vm10 }
0x21aa   :  { %1921 = vmin.xlane.f32.xlu0 %v1920_v33  ;;  %v1893_v18 = vpop.xlane.xlu1 %1892 }
0x21ab   :  { %vm1902_vm14 = vcmp.eq.f32.partialorder %v3585_v40, %v1893_v18  ;;  %v1917_v60 = vsel %vm5435_vm2, %v1893_v18, %v1857_v11  ;;  %vm5440_vm2 = vmmov %vm5437_vm10 }
0x21ac   :  { %v1907_v34 = vsel %vm1902_vm14, 1e+10, %v1847_v1  ;;  %vm5439_vm14 = vcmp.eq.s32.totalorder %v2341_v27, 13 }
0x21ad   :  { %v1926_v12 = vsel %vm5436_vm12, %v1907_v34, inf }
0x21ae   :  { %v4410_v14 = vpop.xlane.xlu0 %1895  ;;  %1927 = vmin.xlane.f32.xlu0 %v1926_v12  ;;  %v4412_v42 = vpop.xlane.xlu1 %1898 }
0x21af   :  { %vm1903_vm1 = vcmp.eq.f32.partialorder %v3601_v15, %v4410_v14  ;;  %vm1904_vm11 = vcmp.eq.f32.partialorder %v3597_v56, %v4412_v42 }
0x21b0   :  { %v1908_v5 = vsel %vm1903_vm1, 1e+10, %v1848_v48  ;;  %v1909_v7 = vsel %vm1904_vm11, 1e+10, %v1849_v54  ;;  %vm5441_vm1 = vmmov %vm5439_vm14 }
0x21b1   :  { %v1929_v17 = vsel %vm5437_vm10, %v1908_v5, inf  ;;  %v1932_v11 = vsel %vm5438_vm13, %v1909_v7, inf  ;;  %vm5442_vm11 = vmmov %vm5440_vm2 }
0x21b2   :  { %1930 = vmin.xlane.f32.xlu1 %v1929_v17  ;;  %1933 = vmin.xlane.f32.xlu0 %v1932_v11  ;;  %vm5443_vm13 = vmmov %vm5441_vm1 }
0x222e   :  { %v1925_v1 = vpop.xlane.xlu1 %1924 }
0x222f   :  { %vm1936_vm15 = vcmp.le.f32.partialorder %v1906_v45, %v1925_v1  ;;  %v1971_v2 = vsel %vm5439_vm14, %v1925_v1, %v1911_v8 }
0x2230   :  { %v1941_v51 = vsel %vm1936_vm15, %v3578_v16, 1e+10  ;;  %vm5444_vm15 = vmmov %vm5440_vm2 }
0x2231   :  { %v1948_v22 = vsel %vm5440_vm2, %v1941_v51, inf }
0x2232   :  { %1949 = vmin.xlane.f32.xlu0 %v1948_v22 }
0x2233   :  { %v1922_v35 = vpop.xlane.xlu0 %1921 }
0x2234   :  { %vm1935_vm12 = vcmp.le.f32.partialorder %v1905_v39, %v1922_v35  ;;  %v1970_v48 = vsel %vm5441_vm1, %v1922_v35, %v1910_v46  ;;  %vm5446_vm1 = vmmov %vm5442_vm11 }
0x2235   :  { %v1940_v54 = vsel %vm1935_vm12, %v3588_v37, 1e+10  ;;  %vm5445_vm12 = vmmov %vm5442_vm11 }
0x2236   :  { %v1945_v25 = vsel %vm5442_vm11, %v1940_v54, inf }
0x2237   :  { %1946 = vmin.xlane.f32.xlu1 %v1945_v25  ;;  %v1928_v19 = vpop.xlane.xlu0 %1927 }
0x2238   :  { %vm1937_vm10 = vcmp.le.f32.partialorder %v1907_v34, %v1928_v19  ;;  %v1972_v8 = vsel %vm5443_vm13, %v1928_v19, %v1912_v24 }
0x2239   :  { %v1942_v29 = vsel %vm1937_vm10, %v3585_v40, 1e+10  ;;  %vm5447_vm10 = vmmov %vm5443_vm13 }
0x223a   :  { %v1951_v6 = vsel %vm5444_vm15, %v1942_v29, inf  ;;  %vm5448_vm13 = vmmov %vm5446_vm1 }
0x223b   :  { %1952 = vmin.xlane.f32.xlu1 %v1951_v6  ;;  %v4432_v36 = vpop.xlane.xlu0 %1933  ;;  %v4434_v49 = vpop.xlane.xlu1 %1930 }
0x223c   :  { %vm1939_vm14 = vcmp.le.f32.partialorder %v1909_v7, %v4432_v36  ;;  %vm1938_vm2 = vcmp.le.f32.partialorder %v1908_v5, %v4434_v49 }
0x223d   :  { %v1944_v46 = vsel %vm1939_vm14, %v3597_v56, 1e+10  ;;  %v1943_v10 = vsel %vm1938_vm2, %v3601_v15, 1e+10  ;;  %vm5449_vm14 = vmmov %vm5447_vm10 }
0x223e   :  { %v1957_v50 = vsel %vm5445_vm12, %v1944_v46, inf  ;;  %v1954_v24 = vsel %vm5446_vm1, %v1943_v10, inf  ;;  %vm5450_vm2 = vmmov %vm5446_vm1 }
0x223f   :  { %1958 = vmin.xlane.f32.xlu1 %v1957_v50  ;;  %1955 = vmin.xlane.f32.xlu0 %v1954_v24  ;;  %vm5451_vm1 = vmmov %vm5447_vm10 }
0x22bb   :  { %v1950_v61 = vpop.xlane.xlu0 %1949 }
0x22bc   :  { %vm1961_vm11 = vcmp.eq.f32.partialorder %v3578_v16, %v1950_v61  ;;  %v1976_v63 = vsel %vm5447_vm10, %v1950_v61, %v1916_v20 }
0x22bd   :  { %v1966_v57 = vsel %vm1961_vm11, 1e+10, %v1906_v45  ;;  %vm5452_vm11 = vmmov %vm5450_vm2 }
0x22be   :  { %v1983_v59 = vsel %vm5448_vm13, %v1966_v57, inf }
0x22bf   :  { %1984 = vmin.xlane.f32.xlu1 %v1983_v59 }
0x22c0   :  { %v1947_v28 = vpop.xlane.xlu1 %1946 }
0x22c1   :  { %vm1960_vm15 = vcmp.eq.f32.partialorder %v3588_v37, %v1947_v28  ;;  %v1975_v55 = vsel %vm5449_vm14, %v1947_v28, %v1915_v47  ;;  %vm5454_vm14 = vmmov %vm5450_vm2 }
0x22c2   :  { %v1965_v62 = vsel %vm1960_vm15, 1e+10, %v1905_v39  ;;  %vm5453_vm15 = vmmov %vm5450_vm2 }
0x22c3   :  { %v1980_v33 = vsel %vm5450_vm2, %v1965_v62, inf }
0x22c4   :  { %1981 = vmin.xlane.f32.xlu0 %v1980_v33  ;;  %v1953_v18 = vpop.xlane.xlu1 %1952 }
0x22c5   :  { %vm1962_vm12 = vcmp.eq.f32.partialorder %v3585_v40, %v1953_v18  ;;  %v1977_v20 = vsel %vm5451_vm1, %v1953_v18, %v1917_v60  ;;  %vm5456_vm1 = vmmov %vm5452_vm11 }
0x22c6   :  { %v1967_v45 = vsel %vm1962_vm12, 1e+10, %v1907_v34  ;;  %vm5455_vm12 = vcmp.eq.s32.totalorder %v2341_v27, 14 }
0x22c7   :  { %v1986_v12 = vsel %vm5452_vm11, %v1967_v45, inf }
0x22c8   :  { %v4454_v17 = vpop.xlane.xlu0 %1955  ;;  %1987 = vmin.xlane.f32.xlu0 %v1986_v12  ;;  %v4456_v11 = vpop.xlane.xlu1 %1958 }
0x22c9   :  { %vm1963_vm10 = vcmp.eq.f32.partialorder %v3601_v15, %v4454_v17  ;;  %vm1964_vm13 = vcmp.eq.f32.partialorder %v3597_v56, %v4456_v11 }
0x22ca   :  { %v1968_v47 = vsel %vm1963_vm10, 1e+10, %v1908_v5  ;;  %v1969_v39 = vsel %vm1964_vm13, 1e+10, %v1909_v7  ;;  %vm5457_vm10 = vmmov %vm5455_vm12 }
0x22cb   :  { %v1989_v1 = vsel %vm5453_vm15, %v1968_v47, inf  ;;  %v1992_v60 = vsel %vm5454_vm14, %v1969_v39, inf  ;;  %vm5458_vm13 = vmmov %vm5456_vm1 }
0x22cc   :  { %1990 = vmin.xlane.f32.xlu1 %v1989_v1  ;;  %1993 = vmin.xlane.f32.xlu0 %v1992_v60  ;;  %vm5459_vm14 = vmmov %vm5457_vm10 }
0x2348   :  { %v1985_v34 = vpop.xlane.xlu1 %1984 }
0x2349   :  { %vm1996_vm2 = vcmp.le.f32.partialorder %v1966_v57, %v1985_v34  ;;  %v2031_v51 = vsel %vm5455_vm12, %v1985_v34, %v1971_v2 }
0x234a   :  { %v2001_v22 = vsel %vm1996_vm2, %v3578_v16, 1e+10  ;;  %vm5460_vm2 = vmmov %vm5456_vm1 }
0x234b   :  { %v2008_v35 = vsel %vm5456_vm1, %v2001_v22, inf }
0x234c   :  { %2009 = vmin.xlane.f32.xlu0 %v2008_v35 }
0x234d   :  { %v1982_v54 = vpop.xlane.xlu0 %1981 }
0x234e   :  { %vm1995_vm11 = vcmp.le.f32.partialorder %v1965_v62, %v1982_v54  ;;  %v2030_v5 = vsel %vm5457_vm10, %v1982_v54, %v1970_v48  ;;  %vm5462_vm10 = vmmov %vm5460_vm2 }
0x234f   :  { %v2000_v7 = vsel %vm1995_vm11, %v3588_v37, 1e+10  ;;  %vm5461_vm11 = vmmov %vm5460_vm2 }
0x2350   :  { %v2005_v25 = vsel %vm5458_vm13, %v2000_v7, inf }
0x2351   :  { %2006 = vmin.xlane.f32.xlu1 %v2005_v25  ;;  %v1988_v19 = vpop.xlane.xlu0 %1987 }
0x2352   :  { %vm1997_vm15 = vcmp.le.f32.partialorder %v1967_v45, %v1988_v19  ;;  %v2032_v2 = vsel %vm5459_vm14, %v1988_v19, %v1972_v8 }
0x2353   :  { %v2002_v29 = vsel %vm1997_vm15, %v3585_v40, 1e+10  ;;  %vm5463_vm15 = vmmov %vm5459_vm14 }
0x2354   :  { %v2011_v6 = vsel %vm5460_vm2, %v2002_v29, inf  ;;  %vm5464_vm14 = vmmov %vm5460_vm2 }
0x2355   :  { %2012 = vmin.xlane.f32.xlu1 %v2011_v6  ;;  %v4476_v46 = vpop.xlane.xlu0 %1993  ;;  %v4478_v10 = vpop.xlane.xlu1 %1990 }
0x2356   :  { %vm1999_vm12 = vcmp.le.f32.partialorder %v1969_v39, %v4476_v46  ;;  %vm1998_vm1 = vcmp.le.f32.partialorder %v1968_v47, %v4478_v10 }
0x2357   :  { %v2004_v48 = vsel %vm1999_vm12, %v3597_v56, 1e+10  ;;  %v2003_v50 = vsel %vm1998_vm1, %v3601_v15, 1e+10  ;;  %vm5465_vm12 = vmmov %vm5463_vm15 }
0x2358   :  { %v2017_v24 = vsel %vm5461_vm11, %v2004_v48, inf  ;;  %v2014_v8 = vsel %vm5462_vm10, %v2003_v50, inf  ;;  %vm5466_vm1 = vmmov %vm5462_vm10 }
0x2359   :  { %2018 = vmin.xlane.f32.xlu1 %v2017_v24  ;;  %2015 = vmin.xlane.f32.xlu0 %v2014_v8  ;;  %vm5467_vm10 = vmmov %vm5465_vm12 }
0x23d5   :  { %v2010_v61 = vpop.xlane.xlu0 %2009 }
0x23d6   :  { %vm2021_vm13 = vcmp.eq.f32.partialorder %v3578_v16, %v2010_v61  ;;  %v2036_v59 = vsel %vm5463_vm15, %v2010_v61, %v1976_v63 }
0x23d7   :  { %v2026_v28 = vsel %vm2021_vm13, 1e+10, %v1966_v57  ;;  %vm5468_vm13 = vmmov %vm5466_vm1 }
0x23d8   :  { %v2043_v33 = vsel %vm5464_vm14, %v2026_v28, inf }
0x23d9   :  { %2044 = vmin.xlane.f32.xlu1 %v2043_v33 }
0x23da   :  { %v2007_v18 = vpop.xlane.xlu1 %2006 }
0x23db   :  { %vm2020_vm2 = vcmp.eq.f32.partialorder %v3588_v37, %v2007_v18  ;;  %v2035_v12 = vsel %vm5465_vm12, %v2007_v18, %v1975_v55  ;;  %vm5470_vm12 = vmmov %vm5466_vm1 }
0x23dc   :  { %v2025_v1 = vsel %vm2020_vm2, 1e+10, %v1965_v62  ;;  %vm5469_vm2 = vmmov %vm5466_vm1 }
0x23dd   :  { %v2040_v60 = vsel %vm5466_vm1, %v2025_v1, inf }
0x23de   :  { %2041 = vmin.xlane.f32.xlu0 %v2040_v60  ;;  %v2013_v34 = vpop.xlane.xlu1 %2012 }
0x23df   :  { %vm2022_vm11 = vcmp.eq.f32.partialorder %v3585_v40, %v2013_v34  ;;  %v2037_v63 = vsel %vm5467_vm10, %v2013_v34, %v1977_v20  ;;  %vm5472_vm10 = vmmov %vm5469_vm2 }
0x23e0   :  { %v2027_v57 = vsel %vm2022_vm11, 1e+10, %v1967_v45  ;;  %vm5471_vm11 = vcmp.eq.s32.totalorder %v2341_v27, 15 }
0x23e1   :  { %v2046_v22 = vsel %vm5468_vm13, %v2027_v57, inf }
0x23e2   :  { %v4498_v35 = vpop.xlane.xlu0 %2015  ;;  %2047 = vmin.xlane.f32.xlu0 %v2046_v22  ;;  %v4500_v54 = vpop.xlane.xlu1 %2018 }
0x23e3   :  { %vm2023_vm15 = vcmp.eq.f32.partialorder %v3601_v15, %v4498_v35  ;;  %vm2024_vm14 = vcmp.eq.f32.partialorder %v3597_v56, %v4500_v54 }
0x23e4   :  { %v2028_v55 = vsel %vm2023_vm15, 1e+10, %v1968_v47  ;;  %v2029_v62 = vsel %vm2024_vm14, 1e+10, %v1969_v39  ;;  %vm5473_vm15 = vmmov %vm5471_vm11 }
0x23e5   :  { %v2049_v7 = vsel %vm5469_vm2, %v2028_v55, inf  ;;  %v2052_v20 = vsel %vm5470_vm12, %v2029_v62, inf  ;;  %vm5474_vm14 = vmmov %vm5469_vm2 }
0x23e6   :  { %2050 = vmin.xlane.f32.xlu1 %v2049_v7  ;;  %2053 = vmin.xlane.f32.xlu0 %v2052_v20  ;;  %vm5475_vm12 = vmmov %vm5471_vm11 }
0x2462   :  { %v2045_v45 = vpop.xlane.xlu1 %2044 }
0x2463   :  { %vm2056_vm1 = vcmp.le.f32.partialorder %v2026_v28, %v2045_v45  ;;  %v4510_v25 = vsel %vm5471_vm11, %v2045_v45, %v2031_v51 }
0x2464   :  { %v2061_v19 = vsel %vm2056_vm1, %v3578_v16, 1e+10  ;;  %vm5476_vm1 = vmmov %vm5472_vm10 }
0x2465   :  { %v2068_v29 = vsel %vm5472_vm10, %v2061_v19, inf }
0x2466   :  { %2069 = vmin.xlane.f32.xlu0 %v2068_v29 }
0x2467   :  { %v2042_v6 = vpop.xlane.xlu0 %2041 }
0x2468   :  { %vm2055_vm13 = vcmp.le.f32.partialorder %v2025_v1, %v2042_v6  ;;  %v4516_v47 = vsel %vm5473_vm15, %v2042_v6, %v2030_v5  ;;  %vm5478_vm15 = vmmov %vm5476_vm1 }
0x2469   :  { %v2060_v39 = vsel %vm2055_vm13, %v3588_v37, 1e+10  ;;  %vm5477_vm13 = vmmov %vm5476_vm1 }
0x246a   :  { %v2065_v48 = vsel %vm5474_vm14, %v2060_v39, inf }
0x246b   :  { %2066 = vmin.xlane.f32.xlu1 %v2065_v48  ;;  %v2048_v50 = vpop.xlane.xlu0 %2047 }
0x246c   :  { %vm2057_vm2 = vcmp.le.f32.partialorder %v2027_v57, %v2048_v50  ;;  %v4522_v51 = vsel %vm5475_vm12, %v2048_v50, %v2032_v2 }
0x246d   :  { %v2062_v24 = vsel %vm2057_vm2, %v3585_v40, 1e+10  ;;  %vm5479_vm2 = vmmov %vm5475_vm12 }
0x246e   :  { %v2071_v8 = vsel %vm5476_vm1, %v2062_v24, inf  ;;  %vm5480_vm12 = vmmov %vm5476_vm1 }
0x246f   :  { %2072 = vmin.xlane.f32.xlu1 %v2071_v8  ;;  %v4526_v61 = vpop.xlane.xlu0 %2053  ;;  %v4528_v5 = vpop.xlane.xlu1 %2050  ;;  %v5487_v8 = vld [vmem:[#allocation92_spill] sm:$0xff] }
0x2470   :  { %vm2059_vm11 = vcmp.le.f32.partialorder %v2029_v62, %v4526_v61  ;;  %vm2058_vm10 = vcmp.le.f32.partialorder %v2028_v55, %v4528_v5 }
0x2471   :  { %v2064_v33 = vsel %vm2059_vm11, %v3597_v56, 1e+10  ;;  %v2063_v18 = vsel %vm2058_vm10, %v3601_v15, 1e+10  ;;  %vm5481_vm11 = vmmov %vm5479_vm2 }
0x2472   :  { %v2077_v2 = vsel %vm5477_vm13, %v2064_v33, inf  ;;  %v2074_v60 = vsel %vm5478_vm15, %v2063_v18, inf  ;;  %vm5482_vm10 = vmmov %vm5480_vm12  ;;  %v5489_v18 = vld [vmem:[#allocation60_spill] sm:$0xff] }
0x2473   :  { %2078 = vmin.xlane.f32.xlu1 %v2077_v2  ;;  %2075 = vmin.xlane.f32.xlu0 %v2074_v60  ;;  %vm5483_vm15 = vmmov %vm5479_vm2  ;;  %v5493_v60 = vld [vmem:[#allocation101_spill] sm:$0xff] }
0x24ef   :  { %v2070_v34 = vpop.xlane.xlu0 %2069 }
0x24f0   :  { %vm2081_vm14 = vcmp.eq.f32.partialorder %v3578_v16, %v2070_v34  ;;  %v4539_v22 = vsel %vm5479_vm2, %v2070_v34, %v2036_v59 }
0x24f1   :  { %v2086_v7 = vsel %vm2081_vm14, 1e+10, %v2026_v28  ;;  %vm5484_vm14 = vmmov %vm5482_vm10 }
0x24f2   :  { %v2103_v20 = vsel %vm5480_vm12, %v2086_v7, inf }
0x24f3   :  { %2104 = vmin.xlane.f32.xlu1 %v2103_v20  ;;  %v5495_v20 = vld [vmem:[#allocation76_spill] sm:$0xff] }
0x24f4   :  { %v2067_v45 = vpop.xlane.xlu1 %2066 }
0x24f5   :  { %vm2080_vm1 = vcmp.eq.f32.partialorder %v3588_v37, %v2067_v45  ;;  %v4545_v19 = vsel %vm5481_vm11, %v2067_v45, %v2035_v12 }
0x24f6   :  { %v2085_v29 = vsel %vm2080_vm1, 1e+10, %v2025_v1  ;;  %vm5485_vm1 = vmmov %vm5482_vm10 }
0x24f7   :  { %v2100_v6 = vsel %vm5482_vm10, %v2085_v29, inf  ;;  %vm5486_vm11 = vmmov %vm5485_vm1  ;;  %vm5488_vm10 = vcmp.eq.s32.totalorder %v2341_v27, 0 }
0x24f8   :  { %2101 = vmin.xlane.f32.xlu0 %v2100_v6  ;;  %v2073_v39 = vpop.xlane.xlu1 %2072  ;;  %v1193_v33 = vsel %vm5488_vm10, %v5487_v8, 1e+10  ;;  %v5496_v6 = vld [vmem:[#allocation110_spill] sm:$0xff]  ;;  %v5498_v8 = vld [vmem:[#allocation61_spill] sm:$0xff] }
0x24f9   :  { %vm2082_vm13 = vcmp.eq.f32.partialorder %v3585_v40, %v2073_v39  ;;  %v4551_v59 = vsel %vm5483_vm15, %v2073_v39, %v2037_v63  ;;  %vm5492_vm15 = vcmp.eq.s32.totalorder %v2341_v27, 1 }
0x24fa   :  { %v2087_v28 = vsel %vm2082_vm13, 1e+10, %v2027_v57  ;;  %vm5490_vm13 = vmmov %vm5488_vm10 }
0x24fb   :  { %v2106_v48 = vsel %vm5484_vm14, %v2087_v28, inf  ;;  %v1194_v2 = vsel %vm5490_vm13, %v5489_v18, 1e+10  ;;  %vm5494_vm14 = vmmov %vm5492_vm15  ;;  %vm5509_vm13 = vcmp.eq.s32.totalorder %v2341_v27, 9 }
0x24fc   :  { %v4554_v50 = vpop.xlane.xlu0 %2075  ;;  %2107 = vmin.xlane.f32.xlu0 %v2106_v48  ;;  %v4556_v24 = vpop.xlane.xlu1 %2078  ;;  %v1253_v34 = vsel %vm5494_vm14, %v5493_v60, %v1193_v33  ;;  %vm5511_vm14 = vcmp.eq.s32.totalorder %v2341_v27, 10 }
0x24fd   :  { %vm2083_vm2 = vcmp.eq.f32.partialorder %v3601_v15, %v4554_v50  ;;  %vm2084_vm12 = vcmp.eq.f32.partialorder %v3597_v56, %v4556_v24  ;;  %v1313_v39 = vsel %vm363_vm3, %v5496_v6, %v1253_v34 }
0x24fe   :  { %v4562_v12 = vsel %vm2083_vm2, 1e+10, %v2028_v55  ;;  %v4564_v1 = vsel %vm2084_vm12, 1e+10, %v2029_v62  ;;  %v5491_v55 = vld [vmem:[#allocation68_spill] sm:$0xff]  ;;  %v1373_v18 = vsel %vm414_vm4, %v5498_v8, %v1313_v39  ;;  %vm5499_vm12 = vcmp.eq.s32.totalorder %v2341_v27, 16 }
0x24ff   :  { %v2109_v63 = vsel %vm5485_vm1, %v4562_v12, inf  ;;  %v2112_v57 = vsel %vm5486_vm11, %v4564_v1, inf  ;;  %v1254_v62 = vsel %vm5492_vm15, %v5491_v55, %v1194_v2  ;;  %v5500_v2 = vld [vmem:[#allocation69_spill] sm:$0xff]  ;;  %v5504_v39 = vld [vmem:[#allocation103_spill] sm:$0xff]  ;;  %vm5508_vm10 = vmmov %vm5499_vm12 }
0x2500   :  { %2110 = vmin.xlane.f32.xlu1 %v2109_v63  ;;  %2113 = vmin.xlane.f32.xlu0 %v2112_v57  ;;  %v1314_v45 = vsel %vm363_vm3, %v5495_v20, %v1254_v62  ;;  %v5497_v63 = vld [vmem:[#allocation84_spill] sm:$0xff]  ;;  %v5501_v62 = vld [vmem:[#allocation70_spill] sm:$0xff]  ;;  %v5502_v20 = vld [vmem:[#allocation111_spill] sm:$0xff] }
0x2501   :  { %v1374_v57 = vsel %vm414_vm4, %v5497_v63, %v1314_v45  ;;  %v1433_v60 = vsel %vm465_vm5, %v5501_v62, %v1373_v18  ;;  %v5503_v45 = vld [vmem:[#allocation85_spill] sm:$0xff]  ;;  %v5505_v63 = vld [vmem:[#allocation104_spill] sm:$0xff]  ;;  %v5507_v18 = vld [vmem:[#allocation10_spill] sm:$0xff] }
0x2502   :  { %v1434_v55 = vsel %vm465_vm5, %v5500_v2, %v1374_v57  ;;  %vm5510_vm15 = vmmov %vm5509_vm13 }
0x257c   :  { %v2105_v48 = vpop.xlane.xlu1 %2104 }
0x257d   :  { %vm2116_vm2 = vcmp.le.f32.partialorder %v2086_v7, %v2105_v48  ;;  %v2141_v33 = vsel %vm5499_vm12, %v2105_v48, %v4510_v25  ;;  %v1494_v7 = vsel %vm516_vm6, %v5502_v20, %v1434_v55  ;;  %v1493_v25 = vsel %vm516_vm6, %v5503_v45, %v1433_v60  ;;  %vm5513_vm12 = vmmov %vm5485_vm1 }
0x257e   :  { %2151 = vst.msk [vmem:[#allocation2 + $0x8] sm:$0xff] %vm31_vm0, %v2141_v33  ;;  %v2121_v34 = vsel %vm2116_vm2, %v3578_v16, 1e+10  ;;  %v1554_v48 = vsel %vm567_vm7, %v5504_v39, %v1494_v7  ;;  %v1553_v57 = vsel %vm567_vm7, %v5505_v63, %v1493_v25  ;;  %v5506_v16 = vld [vmem:[#allocation19_spill] sm:$0xff]  ;;  %vm5512_vm2 = vmmov %vm5511_vm14  ;;  %v5532_v39 = vld [vmem:[#allocation40_spill] sm:$0xff] }
0x257f   :  { %v2128_v6 = vsel %vm5485_vm1, %v2121_v34, inf  ;;  %v1614_v8 = vsel %vm618_vm8, %v5506_v16, %v1554_v48  ;;  %v1613_v33 = vsel %vm618_vm8, %v5507_v18, %v1553_v57  ;;  %vm5514_vm1 = vcmp.eq.s32.totalorder %v2341_v27, 11  ;;  %v5534_v63 = vld [vmem:[#allocation46_spill] sm:$0xff]  ;;  %v5536_v57 = vld [vmem:[#allocation47_spill] sm:$0xff]  ;;  %v5538_v16 = vld [vmem:[#allocation53_spill] sm:$0xff] }
0x2580   :  { %2129 = vmin.xlane.f32.xlu0 %v2128_v6  ;;  %v1674_v55 = vsel %vm669_vm9, %v4044_v53, %v1614_v8  ;;  %v1673_v62 = vsel %vm669_vm9, %v4046_v58, %v1613_v33  ;;  %v5530_v6 = vld [vmem:[#allocation39_spill] sm:$0xff]  ;;  %v5539_v18 = vld [vmem:[#allocation54_spill] sm:$0xff] }
0x2581   :  { %v2102_v2 = vpop.xlane.xlu0 %2101  ;;  %v1734_v34 = vsel %vm5509_vm13, %v4246_v23, %v1674_v55  ;;  %v1733_v20 = vsel %vm5510_vm15, %v4248_v31, %v1673_v62  ;;  %v5540_v55 = vld [vmem:[#allocation62_spill] sm:$0xff] }
0x2582   :  { %vm2115_vm11 = vcmp.le.f32.partialorder %v2085_v29, %v2102_v2  ;;  %v2140_v60 = vsel %vm5508_vm10, %v2102_v2, %v4516_v47  ;;  %v1794_v58 = vsel %vm5511_vm14, %v4300_v0, %v1734_v34  ;;  %v1793_v47 = vsel %vm5512_vm2, %v4302_v43, %v1733_v20  ;;  %vm5515_vm10 = vmmov %vm5514_vm1 }
0x2583   :  { %2150 = vst.msk [vmem:[#allocation2] sm:$0xff] %vm31_vm0, %v2140_v60  ;;  %v2120_v53 = vsel %vm2115_vm11, %v3588_v37, 1e+10  ;;  %v1854_v23 = vsel %vm5514_vm1, %v4344_v44, %v1794_v58  ;;  %v1853_v31 = vsel %vm5515_vm10, %v4346_v52, %v1793_v47  ;;  %vm5516_vm11 = vcmp.eq.s32.totalorder %v2341_v27, 12  ;;  %v5541_v60 = vld [vmem:[#allocation93_spill] sm:$0xff] }
0x2584   :  { %v2125_v29 = vsel %vm5513_vm12, %v2120_v53, inf  ;;  %v1914_v0 = vsel %vm5516_vm11, %v4388_v41, %v1854_v23  ;;  %vm5517_vm13 = vmmov %vm5516_vm11  ;;  %vm5518_vm14 = vcmp.eq.s32.totalorder %v2341_v27, 16  ;;  %vm5519_vm2 = vcmp.eq.s32.totalorder %v2341_v27, 13  ;;  %v5543_v53 = vld [vmem:[#allocation102_spill] sm:$0xff]  ;;  %v5544_v47 = vld [vmem:[#allocation77_spill] sm:$0xff] }
0x2585   :  { %2126 = vmin.xlane.f32.xlu1 %v2125_v29  ;;  %v2108_v37 = vpop.xlane.xlu0 %2107  ;;  %v1913_v43 = vsel %vm5517_vm13, %v4390_v21, %v1853_v31  ;;  %v1974_v44 = vsel %vm5519_vm2, %v4432_v36, %v1914_v0  ;;  %vm5520_vm12 = vmmov %vm5519_vm2  ;;  %vm5521_vm1 = vcmp.eq.s32.totalorder %v2341_v27, 14  ;;  %vm5523_vm11 = vcmask 277504   ;;  %v5545_v23 = vld [vmem:[#allocation86_spill] sm:$0xff] }
0x2586   :  { %vm2117_vm15 = vcmp.le.f32.partialorder %v2087_v28, %v2108_v37  ;;  %v2142_v7 = vsel %vm5518_vm14, %v2108_v37, %v4522_v51  ;;  %v1973_v52 = vsel %vm5520_vm12, %v4434_v49, %v1913_v43  ;;  %v2034_v21 = vsel %vm5521_vm1, %v4476_v46, %v1974_v44  ;;  %vm5522_vm10 = vmmov %vm5521_vm1  ;;  %v5546_v37 = vld [vmem:[#allocation94_spill] sm:$0xff]  ;;  %v5547_v43 = vld [vmem:[#allocation112_spill] sm:$0xff] }
0x2587   :  { %2152 = vst.msk [vmem:[#allocation2 + $0x10] sm:$0xff] %vm31_vm0, %v2142_v7  ;;  %v2122_v41 = vsel %vm2117_vm15, %v3585_v40, 1e+10  ;;  %v2033_v51 = vsel %vm5522_vm10, %v4478_v10, %v1973_v52  ;;  %vm5524_vm13 = vcmp.eq.s32.totalorder %v2341_v27, 15  ;;  %vm5526_vm2 = vcmp.eq.s32.totalorder %v2341_v27, 16  ;;  %vm5528_vm10 = vmmov %vm5523_vm11  ;;  %v5548_v7 = vld [vmem:[#allocation9_spill] sm:$0xff] }
0x2588   :  { %v2131_v28 = vsel %vm5523_vm11, %v2122_v41, inf  ;;  %v2094_v36 = vsel %vm5524_vm13, %v4526_v61, %v2034_v21  ;;  %vm5525_vm14 = vmmov %vm5524_vm13  ;;  %vm5531_vm13 = vcmp.eq.s32.totalorder %v2341_v27, 0  ;;  %v5549_v52 = vld [vmem:[#allocation11_spill] sm:$0xff]  ;;  %v5550_v21 = vld [vmem:[#allocation12_spill] sm:$0xff] }
0x2589   :  { %v2093_v49 = vsel %vm5525_vm14, %v4528_v5, %v2033_v51  ;;  %2132 = vmin.xlane.f32.xlu1 %v2131_v28  ;;  %v2114_v40 = vpop.xlane.xlu0 %2113  ;;  %v2111_v45 = vpop.xlane.xlu1 %2110  ;;  %vm5527_vm1 = vmmov %vm5526_vm2 }
0x258a   :  { %vm2119_vm15 = vcmp.le.f32.partialorder %v4564_v1, %v2114_v40  ;;  %v2144_v46 = vsel %vm5526_vm2, %v2114_v40, %v2094_v36  ;;  %vm2118_vm12 = vcmp.le.f32.partialorder %v4562_v12, %v2111_v45  ;;  %v2143_v10 = vsel %vm5527_vm1, %v2111_v45, %v2093_v49  ;;  %vm5529_vm11 = vmmov %vm5528_vm10 }
0x258b   :  { %2154 = vst.msk [vmem:[#allocation2 + $0x20] sm:$0xff] %vm31_vm0, %v2144_v46  ;;  %2153 = vst.msk [vmem:[#allocation2 + $0x18] sm:$0xff] %vm31_vm0, %v2143_v10  ;;  %v2124_v61 = vsel %vm2119_vm15, %v3597_v56, 1e+10  ;;  %v2123_v5 = vsel %vm2118_vm12, %v3601_v15, 1e+10 }
0x258c   :  { %v2137_v25 = vsel %vm5528_vm10, %v2124_v61, inf  ;;  %v2134_v1 = vsel %vm5529_vm11, %v2123_v5, inf  ;;  %v1199_v12 = vsel %vm5531_vm13, %v5530_v6, 0.0  ;;  %vm5533_vm14 = vmmov %vm5531_vm13  ;;  %vm5535_vm2 = vcmp.eq.s32.totalorder %v2341_v27, 1 }
0x258d   :  { %2138 = vmin.xlane.f32.xlu1 %v2137_v25  ;;  %2135 = vmin.xlane.f32.xlu0 %v2134_v1  ;;  %v1198_v48 = vsel %vm5533_vm14, %v5532_v39, 0.0  ;;  %vm5537_vm15 = vmmov %vm5535_vm2  ;;  %vm5561_vm13 = vcmp.eq.s32.totalorder %v2341_v27, 13 }
0x258e   :  { %v1258_v56 = vsel %vm5535_vm2, %v5534_v63, %v1198_v48  ;;  %v1259_v15 = vsel %vm5537_vm15, %v5536_v57, %v1199_v12  ;;  %vm5542_vm12 = vmmov %vm5527_vm1  ;;  %vm5563_vm2 = vcmp.eq.s32.totalorder %v2341_v27, 14 }
0x258f   :  { %v1318_v8 = vsel %vm363_vm3, %v5538_v16, %v1258_v56  ;;  %v1319_v33 = vsel %vm363_vm3, %v5539_v18, %v1259_v15  ;;  %vm5551_vm3 = vmmov %vm5527_vm1  ;;  %vm5558_vm1 = vcmp.eq.s32.totalorder %v2341_v27, 12 }
0x2590   :  { %v1378_v62 = vsel %vm414_vm4, %v5540_v55, %v1318_v8  ;;  %v1379_v34 = vsel %vm414_vm4, %v5541_v60, %v1319_v33  ;;  %vm5552_vm4 = vcmp.eq.s32.totalorder %v2341_v27, 9  ;;  %vm5559_vm10 = vmmov %vm5558_vm1 }
0x2591   :  { %v1438_v58 = vsel %vm465_vm5, %v5543_v53, %v1378_v62  ;;  %v1439_v29 = vsel %vm465_vm5, %v5544_v47, %v1379_v34  ;;  %vm5553_vm5 = vmmov %vm5552_vm4 }
0x2592   :  { %v1498_v31 = vsel %vm516_vm6, %v5545_v23, %v1438_v58  ;;  %v1499_v0 = vsel %vm516_vm6, %v5546_v37, %v1439_v29  ;;  %vm5554_vm6 = vcmp.eq.s32.totalorder %v2341_v27, 10  ;;  %vm5560_vm11 = vmmov %vm5551_vm3 }
0x2593   :  { %v1559_v44 = vsel %vm567_vm7, %v5548_v7, %v1499_v0  ;;  %vm5562_vm14 = vmmov %vm5561_vm13 }
0x2594   :  { %v1619_v51 = vsel %vm618_vm8, %v5550_v21, %v1559_v44  ;;  %vm5564_vm15 = vmmov %vm5563_vm2 }
0x2595   :  { %v1679_v49 = vsel %vm669_vm9, %v4160_v38, %v1619_v51 }
0x2596   :  { %v1739_v46 = vsel %vm5553_vm5, %v4278_v32, %v1679_v49 }
0x2609   :  { %v2130_v2 = vpop.xlane.xlu0 %2129 }
0x260a   :  { %v2146_v20 = vsel %vm5542_vm12, %v2130_v2, %v4539_v22  ;;  %v1558_v22 = vsel %vm567_vm7, %v5547_v43, %v1498_v31  ;;  %vm5555_vm7 = vmmov %vm5554_vm6  ;;  %vm5565_vm12 = vcmp.eq.s32.totalorder %v2341_v27, 15 }
0x260b   :  { %2156 = vst.msk [vmem:[#allocation3 + $0x8] sm:$0xff] %vm31_vm0, %v2146_v20  ;;  %v1618_v41 = vsel %vm618_vm8, %v5549_v52, %v1558_v22  ;;  %v1799_v38 = vsel %vm5555_vm7, %v4324_v13, %v1739_v46  ;;  %vm5556_vm8 = vcmp.eq.s32.totalorder %v2341_v27, 11 }
0x260c   :  { %v1678_v36 = vsel %vm669_vm9, %v4158_v26, %v1618_v41  ;;  %vm5557_vm9 = vmmov %vm5556_vm8 }
0x260d   :  { %v1738_v45 = vsel %vm5552_vm4, %v4276_v4, %v1678_v36  ;;  %v1859_v4 = vsel %vm5557_vm9, %v4368_v9, %v1799_v38  ;;  %vm5567_vm4 = vmmov %vm5560_vm11 }
0x260e   :  { %v2127_v28 = vpop.xlane.xlu1 %2126  ;;  %v1798_v26 = vsel %vm5554_vm6, %v4322_v30, %v1738_v45  ;;  %v1919_v30 = vsel %vm5559_vm10, %v4412_v42, %v1859_v4  ;;  %vm5568_vm5 = vmmov %vm5567_vm4 }
0x260f   :  { %v2145_v40 = vsel %vm5551_vm3, %v2127_v28, %v4545_v19  ;;  %v1858_v19 = vsel %vm5556_vm8, %v4366_v3, %v1798_v26  ;;  %v1979_v9 = vsel %vm5562_vm14, %v4456_v11, %v1919_v30  ;;  %vm5566_vm3 = vmmov %vm5565_vm12 }
0x2610   :  { %2155 = vst.msk [vmem:[#allocation3] sm:$0xff] %vm31_vm0, %v2145_v40  ;;  %v1918_v32 = vsel %vm5558_vm1, %v4410_v14, %v1858_v19  ;;  %v2039_v42 = vsel %vm5564_vm15, %v4500_v54, %v1979_v9 }
0x2611   :  { %v1978_v3 = vsel %vm5561_vm13, %v4454_v17, %v1918_v32  ;;  %v2099_v17 = vsel %vm5566_vm3, %v4556_v24, %v2039_v42 }
0x2612   :  { %v2133_v10 = vpop.xlane.xlu1 %2132  ;;  %v2038_v14 = vsel %vm5563_vm2, %v4498_v35, %v1978_v3 }
0x2613   :  { %v2147_v13 = vsel %vm5560_vm11, %v2133_v10, %v4551_v59  ;;  %v2098_v59 = vsel %vm5565_vm12, %v4554_v50, %v2038_v14 }
0x2614   :  { %2157 = vst.msk [vmem:[#allocation3 + $0x10] sm:$0xff] %vm31_vm0, %v2147_v13 }
0x2616   :  { %v2136_v61 = vpop.xlane.xlu0 %2135  ;;  %v2139_v11 = vpop.xlane.xlu1 %2138 }
0x2617   :  { %v2148_v5 = vsel %vm5567_vm4, %v2136_v61, %v2098_v59  ;;  %v2149_v35 = vsel %vm5568_vm5, %v2139_v11, %v2099_v17 }
0x2618   :  { %2158 = vst.msk [vmem:[#allocation3 + $0x18] sm:$0xff] %vm31_vm0, %v2148_v5  ;;  %2159 = vst.msk [vmem:[#allocation3 + $0x20] sm:$0xff] %vm31_vm0, %v2149_v35 }
0x2619 PF:  { %v2163_v54 = vld [vmem:[#allocation2] sm:$0xff]  ;;  %v2164_v25 = vld [vmem:[#allocation2 + $0x8] sm:$0xff]  ;;  %v2165_v50 = vld [vmem:[#allocation2 + $0x10] sm:$0xff] }
0x261a   :  { %2169 = vst.msk [vmem:[%s4858_s8] sm:$0xff] %vm31_vm0, %v2163_v54  ;;  %2170 = vst.msk [vmem:[%s4858_s8 + $0x8] sm:$0xff] %vm31_vm0, %v2164_v25  ;;  %v2166_v27 = vld [vmem:[#allocation2 + $0x18] sm:$0xff]  ;;  %v2167_v24 = vld [vmem:[#allocation2 + $0x20] sm:$0xff] }
0x261b   :  { %2171 = vst.msk [vmem:[%s4858_s8 + $0x10] sm:$0xff] %vm31_vm0, %v2165_v50  ;;  %v2174_v1 = vld [vmem:[#allocation3] sm:$0xff]  ;;  %2172 = vst.msk [vmem:[%s4858_s8 + $0x18] sm:$0xff] %vm31_vm0, %v2166_v27  ;;  %v2175_v12 = vld [vmem:[#allocation3 + $0x8] sm:$0xff] }
0x261c   :  { %2173 = vst.msk [vmem:[%s4858_s8 + $0x20] sm:$0xff] %vm31_vm0, %v2167_v24  ;;  %v2198_v6 = vtrunc.f32 %v2174_v1  ;;  %v2176_v39 = vld [vmem:[#allocation3 + $0x10] sm:$0xff]  ;;  %v2200_v63 = vtrunc.f32 %v2175_v12 }
0x261d   :  { %v2202_v56 = vtrunc.f32 %v2176_v39 }
0x261e   :  { %v2199_v16 = vcvt.f32.s32 %v2198_v6  ;;  %v2201_v18 = vcvt.f32.s32 %v2200_v63 }
0x261f   :  { %v2177_v48 = vld [vmem:[#allocation3 + $0x18] sm:$0xff]  ;;  %v2178_v15 = vld [vmem:[#allocation3 + $0x20] sm:$0xff]  ;;  %v2203_v33 = vcvt.f32.s32 %v2202_v56 }
0x2620   :  { %v2204_v57 = vtrunc.f32 %v2177_v48  ;;  %v2206_v8 = vtrunc.f32 %v2178_v15  ;;  %2184 = vst.msk [vmem:[%s4859_s9] sm:$0xff] %vm31_vm0, %v2199_v16  ;;  %2185 = vst.msk [vmem:[%s4859_s9 + $0x8] sm:$0xff] %vm31_vm0, %v2201_v18 }
0x2621   :  { %2186 = vst.msk [vmem:[%s4859_s9 + $0x10] sm:$0xff] %vm31_vm0, %v2203_v33 }
0x2622   :  { %v2205_v2 = vcvt.f32.s32 %v2204_v57  ;;  %v2207_v55 = vcvt.f32.s32 %v2206_v8 }
0x2624   :  { %2187 = vst.msk [vmem:[%s4859_s9 + $0x18] sm:$0xff] %vm31_vm0, %v2205_v2  ;;  %2188 = vst.msk [vmem:[%s4859_s9 + $0x20] sm:$0xff] %vm31_vm0, %v2207_v55 }

</bundles_post_ra>
